<compile_context>
chip_gen: v7x
topology: tpu7x:2x2x1
jax: 0.10.0
libtpu: 0.0.40
codegen_flags: <defaults>
</compile_context>

<pallas_src>
import math
import jax
import jax.numpy as jnp
from jax.experimental import pallas as pl
from jax.experimental.pallas import tpu as pltpu

# ----- config (stands in for the `con` module) -----
PATCH = 4            # con.patch_size
IMG = 16             # img_size
CHANNELS = 3
FLATTEN = CHANNELS * PATCH * PATCH          # con.flatten_size
HIDDEN = 32          # Hidden_dim
HEADS = 4            # num_heads
ENCODER_ITER = 2     # con.Encoder_iter
NUM_CLASSES = 10     # con.num_classes
MLP_RATIO = 4
LN_EPS = 1e-5
N_PATCHES = (IMG // PATCH) ** 2
SEQ = N_PATCHES + 1
PAD_CLASSES = 128    # lane-dense head output (sliced back to NUM_CLASSES)


# ---------------------------------------------------------------- utilities
def _layernorm(x, g, b):
    mu = jnp.mean(x, axis=-1, keepdims=True)
    var = jnp.mean(jnp.square(x - mu), axis=-1, keepdims=True)
    return (x - mu) * jax.lax.rsqrt(var + LN_EPS) * g + b


def image_split(x, p):
    # (B, C, H, W) -> (B, N, C*p*p)   (plain-JAX layout glue, no compute)
    B, C, H, W = x.shape
    x = x.reshape(B, C, H // p, p, W // p, p)
    x = x.transpose(0, 2, 4, 1, 3, 5)           # (B, Hp, Wp, C, p, p)
    return x.reshape(B, (H // p) * (W // p), C * p * p)


def _full_spec(shape):
    # whole-array block, grid=(1,)
    return pl.BlockSpec(shape, lambda b, _s=len(shape): (0,) * _s)


# ---------------------------------------------------------------- fused kernel
def _vit_kernel(patches_ref, base_ref, mask_ref, proj_w_ref,
                ln1g_ref, ln1b_ref, wqkv_ref, bqkv_ref, wo_ref, bo_ref,
                ln2g_ref, ln2b_ref, w1_ref, b1_ref, w2_ref, b2_ref,
                hln_g_ref, hln_b_ref, hw_ref, hb_ref, o_ref):
    T, D = base_ref.shape                 # T = B*SEQ (batch folded into sublanes)
    B = o_ref.shape[0]
    H = HEADS
    Dh = D // H
    scale = 1.0 / math.sqrt(Dh)
    bf = jnp.bfloat16
    f32 = jnp.float32

    # --- patch embedding ---------------------------------------------------
    # `base` already contains pos-embedding + proj bias (patch rows) and
    # cls-token + pos[0] (cls rows, whose patch rows were zero-padded).
    x = jnp.dot(patches_ref[...], proj_w_ref[...],
                preferred_element_type=f32) + base_ref[...]          # (T, D) f32

    mask = mask_ref[...]                  # (T, T) additive block-diagonal mask

    # --- encoder layers (weights stacked on leading axis, static unroll) ----
    for l in range(ENCODER_ITER):
        # MHSA (pre-norm); QKV fused into a single (D, 3D) matmul
        xn = _layernorm(x, ln1g_ref[l], ln1b_ref[l]).astype(bf)
        qkv = jnp.dot(xn, wqkv_ref[l],
                      preferred_element_type=f32) + bqkv_ref[l]      # (T, 3D) f32

        # heads -> leading batch axis: (H, T, Dh) via static lane slices
        q_h = jnp.stack([qkv[:,         h * Dh:        (h + 1) * Dh] for h in range(H)], axis=0)
        k_h = jnp.stack([qkv[:, D     + h * Dh:D     + (h + 1) * Dh] for h in range(H)], axis=0)
        v_h = jnp.stack([qkv[:, 2 * D + h * Dh:2 * D + (h + 1) * Dh] for h in range(H)], axis=0)

        # one batched dot over heads (no materialized k.T), f32 for the tiny dims
        s = jnp.einsum('hqd,hkd->hqk', q_h, k_h,
                       preferred_element_type=f32) * scale           # (H, T, T)
        s = s + mask[None]                                           # block-diag batch mask
        s = s - jnp.max(s, axis=-1, keepdims=True)
        e = jnp.exp(s)
        p = e * pl.reciprocal(jnp.sum(e, axis=-1, keepdims=True), approx=True)
        ctx = jnp.einsum('hqk,hkd->hqd', p, v_h,
                         preferred_element_type=f32)                 # (H, T, Dh)
        attn = jnp.concatenate([ctx[h] for h in range(H)], axis=-1).astype(bf)  # (T, D)
        x = x + jnp.dot(attn, wo_ref[l], preferred_element_type=f32) + bo_ref[l]

        # MLP (pre-norm)
        xn2 = _layernorm(x, ln2g_ref[l], ln2b_ref[l]).astype(bf)
        h1 = jnp.dot(xn2, w1_ref[l], preferred_element_type=f32) + b1_ref[l]
        # TODO(synk): torch nn.GELU defaults to exact (erf) GELU; tanh approx used here.
        h1 = jax.nn.gelu(h1, approximate=True).astype(bf)
        x = x + jnp.dot(h1, w2_ref[l], preferred_element_type=f32) + b2_ref[l]

    # --- classification head: LN(cls rows) @ W_head (lane-padded to 128) ----
    cls_tok = jnp.concatenate([x[b * SEQ:b * SEQ + 1, :] for b in range(B)], axis=0)  # (B, D)
    cls_n = _layernorm(cls_tok, hln_g_ref[...], hln_b_ref[...]).astype(bf)
    o_ref[...] = jnp.dot(cls_n, hw_ref[...],
                         preferred_element_type=f32) + hb_ref[...]   # (B, 128)


# ---------------------------------------------------------------- model
def init_params(key):
    D, F, Dm, C = HIDDEN, FLATTEN, MLP_RATIO * HIDDEN, NUM_CLASSES
    keys = jax.random.split(key, 8 + ENCODER_ITER)
    nrm = lambda k, shape, s=0.02: (s * jax.random.normal(k, shape)).astype(jnp.float32)

    params = {
        'proj_w': nrm(keys[0], (F, D)),
        'proj_b': jnp.zeros((1, D), jnp.float32),
        'cls':    nrm(keys[1], (1, D), 1.0),
        'pos':    nrm(keys[2], (SEQ, D), 1.0),
        'head_ln_g': jnp.ones((1, D), jnp.float32),
        'head_ln_b': jnp.zeros((1, D), jnp.float32),
        'head_w': nrm(keys[3], (D, C)),
        'head_b': jnp.zeros((1, C), jnp.float32),
        'encoders': [],
    }
    for i in range(ENCODER_ITER):
        ek = jax.random.split(keys[8 + i], 6)
        params['encoders'].append({
            'ln1_g': jnp.ones((1, D), jnp.float32),
            'ln1_b': jnp.zeros((1, D), jnp.float32),
            'wq': nrm(ek[0], (D, D)), 'bq': jnp.zeros((1, D), jnp.float32),
            'wk': nrm(ek[1], (D, D)), 'bk': jnp.zeros((1, D), jnp.float32),
            'wv': nrm(ek[2], (D, D)), 'bv': jnp.zeros((1, D), jnp.float32),
            'wo': nrm(ek[3], (D, D)), 'bo': jnp.zeros((1, D), jnp.float32),
            'ln2_g': jnp.ones((1, D), jnp.float32),
            'ln2_b': jnp.zeros((1, D), jnp.float32),
            'w1': nrm(ek[4], (D, Dm)), 'b1': jnp.zeros((1, Dm), jnp.float32),
            'w2': nrm(ek[5], (Dm, D)), 'b2': jnp.zeros((1, D), jnp.float32),
        })
    return params


def vit_forward(x, params):
    B = x.shape[0]
    D, F, L, Dm = HIDDEN, FLATTEN, ENCODER_ITER, MLP_RATIO * HIDDEN
    T = B * SEQ
    bf = jnp.bfloat16

    # ---- layout plumbing (plain JAX, tiny) ----
    patches = image_split(x, PATCH).astype(jnp.float32)                    # (B, N, F)
    # zero row at the cls slot so the fused in-kernel projection contributes 0 there
    patches = jnp.concatenate([jnp.zeros((B, 1, F), jnp.float32), patches], axis=1)
    patches = patches.reshape(T, F)                                        # fold batch

    # base = pos + proj bias on patch rows; pos[0] + cls on cls rows
    base = params['pos'] + params['proj_b']                                # (SEQ, D)
    base = base.at[0].set(params['pos'][0] + params['cls'][0])
    base = jnp.tile(base, (B, 1))                                          # (T, D)

    # additive block-diagonal mask: folded batches must not attend to each other
    bid = jnp.repeat(jnp.arange(B), SEQ)
    mask = jnp.where(bid[:, None] == bid[None, :], 0.0, -1e30).astype(jnp.float32)

    # stack per-layer weights on a leading axis (bf16 for MXU operands)
    enc = params['encoders']
    stack = lambda k: jnp.stack([e[k] for e in enc], axis=0)
    ln1g, ln1b = stack('ln1_g'), stack('ln1_b')                            # (L, 1, D)
    wqkv = jnp.stack([jnp.concatenate([e['wq'], e['wk'], e['wv']], axis=1)
                      for e in enc], axis=0).astype(bf)                    # (L, D, 3D)
    bqkv = jnp.stack([jnp.concatenate([e['bq'], e['bk'], e['bv']], axis=1)
                      for e in enc], axis=0)                               # (L, 1, 3D)
    wo, bo = stack('wo').astype(bf), stack('bo')
    ln2g, ln2b = stack('ln2_g'), stack('ln2_b')
    w1, b1 = stack('w1').astype(bf), stack('b1')
    w2, b2 = stack('w2').astype(bf), stack('b2')

    # lane-dense classifier: pad (D, C) -> (D, 128)
    head_w = jnp.zeros((D, PAD_CLASSES), jnp.float32)\
        .at[:, :NUM_CLASSES].set(params['head_w']).astype(bf)
    head_b = jnp.zeros((1, PAD_CLASSES), jnp.float32)\
        .at[:, :NUM_CLASSES].set(params['head_b'])
    proj_w = params['proj_w'].astype(bf)

    out = pl.pallas_call(
        _vit_kernel,
        out_shape=jax.ShapeDtypeStruct((B, PAD_CLASSES), jnp.float32),
        grid_spec=pltpu.PrefetchScalarGridSpec(
            num_scalar_prefetch=0, grid=(1,),
            in_specs=[
                _full_spec((T, F)), _full_spec((T, D)), _full_spec((T, T)),
                _full_spec((F, D)),
                _full_spec((L, 1, D)), _full_spec((L, 1, D)),              # ln1
                _full_spec((L, D, 3 * D)), _full_spec((L, 1, 3 * D)),      # qkv
                _full_spec((L, D, D)), _full_spec((L, 1, D)),              # out proj
                _full_spec((L, 1, D)), _full_spec((L, 1, D)),              # ln2
                _full_spec((L, D, Dm)), _full_spec((L, 1, Dm)),            # mlp1
                _full_spec((L, Dm, D)), _full_spec((L, 1, D)),             # mlp2
                _full_spec((1, D)), _full_spec((1, D)),                    # head ln
                _full_spec((D, PAD_CLASSES)), _full_spec((1, PAD_CLASSES)),# head
            ],
            out_specs=_full_spec((B, PAD_CLASSES))),
        compiler_params=pltpu.CompilerParams(dimension_semantics=("arbitrary",)),
    )(patches.astype(bf), base, mask, proj_w,
      ln1g, ln1b, wqkv, bqkv, wo, bo, ln2g, ln2b, w1, b1, w2, b2,
      params['head_ln_g'], params['head_ln_b'], head_w, head_b)

    return out[:, :NUM_CLASSES]                                            # (B, num_classes)


if __name__ == "__main__":
    key = jax.random.PRNGKey(0)
    pkey, xkey = jax.random.split(key)
    params = init_params(pkey)
    x = jax.random.normal(xkey, (2, CHANNELS, IMG, IMG), dtype=jnp.float32)
    fwd = jax.jit(vit_forward)
    out = fwd(x, params)
    out = jax.block_until_ready(out)
    assert out.shape == (2, NUM_CLASSES)
    assert bool(jnp.all(jnp.isfinite(out)))
    print("KERNEL_OK")
</pallas_src>

<mosaic_0001>
module attributes {stable_mosaic.version = 11 : i64} {
  func.func @_vit_kernel(%arg0: i32, %arg1: memref<34x48xbf16, #tpu.memory_space<vmem>>, %arg2: memref<34x32xf32, #tpu.memory_space<vmem>>, %arg3: memref<34x34xf32, #tpu.memory_space<vmem>>, %arg4: memref<48x32xbf16, #tpu.memory_space<vmem>>, %arg5: memref<2x1x32xf32, #tpu.memory_space<vmem>>, %arg6: memref<2x1x32xf32, #tpu.memory_space<vmem>>, %arg7: memref<2x32x96xbf16, #tpu.memory_space<vmem>>, %arg8: memref<2x1x96xf32, #tpu.memory_space<vmem>>, %arg9: memref<2x32x32xbf16, #tpu.memory_space<vmem>>, %arg10: memref<2x1x32xf32, #tpu.memory_space<vmem>>, %arg11: memref<2x1x32xf32, #tpu.memory_space<vmem>>, %arg12: memref<2x1x32xf32, #tpu.memory_space<vmem>>, %arg13: memref<2x32x128xbf16, #tpu.memory_space<vmem>>, %arg14: memref<2x1x128xf32, #tpu.memory_space<vmem>>, %arg15: memref<2x128x32xbf16, #tpu.memory_space<vmem>>, %arg16: memref<2x1x32xf32, #tpu.memory_space<vmem>>, %arg17: memref<1x32xf32, #tpu.memory_space<vmem>>, %arg18: memref<1x32xf32, #tpu.memory_space<vmem>>, %arg19: memref<32x128xbf16, #tpu.memory_space<vmem>>, %arg20: memref<1x128xf32, #tpu.memory_space<vmem>>, %arg21: memref<2x128xf32, #tpu.memory_space<vmem>>) attributes {dimension_semantics = [#tpu.dimension_semantics<arbitrary>], iteration_bounds = array<i64: 1>, scalar_prefetch = 0 : i64, scratch_operands = 0 : i64, tpu.core_type = #tpu.core_type<tc>, window_params = [{pipeline_mode = #tpu.pipeline_mode<synchronous>, transform_indices = @transform_0, window_bounds = array<i64: 34, 48>}, {pipeline_mode = #tpu.pipeline_mode<synchronous>, transform_indices = @transform_1, window_bounds = array<i64: 34, 32>}, {pipeline_mode = #tpu.pipeline_mode<synchronous>, transform_indices = @transform_2, window_bounds = array<i64: 34, 34>}, {pipeline_mode = #tpu.pipeline_mode<synchronous>, transform_indices = @transform_3, window_bounds = array<i64: 48, 32>}, {pipeline_mode = #tpu.pipeline_mode<synchronous>, transform_indices = @transform_4, window_bounds = array<i64: 2, 1, 32>}, {pipeline_mode = #tpu.pipeline_mode<synchronous>, transform_indices = @transform_5, window_bounds = array<i64: 2, 1, 32>}, {pipeline_mode = #tpu.pipeline_mode<synchronous>, transform_indices = @transform_6, window_bounds = array<i64: 2, 32, 96>}, {pipeline_mode = #tpu.pipeline_mode<synchronous>, transform_indices = @transform_7, window_bounds = array<i64: 2, 1, 96>}, {pipeline_mode = #tpu.pipeline_mode<synchronous>, transform_indices = @transform_8, window_bounds = array<i64: 2, 32, 32>}, {pipeline_mode = #tpu.pipeline_mode<synchronous>, transform_indices = @transform_9, window_bounds = array<i64: 2, 1, 32>}, {pipeline_mode = #tpu.pipeline_mode<synchronous>, transform_indices = @transform_10, window_bounds = array<i64: 2, 1, 32>}, {pipeline_mode = #tpu.pipeline_mode<synchronous>, transform_indices = @transform_11, window_bounds = array<i64: 2, 1, 32>}, {pipeline_mode = #tpu.pipeline_mode<synchronous>, transform_indices = @transform_12, window_bounds = array<i64: 2, 32, 128>}, {pipeline_mode = #tpu.pipeline_mode<synchronous>, transform_indices = @transform_13, window_bounds = array<i64: 2, 1, 128>}, {pipeline_mode = #tpu.pipeline_mode<synchronous>, transform_indices = @transform_14, window_bounds = array<i64: 2, 128, 32>}, {pipeline_mode = #tpu.pipeline_mode<synchronous>, transform_indices = @transform_15, window_bounds = array<i64: 2, 1, 32>}, {pipeline_mode = #tpu.pipeline_mode<synchronous>, transform_indices = @transform_16, window_bounds = array<i64: 1, 32>}, {pipeline_mode = #tpu.pipeline_mode<synchronous>, transform_indices = @transform_17, window_bounds = array<i64: 1, 32>}, {pipeline_mode = #tpu.pipeline_mode<synchronous>, transform_indices = @transform_18, window_bounds = array<i64: 32, 128>}, {pipeline_mode = #tpu.pipeline_mode<synchronous>, transform_indices = @transform_19, window_bounds = array<i64: 1, 128>}, {pipeline_mode = #tpu.pipeline_mode<synchronous>, transform_indices = @transform_20, window_bounds = array<i64: 2, 128>}]} {
    %c0 = arith.constant 0 : index
    %c0_0 = arith.constant 0 : index
    %0 = vector.load %arg1[%c0, %c0_0] : memref<34x48xbf16, #tpu.memory_space<vmem>>, vector<34x48xbf16>
    %c0_1 = arith.constant 0 : index
    %c0_2 = arith.constant 0 : index
    %1 = vector.load %arg4[%c0_1, %c0_2] : memref<48x32xbf16, #tpu.memory_space<vmem>>, vector<48x32xbf16>
    %cst = arith.constant dense<0.000000e+00> : vector<34x32xf32>
    %2 = tpu.matmul %0, %1, %cst {dimension_numbers = #tpu.dot_dimension_numbers<[1], [0], [0], [1], [0, 0, 1, 1], [], []>} : vector<34x48xbf16>, vector<48x32xbf16>, vector<34x32xf32> -> vector<34x32xf32>
    %c0_3 = arith.constant 0 : index
    %c0_4 = arith.constant 0 : index
    %3 = vector.load %arg2[%c0_3, %c0_4] : memref<34x32xf32, #tpu.memory_space<vmem>>, vector<34x32xf32>
    %4 = arith.addf %2, %3 : vector<34x32xf32>
    %c0_5 = arith.constant 0 : index
    %c0_6 = arith.constant 0 : index
    %5 = vector.load %arg3[%c0_5, %c0_6] : memref<34x34xf32, #tpu.memory_space<vmem>>, vector<34x34xf32>
    %c0_7 = arith.constant 0 : index
    %c0_8 = arith.constant 0 : index
    %c0_9 = arith.constant 0 : index
    %6 = vector.load %arg5[%c0_7, %c0_8, %c0_9] : memref<2x1x32xf32, #tpu.memory_space<vmem>>, vector<1x1x32xf32>
    %7 = vector.shape_cast %6 : vector<1x1x32xf32> to vector<1x32xf32>
    %c0_10 = arith.constant 0 : index
    %c0_11 = arith.constant 0 : index
    %c0_12 = arith.constant 0 : index
    %8 = vector.load %arg6[%c0_10, %c0_11, %c0_12] : memref<2x1x32xf32, #tpu.memory_space<vmem>>, vector<1x1x32xf32>
    %9 = vector.shape_cast %8 : vector<1x1x32xf32> to vector<1x32xf32>
    %cst_13 = arith.constant dense<0.000000e+00> : vector<34xf32>
    %10 = vector.multi_reduction <add>, %4, %cst_13 [1] : vector<34x32xf32> to vector<34xf32>
    %11 = vector.shape_cast %10 : vector<34xf32> to vector<34x1xf32>
    %cst_14 = arith.constant 3.200000e+01 : f32
    %12 = vector.broadcast %cst_14 : f32 to vector<34x1xf32>
    %13 = arith.divf %11, %12 : vector<34x1xf32>
    %14 = vector.broadcast %13 : vector<34x1xf32> to vector<34x32xf32>
    %15 = arith.subf %4, %14 : vector<34x32xf32>
    %16 = arith.mulf %15, %15 : vector<34x32xf32>
    %cst_15 = arith.constant dense<0.000000e+00> : vector<34xf32>
    %17 = vector.multi_reduction <add>, %16, %cst_15 [1] : vector<34x32xf32> to vector<34xf32>
    %18 = vector.shape_cast %17 : vector<34xf32> to vector<34x1xf32>
    %cst_16 = arith.constant 3.200000e+01 : f32
    %19 = vector.broadcast %cst_16 : f32 to vector<34x1xf32>
    %20 = arith.divf %18, %19 : vector<34x1xf32>
    %21 = vector.broadcast %13 : vector<34x1xf32> to vector<34x32xf32>
    %22 = arith.subf %4, %21 : vector<34x32xf32>
    %cst_17 = arith.constant 9.99999974E-6 : f32
    %23 = vector.broadcast %cst_17 : f32 to vector<34x1xf32>
    %24 = arith.addf %20, %23 : vector<34x1xf32>
    %25 = math.rsqrt %24 : vector<34x1xf32>
    %26 = vector.broadcast %25 : vector<34x1xf32> to vector<34x32xf32>
    %27 = arith.mulf %22, %26 : vector<34x32xf32>
    %28 = vector.broadcast %7 : vector<1x32xf32> to vector<34x32xf32>
    %29 = arith.mulf %27, %28 : vector<34x32xf32>
    %30 = vector.broadcast %9 : vector<1x32xf32> to vector<34x32xf32>
    %31 = arith.addf %29, %30 : vector<34x32xf32>
    %32 = arith.truncf %31 : vector<34x32xf32> to vector<34x32xbf16>
    %c0_18 = arith.constant 0 : index
    %c0_19 = arith.constant 0 : index
    %c0_20 = arith.constant 0 : index
    %33 = vector.load %arg7[%c0_18, %c0_19, %c0_20] : memref<2x32x96xbf16, #tpu.memory_space<vmem>>, vector<1x32x96xbf16>
    %34 = vector.shape_cast %33 : vector<1x32x96xbf16> to vector<32x96xbf16>
    %cst_21 = arith.constant dense<0.000000e+00> : vector<34x96xf32>
    %35 = tpu.matmul %32, %34, %cst_21 {dimension_numbers = #tpu.dot_dimension_numbers<[1], [0], [0], [1], [0, 0, 1, 1], [], []>} : vector<34x32xbf16>, vector<32x96xbf16>, vector<34x96xf32> -> vector<34x96xf32>
    %c0_22 = arith.constant 0 : index
    %c0_23 = arith.constant 0 : index
    %c0_24 = arith.constant 0 : index
    %36 = vector.load %arg8[%c0_22, %c0_23, %c0_24] : memref<2x1x96xf32, #tpu.memory_space<vmem>>, vector<1x1x96xf32>
    %37 = vector.shape_cast %36 : vector<1x1x96xf32> to vector<1x96xf32>
    %38 = vector.broadcast %37 : vector<1x96xf32> to vector<34x96xf32>
    %39 = arith.addf %35, %38 : vector<34x96xf32>
    %40 = vector.extract_strided_slice %39 {offsets = [0, 0], sizes = [34, 8], strides = [1, 1]} : vector<34x96xf32> to vector<34x8xf32>
    %41 = vector.extract_strided_slice %39 {offsets = [0, 8], sizes = [34, 8], strides = [1, 1]} : vector<34x96xf32> to vector<34x8xf32>
    %42 = vector.extract_strided_slice %39 {offsets = [0, 16], sizes = [34, 8], strides = [1, 1]} : vector<34x96xf32> to vector<34x8xf32>
    %43 = vector.extract_strided_slice %39 {offsets = [0, 24], sizes = [34, 8], strides = [1, 1]} : vector<34x96xf32> to vector<34x8xf32>
    %44 = vector.shape_cast %40 : vector<34x8xf32> to vector<1x34x8xf32>
    %45 = vector.shape_cast %41 : vector<34x8xf32> to vector<1x34x8xf32>
    %46 = vector.shape_cast %42 : vector<34x8xf32> to vector<1x34x8xf32>
    %47 = vector.shape_cast %43 : vector<34x8xf32> to vector<1x34x8xf32>
    %48 = tpu.concatenate %44, %45, %46, %47 in 0 : vector<1x34x8xf32>, vector<1x34x8xf32>, vector<1x34x8xf32>, vector<1x34x8xf32> -> vector<4x34x8xf32>
    %49 = vector.extract_strided_slice %39 {offsets = [0, 32], sizes = [34, 8], strides = [1, 1]} : vector<34x96xf32> to vector<34x8xf32>
    %50 = vector.extract_strided_slice %39 {offsets = [0, 40], sizes = [34, 8], strides = [1, 1]} : vector<34x96xf32> to vector<34x8xf32>
    %51 = vector.extract_strided_slice %39 {offsets = [0, 48], sizes = [34, 8], strides = [1, 1]} : vector<34x96xf32> to vector<34x8xf32>
    %52 = vector.extract_strided_slice %39 {offsets = [0, 56], sizes = [34, 8], strides = [1, 1]} : vector<34x96xf32> to vector<34x8xf32>
    %53 = vector.shape_cast %49 : vector<34x8xf32> to vector<1x34x8xf32>
    %54 = vector.shape_cast %50 : vector<34x8xf32> to vector<1x34x8xf32>
    %55 = vector.shape_cast %51 : vector<34x8xf32> to vector<1x34x8xf32>
    %56 = vector.shape_cast %52 : vector<34x8xf32> to vector<1x34x8xf32>
    %57 = tpu.concatenate %53, %54, %55, %56 in 0 : vector<1x34x8xf32>, vector<1x34x8xf32>, vector<1x34x8xf32>, vector<1x34x8xf32> -> vector<4x34x8xf32>
    %58 = vector.extract_strided_slice %39 {offsets = [0, 64], sizes = [34, 8], strides = [1, 1]} : vector<34x96xf32> to vector<34x8xf32>
    %59 = vector.extract_strided_slice %39 {offsets = [0, 72], sizes = [34, 8], strides = [1, 1]} : vector<34x96xf32> to vector<34x8xf32>
    %60 = vector.extract_strided_slice %39 {offsets = [0, 80], sizes = [34, 8], strides = [1, 1]} : vector<34x96xf32> to vector<34x8xf32>
    %61 = vector.extract_strided_slice %39 {offsets = [0, 88], sizes = [34, 8], strides = [1, 1]} : vector<34x96xf32> to vector<34x8xf32>
    %62 = vector.shape_cast %58 : vector<34x8xf32> to vector<1x34x8xf32>
    %63 = vector.shape_cast %59 : vector<34x8xf32> to vector<1x34x8xf32>
    %64 = vector.shape_cast %60 : vector<34x8xf32> to vector<1x34x8xf32>
    %65 = vector.shape_cast %61 : vector<34x8xf32> to vector<1x34x8xf32>
    %66 = tpu.concatenate %62, %63, %64, %65 in 0 : vector<1x34x8xf32>, vector<1x34x8xf32>, vector<1x34x8xf32>, vector<1x34x8xf32> -> vector<4x34x8xf32>
    "tpu.trace_start"() <{level = 10 : i32, message = "hqd,hkd->hqk"}> : () -> ()
    %cst_25 = arith.constant dense<0.000000e+00> : vector<4x34x34xf32>
    %67 = tpu.matmul %48, %57, %cst_25 {dimension_numbers = #tpu.dot_dimension_numbers<[2], [2], [1], [1], [0, 0, 0, 1, 1, 1], [0], [0]>} : vector<4x34x8xf32>, vector<4x34x8xf32>, vector<4x34x34xf32> -> vector<4x34x34xf32>
    "tpu.trace_stop"() : () -> ()
    %cst_26 = arith.constant 0.353553385 : f32
    %68 = vector.broadcast %cst_26 : f32 to vector<4x34x34xf32>
    %69 = arith.mulf %67, %68 : vector<4x34x34xf32>
    %70 = vector.shape_cast %5 : vector<34x34xf32> to vector<1x34x34xf32>
    %71 = vector.broadcast %70 : vector<1x34x34xf32> to vector<4x34x34xf32>
    %72 = arith.addf %69, %71 : vector<4x34x34xf32>
    %cst_27 = arith.constant dense<0xFF800000> : vector<4x34xf32>
    %73 = vector.multi_reduction <maximumf>, %72, %cst_27 [2] : vector<4x34x34xf32> to vector<4x34xf32>
    %74 = vector.shape_cast %73 : vector<4x34xf32> to vector<4x34x1xf32>
    %75 = vector.broadcast %74 : vector<4x34x1xf32> to vector<4x34x34xf32>
    %76 = arith.subf %72, %75 : vector<4x34x34xf32>
    %77 = math.exp %76 : vector<4x34x34xf32>
    %cst_28 = arith.constant dense<0.000000e+00> : vector<4x34xf32>
    %78 = vector.multi_reduction <add>, %77, %cst_28 [2] : vector<4x34x34xf32> to vector<4x34xf32>
    %79 = vector.shape_cast %78 : vector<4x34xf32> to vector<4x34x1xf32>
    %80 = tpu.reciprocal %79 {approx = true} : vector<4x34x1xf32> -> vector<4x34x1xf32>
    %81 = vector.broadcast %80 : vector<4x34x1xf32> to vector<4x34x34xf32>
    %82 = arith.mulf %77, %81 : vector<4x34x34xf32>
    "tpu.trace_start"() <{level = 10 : i32, message = "hqk,hkd->hqd"}> : () -> ()
    %cst_29 = arith.constant dense<0.000000e+00> : vector<4x34x8xf32>
    %83 = tpu.matmul %82, %66, %cst_29 {dimension_numbers = #tpu.dot_dimension_numbers<[2], [1], [1], [2], [0, 0, 0, 1, 1, 2], [0], [0]>} : vector<4x34x34xf32>, vector<4x34x8xf32>, vector<4x34x8xf32> -> vector<4x34x8xf32>
    "tpu.trace_stop"() : () -> ()
    %84 = vector.extract_strided_slice %83 {offsets = [0, 0, 0], sizes = [1, 34, 8], strides = [1, 1, 1]} : vector<4x34x8xf32> to vector<1x34x8xf32>
    %85 = vector.shape_cast %84 : vector<1x34x8xf32> to vector<34x8xf32>
    %86 = vector.extract_strided_slice %83 {offsets = [1, 0, 0], sizes = [1, 34, 8], strides = [1, 1, 1]} : vector<4x34x8xf32> to vector<1x34x8xf32>
    %87 = vector.shape_cast %86 : vector<1x34x8xf32> to vector<34x8xf32>
    %88 = vector.extract_strided_slice %83 {offsets = [2, 0, 0], sizes = [1, 34, 8], strides = [1, 1, 1]} : vector<4x34x8xf32> to vector<1x34x8xf32>
    %89 = vector.shape_cast %88 : vector<1x34x8xf32> to vector<34x8xf32>
    %90 = vector.extract_strided_slice %83 {offsets = [3, 0, 0], sizes = [1, 34, 8], strides = [1, 1, 1]} : vector<4x34x8xf32> to vector<1x34x8xf32>
    %91 = vector.shape_cast %90 : vector<1x34x8xf32> to vector<34x8xf32>
    %92 = tpu.concatenate %85, %87, %89, %91 in 1 : vector<34x8xf32>, vector<34x8xf32>, vector<34x8xf32>, vector<34x8xf32> -> vector<34x32xf32>
    %93 = arith.truncf %92 : vector<34x32xf32> to vector<34x32xbf16>
    %c0_30 = arith.constant 0 : index
    %c0_31 = arith.constant 0 : index
    %c0_32 = arith.constant 0 : index
    %94 = vector.load %arg9[%c0_30, %c0_31, %c0_32] : memref<2x32x32xbf16, #tpu.memory_space<vmem>>, vector<1x32x32xbf16>
    %95 = vector.shape_cast %94 : vector<1x32x32xbf16> to vector<32x32xbf16>
    %cst_33 = arith.constant dense<0.000000e+00> : vector<34x32xf32>
    %96 = tpu.matmul %93, %95, %cst_33 {dimension_numbers = #tpu.dot_dimension_numbers<[1], [0], [0], [1], [0, 0, 1, 1], [], []>} : vector<34x32xbf16>, vector<32x32xbf16>, vector<34x32xf32> -> vector<34x32xf32>
    %97 = arith.addf %4, %96 : vector<34x32xf32>
    %c0_34 = arith.constant 0 : index
    %c0_35 = arith.constant 0 : index
    %c0_36 = arith.constant 0 : index
    %98 = vector.load %arg10[%c0_34, %c0_35, %c0_36] : memref<2x1x32xf32, #tpu.memory_space<vmem>>, vector<1x1x32xf32>
    %99 = vector.shape_cast %98 : vector<1x1x32xf32> to vector<1x32xf32>
    %100 = vector.broadcast %99 : vector<1x32xf32> to vector<34x32xf32>
    %101 = arith.addf %97, %100 : vector<34x32xf32>
    %c0_37 = arith.constant 0 : index
    %c0_38 = arith.constant 0 : index
    %c0_39 = arith.constant 0 : index
    %102 = vector.load %arg11[%c0_37, %c0_38, %c0_39] : memref<2x1x32xf32, #tpu.memory_space<vmem>>, vector<1x1x32xf32>
    %103 = vector.shape_cast %102 : vector<1x1x32xf32> to vector<1x32xf32>
    %c0_40 = arith.constant 0 : index
    %c0_41 = arith.constant 0 : index
    %c0_42 = arith.constant 0 : index
    %104 = vector.load %arg12[%c0_40, %c0_41, %c0_42] : memref<2x1x32xf32, #tpu.memory_space<vmem>>, vector<1x1x32xf32>
    %105 = vector.shape_cast %104 : vector<1x1x32xf32> to vector<1x32xf32>
    %cst_43 = arith.constant dense<0.000000e+00> : vector<34xf32>
    %106 = vector.multi_reduction <add>, %101, %cst_43 [1] : vector<34x32xf32> to vector<34xf32>
    %107 = vector.shape_cast %106 : vector<34xf32> to vector<34x1xf32>
    %cst_44 = arith.constant 3.200000e+01 : f32
    %108 = vector.broadcast %cst_44 : f32 to vector<34x1xf32>
    %109 = arith.divf %107, %108 : vector<34x1xf32>
    %110 = vector.broadcast %109 : vector<34x1xf32> to vector<34x32xf32>
    %111 = arith.subf %101, %110 : vector<34x32xf32>
    %112 = arith.mulf %111, %111 : vector<34x32xf32>
    %cst_45 = arith.constant dense<0.000000e+00> : vector<34xf32>
    %113 = vector.multi_reduction <add>, %112, %cst_45 [1] : vector<34x32xf32> to vector<34xf32>
    %114 = vector.shape_cast %113 : vector<34xf32> to vector<34x1xf32>
    %cst_46 = arith.constant 3.200000e+01 : f32
    %115 = vector.broadcast %cst_46 : f32 to vector<34x1xf32>
    %116 = arith.divf %114, %115 : vector<34x1xf32>
    %117 = vector.broadcast %109 : vector<34x1xf32> to vector<34x32xf32>
    %118 = arith.subf %101, %117 : vector<34x32xf32>
    %cst_47 = arith.constant 9.99999974E-6 : f32
    %119 = vector.broadcast %cst_47 : f32 to vector<34x1xf32>
    %120 = arith.addf %116, %119 : vector<34x1xf32>
    %121 = math.rsqrt %120 : vector<34x1xf32>
    %122 = vector.broadcast %121 : vector<34x1xf32> to vector<34x32xf32>
    %123 = arith.mulf %118, %122 : vector<34x32xf32>
    %124 = vector.broadcast %103 : vector<1x32xf32> to vector<34x32xf32>
    %125 = arith.mulf %123, %124 : vector<34x32xf32>
    %126 = vector.broadcast %105 : vector<1x32xf32> to vector<34x32xf32>
    %127 = arith.addf %125, %126 : vector<34x32xf32>
    %128 = arith.truncf %127 : vector<34x32xf32> to vector<34x32xbf16>
    %c0_48 = arith.constant 0 : index
    %c0_49 = arith.constant 0 : index
    %c0_50 = arith.constant 0 : index
    %129 = vector.load %arg13[%c0_48, %c0_49, %c0_50] : memref<2x32x128xbf16, #tpu.memory_space<vmem>>, vector<1x32x128xbf16>
    %130 = vector.shape_cast %129 : vector<1x32x128xbf16> to vector<32x128xbf16>
    %cst_51 = arith.constant dense<0.000000e+00> : vector<34x128xf32>
    %131 = tpu.matmul %128, %130, %cst_51 {dimension_numbers = #tpu.dot_dimension_numbers<[1], [0], [0], [1], [0, 0, 1, 1], [], []>} : vector<34x32xbf16>, vector<32x128xbf16>, vector<34x128xf32> -> vector<34x128xf32>
    %c0_52 = arith.constant 0 : index
    %c0_53 = arith.constant 0 : index
    %c0_54 = arith.constant 0 : index
    %132 = vector.load %arg14[%c0_52, %c0_53, %c0_54] : memref<2x1x128xf32, #tpu.memory_space<vmem>>, vector<1x1x128xf32>
    %133 = vector.shape_cast %132 : vector<1x1x128xf32> to vector<1x128xf32>
    %134 = vector.broadcast %133 : vector<1x128xf32> to vector<34x128xf32>
    %135 = arith.addf %131, %134 : vector<34x128xf32>
    %136 = arith.mulf %135, %135 : vector<34x128xf32>
    %137 = arith.mulf %135, %136 : vector<34x128xf32>
    %cst_55 = arith.constant 4.471500e-02 : f32
    %138 = vector.broadcast %cst_55 : f32 to vector<34x128xf32>
    %139 = arith.mulf %138, %137 : vector<34x128xf32>
    %140 = arith.addf %135, %139 : vector<34x128xf32>
    %cst_56 = arith.constant 0.797884583 : f32
    %141 = vector.broadcast %cst_56 : f32 to vector<34x128xf32>
    %142 = arith.mulf %141, %140 : vector<34x128xf32>
    %143 = math.tanh %142 : vector<34x128xf32>
    %cst_57 = arith.constant 1.000000e+00 : f32
    %144 = vector.broadcast %cst_57 : f32 to vector<34x128xf32>
    %145 = arith.addf %144, %143 : vector<34x128xf32>
    %cst_58 = arith.constant 5.000000e-01 : f32
    %146 = vector.broadcast %cst_58 : f32 to vector<34x128xf32>
    %147 = arith.mulf %146, %145 : vector<34x128xf32>
    %148 = arith.mulf %135, %147 : vector<34x128xf32>
    %149 = arith.truncf %148 : vector<34x128xf32> to vector<34x128xbf16>
    %c0_59 = arith.constant 0 : index
    %c0_60 = arith.constant 0 : index
    %c0_61 = arith.constant 0 : index
    %150 = vector.load %arg15[%c0_59, %c0_60, %c0_61] : memref<2x128x32xbf16, #tpu.memory_space<vmem>>, vector<1x128x32xbf16>
    %151 = vector.shape_cast %150 : vector<1x128x32xbf16> to vector<128x32xbf16>
    %cst_62 = arith.constant dense<0.000000e+00> : vector<34x32xf32>
    %152 = tpu.matmul %149, %151, %cst_62 {dimension_numbers = #tpu.dot_dimension_numbers<[1], [0], [0], [1], [0, 0, 1, 1], [], []>} : vector<34x128xbf16>, vector<128x32xbf16>, vector<34x32xf32> -> vector<34x32xf32>
    %153 = arith.addf %101, %152 : vector<34x32xf32>
    %c0_63 = arith.constant 0 : index
    %c0_64 = arith.constant 0 : index
    %c0_65 = arith.constant 0 : index
    %154 = vector.load %arg16[%c0_63, %c0_64, %c0_65] : memref<2x1x32xf32, #tpu.memory_space<vmem>>, vector<1x1x32xf32>
    %155 = vector.shape_cast %154 : vector<1x1x32xf32> to vector<1x32xf32>
    %156 = vector.broadcast %155 : vector<1x32xf32> to vector<34x32xf32>
    %157 = arith.addf %153, %156 : vector<34x32xf32>
    %c1 = arith.constant 1 : index
    %c0_66 = arith.constant 0 : index
    %c0_67 = arith.constant 0 : index
    %158 = vector.load %arg5[%c1, %c0_66, %c0_67] : memref<2x1x32xf32, #tpu.memory_space<vmem>>, vector<1x1x32xf32>
    %159 = vector.shape_cast %158 : vector<1x1x32xf32> to vector<1x32xf32>
    %c1_68 = arith.constant 1 : index
    %c0_69 = arith.constant 0 : index
    %c0_70 = arith.constant 0 : index
    %160 = vector.load %arg6[%c1_68, %c0_69, %c0_70] : memref<2x1x32xf32, #tpu.memory_space<vmem>>, vector<1x1x32xf32>
    %161 = vector.shape_cast %160 : vector<1x1x32xf32> to vector<1x32xf32>
    %cst_71 = arith.constant dense<0.000000e+00> : vector<34xf32>
    %162 = vector.multi_reduction <add>, %157, %cst_71 [1] : vector<34x32xf32> to vector<34xf32>
    %163 = vector.shape_cast %162 : vector<34xf32> to vector<34x1xf32>
    %cst_72 = arith.constant 3.200000e+01 : f32
    %164 = vector.broadcast %cst_72 : f32 to vector<34x1xf32>
    %165 = arith.divf %163, %164 : vector<34x1xf32>
    %166 = vector.broadcast %165 : vector<34x1xf32> to vector<34x32xf32>
    %167 = arith.subf %157, %166 : vector<34x32xf32>
    %168 = arith.mulf %167, %167 : vector<34x32xf32>
    %cst_73 = arith.constant dense<0.000000e+00> : vector<34xf32>
    %169 = vector.multi_reduction <add>, %168, %cst_73 [1] : vector<34x32xf32> to vector<34xf32>
    %170 = vector.shape_cast %169 : vector<34xf32> to vector<34x1xf32>
    %cst_74 = arith.constant 3.200000e+01 : f32
    %171 = vector.broadcast %cst_74 : f32 to vector<34x1xf32>
    %172 = arith.divf %170, %171 : vector<34x1xf32>
    %173 = vector.broadcast %165 : vector<34x1xf32> to vector<34x32xf32>
    %174 = arith.subf %157, %173 : vector<34x32xf32>
    %cst_75 = arith.constant 9.99999974E-6 : f32
    %175 = vector.broadcast %cst_75 : f32 to vector<34x1xf32>
    %176 = arith.addf %172, %175 : vector<34x1xf32>
    %177 = math.rsqrt %176 : vector<34x1xf32>
    %178 = vector.broadcast %177 : vector<34x1xf32> to vector<34x32xf32>
    %179 = arith.mulf %174, %178 : vector<34x32xf32>
    %180 = vector.broadcast %159 : vector<1x32xf32> to vector<34x32xf32>
    %181 = arith.mulf %179, %180 : vector<34x32xf32>
    %182 = vector.broadcast %161 : vector<1x32xf32> to vector<34x32xf32>
    %183 = arith.addf %181, %182 : vector<34x32xf32>
    %184 = arith.truncf %183 : vector<34x32xf32> to vector<34x32xbf16>
    %c1_76 = arith.constant 1 : index
    %c0_77 = arith.constant 0 : index
    %c0_78 = arith.constant 0 : index
    %185 = vector.load %arg7[%c1_76, %c0_77, %c0_78] : memref<2x32x96xbf16, #tpu.memory_space<vmem>>, vector<1x32x96xbf16>
    %186 = vector.shape_cast %185 : vector<1x32x96xbf16> to vector<32x96xbf16>
    %cst_79 = arith.constant dense<0.000000e+00> : vector<34x96xf32>
    %187 = tpu.matmul %184, %186, %cst_79 {dimension_numbers = #tpu.dot_dimension_numbers<[1], [0], [0], [1], [0, 0, 1, 1], [], []>} : vector<34x32xbf16>, vector<32x96xbf16>, vector<34x96xf32> -> vector<34x96xf32>
    %c1_80 = arith.constant 1 : index
    %c0_81 = arith.constant 0 : index
    %c0_82 = arith.constant 0 : index
    %188 = vector.load %arg8[%c1_80, %c0_81, %c0_82] : memref<2x1x96xf32, #tpu.memory_space<vmem>>, vector<1x1x96xf32>
    %189 = vector.shape_cast %188 : vector<1x1x96xf32> to vector<1x96xf32>
    %190 = vector.broadcast %189 : vector<1x96xf32> to vector<34x96xf32>
    %191 = arith.addf %187, %190 : vector<34x96xf32>
    %192 = vector.extract_strided_slice %191 {offsets = [0, 0], sizes = [34, 8], strides = [1, 1]} : vector<34x96xf32> to vector<34x8xf32>
    %193 = vector.extract_strided_slice %191 {offsets = [0, 8], sizes = [34, 8], strides = [1, 1]} : vector<34x96xf32> to vector<34x8xf32>
    %194 = vector.extract_strided_slice %191 {offsets = [0, 16], sizes = [34, 8], strides = [1, 1]} : vector<34x96xf32> to vector<34x8xf32>
    %195 = vector.extract_strided_slice %191 {offsets = [0, 24], sizes = [34, 8], strides = [1, 1]} : vector<34x96xf32> to vector<34x8xf32>
    %196 = vector.shape_cast %192 : vector<34x8xf32> to vector<1x34x8xf32>
    %197 = vector.shape_cast %193 : vector<34x8xf32> to vector<1x34x8xf32>
    %198 = vector.shape_cast %194 : vector<34x8xf32> to vector<1x34x8xf32>
    %199 = vector.shape_cast %195 : vector<34x8xf32> to vector<1x34x8xf32>
    %200 = tpu.concatenate %196, %197, %198, %199 in 0 : vector<1x34x8xf32>, vector<1x34x8xf32>, vector<1x34x8xf32>, vector<1x34x8xf32> -> vector<4x34x8xf32>
    %201 = vector.extract_strided_slice %191 {offsets = [0, 32], sizes = [34, 8], strides = [1, 1]} : vector<34x96xf32> to vector<34x8xf32>
    %202 = vector.extract_strided_slice %191 {offsets = [0, 40], sizes = [34, 8], strides = [1, 1]} : vector<34x96xf32> to vector<34x8xf32>
    %203 = vector.extract_strided_slice %191 {offsets = [0, 48], sizes = [34, 8], strides = [1, 1]} : vector<34x96xf32> to vector<34x8xf32>
    %204 = vector.extract_strided_slice %191 {offsets = [0, 56], sizes = [34, 8], strides = [1, 1]} : vector<34x96xf32> to vector<34x8xf32>
    %205 = vector.shape_cast %201 : vector<34x8xf32> to vector<1x34x8xf32>
    %206 = vector.shape_cast %202 : vector<34x8xf32> to vector<1x34x8xf32>
    %207 = vector.shape_cast %203 : vector<34x8xf32> to vector<1x34x8xf32>
    %208 = vector.shape_cast %204 : vector<34x8xf32> to vector<1x34x8xf32>
    %209 = tpu.concatenate %205, %206, %207, %208 in 0 : vector<1x34x8xf32>, vector<1x34x8xf32>, vector<1x34x8xf32>, vector<1x34x8xf32> -> vector<4x34x8xf32>
    %210 = vector.extract_strided_slice %191 {offsets = [0, 64], sizes = [34, 8], strides = [1, 1]} : vector<34x96xf32> to vector<34x8xf32>
    %211 = vector.extract_strided_slice %191 {offsets = [0, 72], sizes = [34, 8], strides = [1, 1]} : vector<34x96xf32> to vector<34x8xf32>
    %212 = vector.extract_strided_slice %191 {offsets = [0, 80], sizes = [34, 8], strides = [1, 1]} : vector<34x96xf32> to vector<34x8xf32>
    %213 = vector.extract_strided_slice %191 {offsets = [0, 88], sizes = [34, 8], strides = [1, 1]} : vector<34x96xf32> to vector<34x8xf32>
    %214 = vector.shape_cast %210 : vector<34x8xf32> to vector<1x34x8xf32>
    %215 = vector.shape_cast %211 : vector<34x8xf32> to vector<1x34x8xf32>
    %216 = vector.shape_cast %212 : vector<34x8xf32> to vector<1x34x8xf32>
    %217 = vector.shape_cast %213 : vector<34x8xf32> to vector<1x34x8xf32>
    %218 = tpu.concatenate %214, %215, %216, %217 in 0 : vector<1x34x8xf32>, vector<1x34x8xf32>, vector<1x34x8xf32>, vector<1x34x8xf32> -> vector<4x34x8xf32>
    "tpu.trace_start"() <{level = 10 : i32, message = "hqd,hkd->hqk"}> : () -> ()
    %cst_83 = arith.constant dense<0.000000e+00> : vector<4x34x34xf32>
    %219 = tpu.matmul %200, %209, %cst_83 {dimension_numbers = #tpu.dot_dimension_numbers<[2], [2], [1], [1], [0, 0, 0, 1, 1, 1], [0], [0]>} : vector<4x34x8xf32>, vector<4x34x8xf32>, vector<4x34x34xf32> -> vector<4x34x34xf32>
    "tpu.trace_stop"() : () -> ()
    %cst_84 = arith.constant 0.353553385 : f32
    %220 = vector.broadcast %cst_84 : f32 to vector<4x34x34xf32>
    %221 = arith.mulf %219, %220 : vector<4x34x34xf32>
    %222 = vector.shape_cast %5 : vector<34x34xf32> to vector<1x34x34xf32>
    %223 = vector.broadcast %222 : vector<1x34x34xf32> to vector<4x34x34xf32>
    %224 = arith.addf %221, %223 : vector<4x34x34xf32>
    %cst_85 = arith.constant dense<0xFF800000> : vector<4x34xf32>
    %225 = vector.multi_reduction <maximumf>, %224, %cst_85 [2] : vector<4x34x34xf32> to vector<4x34xf32>
    %226 = vector.shape_cast %225 : vector<4x34xf32> to vector<4x34x1xf32>
    %227 = vector.broadcast %226 : vector<4x34x1xf32> to vector<4x34x34xf32>
    %228 = arith.subf %224, %227 : vector<4x34x34xf32>
    %229 = math.exp %228 : vector<4x34x34xf32>
    %cst_86 = arith.constant dense<0.000000e+00> : vector<4x34xf32>
    %230 = vector.multi_reduction <add>, %229, %cst_86 [2] : vector<4x34x34xf32> to vector<4x34xf32>
    %231 = vector.shape_cast %230 : vector<4x34xf32> to vector<4x34x1xf32>
    %232 = tpu.reciprocal %231 {approx = true} : vector<4x34x1xf32> -> vector<4x34x1xf32>
    %233 = vector.broadcast %232 : vector<4x34x1xf32> to vector<4x34x34xf32>
    %234 = arith.mulf %229, %233 : vector<4x34x34xf32>
    "tpu.trace_start"() <{level = 10 : i32, message = "hqk,hkd->hqd"}> : () -> ()
    %cst_87 = arith.constant dense<0.000000e+00> : vector<4x34x8xf32>
    %235 = tpu.matmul %234, %218, %cst_87 {dimension_numbers = #tpu.dot_dimension_numbers<[2], [1], [1], [2], [0, 0, 0, 1, 1, 2], [0], [0]>} : vector<4x34x34xf32>, vector<4x34x8xf32>, vector<4x34x8xf32> -> vector<4x34x8xf32>
    "tpu.trace_stop"() : () -> ()
    %236 = vector.extract_strided_slice %235 {offsets = [0, 0, 0], sizes = [1, 34, 8], strides = [1, 1, 1]} : vector<4x34x8xf32> to vector<1x34x8xf32>
    %237 = vector.shape_cast %236 : vector<1x34x8xf32> to vector<34x8xf32>
    %238 = vector.extract_strided_slice %235 {offsets = [1, 0, 0], sizes = [1, 34, 8], strides = [1, 1, 1]} : vector<4x34x8xf32> to vector<1x34x8xf32>
    %239 = vector.shape_cast %238 : vector<1x34x8xf32> to vector<34x8xf32>
    %240 = vector.extract_strided_slice %235 {offsets = [2, 0, 0], sizes = [1, 34, 8], strides = [1, 1, 1]} : vector<4x34x8xf32> to vector<1x34x8xf32>
    %241 = vector.shape_cast %240 : vector<1x34x8xf32> to vector<34x8xf32>
    %242 = vector.extract_strided_slice %235 {offsets = [3, 0, 0], sizes = [1, 34, 8], strides = [1, 1, 1]} : vector<4x34x8xf32> to vector<1x34x8xf32>
    %243 = vector.shape_cast %242 : vector<1x34x8xf32> to vector<34x8xf32>
    %244 = tpu.concatenate %237, %239, %241, %243 in 1 : vector<34x8xf32>, vector<34x8xf32>, vector<34x8xf32>, vector<34x8xf32> -> vector<34x32xf32>
    %245 = arith.truncf %244 : vector<34x32xf32> to vector<34x32xbf16>
    %c1_88 = arith.constant 1 : index
    %c0_89 = arith.constant 0 : index
    %c0_90 = arith.constant 0 : index
    %246 = vector.load %arg9[%c1_88, %c0_89, %c0_90] : memref<2x32x32xbf16, #tpu.memory_space<vmem>>, vector<1x32x32xbf16>
    %247 = vector.shape_cast %246 : vector<1x32x32xbf16> to vector<32x32xbf16>
    %cst_91 = arith.constant dense<0.000000e+00> : vector<34x32xf32>
    %248 = tpu.matmul %245, %247, %cst_91 {dimension_numbers = #tpu.dot_dimension_numbers<[1], [0], [0], [1], [0, 0, 1, 1], [], []>} : vector<34x32xbf16>, vector<32x32xbf16>, vector<34x32xf32> -> vector<34x32xf32>
    %249 = arith.addf %157, %248 : vector<34x32xf32>
    %c1_92 = arith.constant 1 : index
    %c0_93 = arith.constant 0 : index
    %c0_94 = arith.constant 0 : index
    %250 = vector.load %arg10[%c1_92, %c0_93, %c0_94] : memref<2x1x32xf32, #tpu.memory_space<vmem>>, vector<1x1x32xf32>
    %251 = vector.shape_cast %250 : vector<1x1x32xf32> to vector<1x32xf32>
    %252 = vector.broadcast %251 : vector<1x32xf32> to vector<34x32xf32>
    %253 = arith.addf %249, %252 : vector<34x32xf32>
    %c1_95 = arith.constant 1 : index
    %c0_96 = arith.constant 0 : index
    %c0_97 = arith.constant 0 : index
    %254 = vector.load %arg11[%c1_95, %c0_96, %c0_97] : memref<2x1x32xf32, #tpu.memory_space<vmem>>, vector<1x1x32xf32>
    %255 = vector.shape_cast %254 : vector<1x1x32xf32> to vector<1x32xf32>
    %c1_98 = arith.constant 1 : index
    %c0_99 = arith.constant 0 : index
    %c0_100 = arith.constant 0 : index
    %256 = vector.load %arg12[%c1_98, %c0_99, %c0_100] : memref<2x1x32xf32, #tpu.memory_space<vmem>>, vector<1x1x32xf32>
    %257 = vector.shape_cast %256 : vector<1x1x32xf32> to vector<1x32xf32>
    %cst_101 = arith.constant dense<0.000000e+00> : vector<34xf32>
    %258 = vector.multi_reduction <add>, %253, %cst_101 [1] : vector<34x32xf32> to vector<34xf32>
    %259 = vector.shape_cast %258 : vector<34xf32> to vector<34x1xf32>
    %cst_102 = arith.constant 3.200000e+01 : f32
    %260 = vector.broadcast %cst_102 : f32 to vector<34x1xf32>
    %261 = arith.divf %259, %260 : vector<34x1xf32>
    %262 = vector.broadcast %261 : vector<34x1xf32> to vector<34x32xf32>
    %263 = arith.subf %253, %262 : vector<34x32xf32>
    %264 = arith.mulf %263, %263 : vector<34x32xf32>
    %cst_103 = arith.constant dense<0.000000e+00> : vector<34xf32>
    %265 = vector.multi_reduction <add>, %264, %cst_103 [1] : vector<34x32xf32> to vector<34xf32>
    %266 = vector.shape_cast %265 : vector<34xf32> to vector<34x1xf32>
    %cst_104 = arith.constant 3.200000e+01 : f32
    %267 = vector.broadcast %cst_104 : f32 to vector<34x1xf32>
    %268 = arith.divf %266, %267 : vector<34x1xf32>
    %269 = vector.broadcast %261 : vector<34x1xf32> to vector<34x32xf32>
    %270 = arith.subf %253, %269 : vector<34x32xf32>
    %cst_105 = arith.constant 9.99999974E-6 : f32
    %271 = vector.broadcast %cst_105 : f32 to vector<34x1xf32>
    %272 = arith.addf %268, %271 : vector<34x1xf32>
    %273 = math.rsqrt %272 : vector<34x1xf32>
    %274 = vector.broadcast %273 : vector<34x1xf32> to vector<34x32xf32>
    %275 = arith.mulf %270, %274 : vector<34x32xf32>
    %276 = vector.broadcast %255 : vector<1x32xf32> to vector<34x32xf32>
    %277 = arith.mulf %275, %276 : vector<34x32xf32>
    %278 = vector.broadcast %257 : vector<1x32xf32> to vector<34x32xf32>
    %279 = arith.addf %277, %278 : vector<34x32xf32>
    %280 = arith.truncf %279 : vector<34x32xf32> to vector<34x32xbf16>
    %c1_106 = arith.constant 1 : index
    %c0_107 = arith.constant 0 : index
    %c0_108 = arith.constant 0 : index
    %281 = vector.load %arg13[%c1_106, %c0_107, %c0_108] : memref<2x32x128xbf16, #tpu.memory_space<vmem>>, vector<1x32x128xbf16>
    %282 = vector.shape_cast %281 : vector<1x32x128xbf16> to vector<32x128xbf16>
    %cst_109 = arith.constant dense<0.000000e+00> : vector<34x128xf32>
    %283 = tpu.matmul %280, %282, %cst_109 {dimension_numbers = #tpu.dot_dimension_numbers<[1], [0], [0], [1], [0, 0, 1, 1], [], []>} : vector<34x32xbf16>, vector<32x128xbf16>, vector<34x128xf32> -> vector<34x128xf32>
    %c1_110 = arith.constant 1 : index
    %c0_111 = arith.constant 0 : index
    %c0_112 = arith.constant 0 : index
    %284 = vector.load %arg14[%c1_110, %c0_111, %c0_112] : memref<2x1x128xf32, #tpu.memory_space<vmem>>, vector<1x1x128xf32>
    %285 = vector.shape_cast %284 : vector<1x1x128xf32> to vector<1x128xf32>
    %286 = vector.broadcast %285 : vector<1x128xf32> to vector<34x128xf32>
    %287 = arith.addf %283, %286 : vector<34x128xf32>
    %288 = arith.mulf %287, %287 : vector<34x128xf32>
    %289 = arith.mulf %287, %288 : vector<34x128xf32>
    %cst_113 = arith.constant 4.471500e-02 : f32
    %290 = vector.broadcast %cst_113 : f32 to vector<34x128xf32>
    %291 = arith.mulf %290, %289 : vector<34x128xf32>
    %292 = arith.addf %287, %291 : vector<34x128xf32>
    %cst_114 = arith.constant 0.797884583 : f32
    %293 = vector.broadcast %cst_114 : f32 to vector<34x128xf32>
    %294 = arith.mulf %293, %292 : vector<34x128xf32>
    %295 = math.tanh %294 : vector<34x128xf32>
    %cst_115 = arith.constant 1.000000e+00 : f32
    %296 = vector.broadcast %cst_115 : f32 to vector<34x128xf32>
    %297 = arith.addf %296, %295 : vector<34x128xf32>
    %cst_116 = arith.constant 5.000000e-01 : f32
    %298 = vector.broadcast %cst_116 : f32 to vector<34x128xf32>
    %299 = arith.mulf %298, %297 : vector<34x128xf32>
    %300 = arith.mulf %287, %299 : vector<34x128xf32>
    %301 = arith.truncf %300 : vector<34x128xf32> to vector<34x128xbf16>
    %c1_117 = arith.constant 1 : index
    %c0_118 = arith.constant 0 : index
    %c0_119 = arith.constant 0 : index
    %302 = vector.load %arg15[%c1_117, %c0_118, %c0_119] : memref<2x128x32xbf16, #tpu.memory_space<vmem>>, vector<1x128x32xbf16>
    %303 = vector.shape_cast %302 : vector<1x128x32xbf16> to vector<128x32xbf16>
    %cst_120 = arith.constant dense<0.000000e+00> : vector<34x32xf32>
    %304 = tpu.matmul %301, %303, %cst_120 {dimension_numbers = #tpu.dot_dimension_numbers<[1], [0], [0], [1], [0, 0, 1, 1], [], []>} : vector<34x128xbf16>, vector<128x32xbf16>, vector<34x32xf32> -> vector<34x32xf32>
    %305 = arith.addf %253, %304 : vector<34x32xf32>
    %c1_121 = arith.constant 1 : index
    %c0_122 = arith.constant 0 : index
    %c0_123 = arith.constant 0 : index
    %306 = vector.load %arg16[%c1_121, %c0_122, %c0_123] : memref<2x1x32xf32, #tpu.memory_space<vmem>>, vector<1x1x32xf32>
    %307 = vector.shape_cast %306 : vector<1x1x32xf32> to vector<1x32xf32>
    %308 = vector.broadcast %307 : vector<1x32xf32> to vector<34x32xf32>
    %309 = arith.addf %305, %308 : vector<34x32xf32>
    %310 = vector.extract_strided_slice %309 {offsets = [0, 0], sizes = [1, 32], strides = [1, 1]} : vector<34x32xf32> to vector<1x32xf32>
    %311 = vector.extract_strided_slice %309 {offsets = [17, 0], sizes = [1, 32], strides = [1, 1]} : vector<34x32xf32> to vector<1x32xf32>
    %312 = tpu.concatenate %310, %311 in 0 : vector<1x32xf32>, vector<1x32xf32> -> vector<2x32xf32>
    %c0_124 = arith.constant 0 : index
    %c0_125 = arith.constant 0 : index
    %313 = vector.load %arg17[%c0_124, %c0_125] : memref<1x32xf32, #tpu.memory_space<vmem>>, vector<1x32xf32>
    %c0_126 = arith.constant 0 : index
    %c0_127 = arith.constant 0 : index
    %314 = vector.load %arg18[%c0_126, %c0_127] : memref<1x32xf32, #tpu.memory_space<vmem>>, vector<1x32xf32>
    %cst_128 = arith.constant dense<0.000000e+00> : vector<2xf32>
    %315 = vector.multi_reduction <add>, %312, %cst_128 [1] : vector<2x32xf32> to vector<2xf32>
    %316 = vector.shape_cast %315 : vector<2xf32> to vector<2x1xf32>
    %cst_129 = arith.constant 3.200000e+01 : f32
    %317 = vector.broadcast %cst_129 : f32 to vector<2x1xf32>
    %318 = arith.divf %316, %317 : vector<2x1xf32>
    %319 = vector.broadcast %318 : vector<2x1xf32> to vector<2x32xf32>
    %320 = arith.subf %312, %319 : vector<2x32xf32>
    %321 = arith.mulf %320, %320 : vector<2x32xf32>
    %cst_130 = arith.constant dense<0.000000e+00> : vector<2xf32>
    %322 = vector.multi_reduction <add>, %321, %cst_130 [1] : vector<2x32xf32> to vector<2xf32>
    %323 = vector.shape_cast %322 : vector<2xf32> to vector<2x1xf32>
    %cst_131 = arith.constant 3.200000e+01 : f32
    %324 = vector.broadcast %cst_131 : f32 to vector<2x1xf32>
    %325 = arith.divf %323, %324 : vector<2x1xf32>
    %326 = vector.broadcast %318 : vector<2x1xf32> to vector<2x32xf32>
    %327 = arith.subf %312, %326 : vector<2x32xf32>
    %cst_132 = arith.constant 9.99999974E-6 : f32
    %328 = vector.broadcast %cst_132 : f32 to vector<2x1xf32>
    %329 = arith.addf %325, %328 : vector<2x1xf32>
    %330 = math.rsqrt %329 : vector<2x1xf32>
    %331 = vector.broadcast %330 : vector<2x1xf32> to vector<2x32xf32>
    %332 = arith.mulf %327, %331 : vector<2x32xf32>
    %333 = vector.broadcast %313 : vector<1x32xf32> to vector<2x32xf32>
    %334 = arith.mulf %332, %333 : vector<2x32xf32>
    %335 = vector.broadcast %314 : vector<1x32xf32> to vector<2x32xf32>
    %336 = arith.addf %334, %335 : vector<2x32xf32>
    %337 = arith.truncf %336 : vector<2x32xf32> to vector<2x32xbf16>
    %c0_133 = arith.constant 0 : index
    %c0_134 = arith.constant 0 : index
    %338 = vector.load %arg19[%c0_133, %c0_134] : memref<32x128xbf16, #tpu.memory_space<vmem>>, vector<32x128xbf16>
    %cst_135 = arith.constant dense<0.000000e+00> : vector<2x128xf32>
    %339 = tpu.matmul %337, %338, %cst_135 {dimension_numbers = #tpu.dot_dimension_numbers<[1], [0], [0], [1], [0, 0, 1, 1], [], []>} : vector<2x32xbf16>, vector<32x128xbf16>, vector<2x128xf32> -> vector<2x128xf32>
    %c0_136 = arith.constant 0 : index
    %c0_137 = arith.constant 0 : index
    %340 = vector.load %arg20[%c0_136, %c0_137] : memref<1x128xf32, #tpu.memory_space<vmem>>, vector<1x128xf32>
    %341 = vector.broadcast %340 : vector<1x128xf32> to vector<2x128xf32>
    %342 = arith.addf %339, %341 : vector<2x128xf32>
    %c0_138 = arith.constant 0 : index
    %c0_139 = arith.constant 0 : index
    %343 = vector.load %arg21[%c0_138, %c0_139] : memref<2x128xf32, #tpu.memory_space<vmem>>, vector<2x128xf32>
    tpu.vector_store %arg21[%c0_138, %c0_139], %342 {strides = array<i32>} : memref<2x128xf32, #tpu.memory_space<vmem>>, vector<2x128xf32>,
    return
  }
  func.func @transform_0(%arg0: i32) -> (i32, i32) {
    %c0_i32 = arith.constant 0 : i32
    %c0_i32_0 = arith.constant 0 : i32
    %c0_i32_1 = arith.constant 0 : i32
    return %c0_i32, %c0_i32_0 : i32, i32
  }
  func.func @transform_1(%arg0: i32) -> (i32, i32) {
    %c0_i32 = arith.constant 0 : i32
    %c0_i32_0 = arith.constant 0 : i32
    %c0_i32_1 = arith.constant 0 : i32
    return %c0_i32, %c0_i32_0 : i32, i32
  }
  func.func @transform_2(%arg0: i32) -> (i32, i32) {
    %c0_i32 = arith.constant 0 : i32
    %c0_i32_0 = arith.constant 0 : i32
    %c0_i32_1 = arith.constant 0 : i32
    return %c0_i32, %c0_i32_0 : i32, i32
  }
  func.func @transform_3(%arg0: i32) -> (i32, i32) {
    %c0_i32 = arith.constant 0 : i32
    %c0_i32_0 = arith.constant 0 : i32
    %c0_i32_1 = arith.constant 0 : i32
    return %c0_i32, %c0_i32_0 : i32, i32
  }
  func.func @transform_4(%arg0: i32) -> (i32, i32, i32) {
    %c0_i32 = arith.constant 0 : i32
    %c0_i32_0 = arith.constant 0 : i32
    %c0_i32_1 = arith.constant 0 : i32
    %c0_i32_2 = arith.constant 0 : i32
    return %c0_i32, %c0_i32_0, %c0_i32_1 : i32, i32, i32
  }
  func.func @transform_5(%arg0: i32) -> (i32, i32, i32) {
    %c0_i32 = arith.constant 0 : i32
    %c0_i32_0 = arith.constant 0 : i32
    %c0_i32_1 = arith.constant 0 : i32
    %c0_i32_2 = arith.constant 0 : i32
    return %c0_i32, %c0_i32_0, %c0_i32_1 : i32, i32, i32
  }
  func.func @transform_6(%arg0: i32) -> (i32, i32, i32) {
    %c0_i32 = arith.constant 0 : i32
    %c0_i32_0 = arith.constant 0 : i32
    %c0_i32_1 = arith.constant 0 : i32
    %c0_i32_2 = arith.constant 0 : i32
    return %c0_i32, %c0_i32_0, %c0_i32_1 : i32, i32, i32
  }
  func.func @transform_7(%arg0: i32) -> (i32, i32, i32) {
    %c0_i32 = arith.constant 0 : i32
    %c0_i32_0 = arith.constant 0 : i32
    %c0_i32_1 = arith.constant 0 : i32
    %c0_i32_2 = arith.constant 0 : i32
    return %c0_i32, %c0_i32_0, %c0_i32_1 : i32, i32, i32
  }
  func.func @transform_8(%arg0: i32) -> (i32, i32, i32) {
    %c0_i32 = arith.constant 0 : i32
    %c0_i32_0 = arith.constant 0 : i32
    %c0_i32_1 = arith.constant 0 : i32
    %c0_i32_2 = arith.constant 0 : i32
    return %c0_i32, %c0_i32_0, %c0_i32_1 : i32, i32, i32
  }
  func.func @transform_9(%arg0: i32) -> (i32, i32, i32) {
    %c0_i32 = arith.constant 0 : i32
    %c0_i32_0 = arith.constant 0 : i32
    %c0_i32_1 = arith.constant 0 : i32
    %c0_i32_2 = arith.constant 0 : i32
    return %c0_i32, %c0_i32_0, %c0_i32_1 : i32, i32, i32
  }
  func.func @transform_10(%arg0: i32) -> (i32, i32, i32) {
    %c0_i32 = arith.constant 0 : i32
    %c0_i32_0 = arith.constant 0 : i32
    %c0_i32_1 = arith.constant 0 : i32
    %c0_i32_2 = arith.constant 0 : i32
    return %c0_i32, %c0_i32_0, %c0_i32_1 : i32, i32, i32
  }
  func.func @transform_11(%arg0: i32) -> (i32, i32, i32) {
    %c0_i32 = arith.constant 0 : i32
    %c0_i32_0 = arith.constant 0 : i32
    %c0_i32_1 = arith.constant 0 : i32
    %c0_i32_2 = arith.constant 0 : i32
    return %c0_i32, %c0_i32_0, %c0_i32_1 : i32, i32, i32
  }
  func.func @transform_12(%arg0: i32) -> (i32, i32, i32) {
    %c0_i32 = arith.constant 0 : i32
    %c0_i32_0 = arith.constant 0 : i32
    %c0_i32_1 = arith.constant 0 : i32
    %c0_i32_2 = arith.constant 0 : i32
    return %c0_i32, %c0_i32_0, %c0_i32_1 : i32, i32, i32
  }
  func.func @transform_13(%arg0: i32) -> (i32, i32, i32) {
    %c0_i32 = arith.constant 0 : i32
    %c0_i32_0 = arith.constant 0 : i32
    %c0_i32_1 = arith.constant 0 : i32
    %c0_i32_2 = arith.constant 0 : i32
    return %c0_i32, %c0_i32_0, %c0_i32_1 : i32, i32, i32
  }
  func.func @transform_14(%arg0: i32) -> (i32, i32, i32) {
    %c0_i32 = arith.constant 0 : i32
    %c0_i32_0 = arith.constant 0 : i32
    %c0_i32_1 = arith.constant 0 : i32
    %c0_i32_2 = arith.constant 0 : i32
    return %c0_i32, %c0_i32_0, %c0_i32_1 : i32, i32, i32
  }
  func.func @transform_15(%arg0: i32) -> (i32, i32, i32) {
    %c0_i32 = arith.constant 0 : i32
    %c0_i32_0 = arith.constant 0 : i32
    %c0_i32_1 = arith.constant 0 : i32
    %c0_i32_2 = arith.constant 0 : i32
    return %c0_i32, %c0_i32_0, %c0_i32_1 : i32, i32, i32
  }
  func.func @transform_16(%arg0: i32) -> (i32, i32) {
    %c0_i32 = arith.constant 0 : i32
    %c0_i32_0 = arith.constant 0 : i32
    %c0_i32_1 = arith.constant 0 : i32
    return %c0_i32, %c0_i32_0 : i32, i32
  }
  func.func @transform_17(%arg0: i32) -> (i32, i32) {
    %c0_i32 = arith.constant 0 : i32
    %c0_i32_0 = arith.constant 0 : i32
    %c0_i32_1 = arith.constant 0 : i32
    return %c0_i32, %c0_i32_0 : i32, i32
  }
  func.func @transform_18(%arg0: i32) -> (i32, i32) {
    %c0_i32 = arith.constant 0 : i32
    %c0_i32_0 = arith.constant 0 : i32
    %c0_i32_1 = arith.constant 0 : i32
    return %c0_i32, %c0_i32_0 : i32, i32
  }
  func.func @transform_19(%arg0: i32) -> (i32, i32) {
    %c0_i32 = arith.constant 0 : i32
    %c0_i32_0 = arith.constant 0 : i32
    %c0_i32_1 = arith.constant 0 : i32
    return %c0_i32, %c0_i32_0 : i32, i32
  }
  func.func @transform_20(%arg0: i32) -> (i32, i32) {
    %c0_i32 = arith.constant 0 : i32
    %c0_i32_0 = arith.constant 0 : i32
    %c0_i32_1 = arith.constant 0 : i32
    return %c0_i32, %c0_i32_0 : i32, i32
  }
}

</mosaic_0001>

<bundles_post_ra>
// kernel: tile.9
= control target key start
LH: loop header
LB: loop body
LE: loop exit
PB: predicated region body
PF: predicated region fallthrough
CT: control target
= control target key end

     0   :  { %vm3_vm0 = vcmask 261120   ;;  %s11_s6 = smov 3  ;;  %s74_s0 = inlined_call_operand.vmem [shape: f32[2,17,32], index: 0, kind: input, shape index: {}]   ;;  %s75_s1 = inlined_call_operand.vmem [shape: f32[34,32], index: 1, kind: output, shape index: {}]  }
   0x1   :  { %v2_v0 = vld [vmem:[%s74_s0] sm:$0xff]   ;;  %v26_v1 = vld [vmem:[%s74_s0 + $0x8] sm:$0xff]  }
   0x2   :  { %v28_v2 = vld [vmem:[%s74_s0 + $0x10] ss:$8 sm:%s11_s6]   ;;  %4 = vst.msk [vmem:[%s75_s1] sm:$0xff] %vm3_vm0, %v2_v0   ;;  %27 = vst.msk [vmem:[%s75_s1 + $0x8] sm:$0xff] %vm3_vm0, %v26_v1  }
   0x3   :  { %29 = vst.msk [vmem:[%s75_s1 + $0x10] sm:$0x3] %vm3_vm0, %v28_v2   ;;  %v30_v3 = vld [vmem:[%s74_s0 + $0x19] sm:$0xff]   ;;  %v32_v4 = vld [vmem:[%s74_s0 + $0x21] sm:$0xff]  }
   0x4   :  { %31 = vst.msk [vmem:[%s75_s1 + $0x12] sm:$0xff] %vm3_vm0, %v30_v3   ;;  %33 = vst.msk [vmem:[%s75_s1 + $0x1a] sm:$0xff] %vm3_vm0, %v32_v4  }

// kernel: eq.8
= control target key start
LH: loop header
LB: loop body
LE: loop exit
PB: predicated region body
PF: predicated region fallthrough
CT: control target
= control target key end

     0   :  { %vm7_vm0 = vcmask 138240   ;;  %vm13_vm1 = vcmask 277640   ;;  %s39_s0 = inlined_call_operand.vmem [shape: s32[2,17], index: 0, kind: input, shape index: {}]   ;;  %s40_s1 = inlined_call_operand.vmem [shape: s32[34], index: 1, kind: output, shape index: {}]  }
   0x1   :  { %v4_v0 = vld [vmem:[%s39_s0] sm:$0x3]  ;;  %s22_s0 = smov 17  }
   0x2   :  { %5 = vst [vmem:[#allocation1] sm:$0x3] %v4_v0 }
   0x9   :  { %v10_v1 = vld [vmem:[#allocation1 + $0x1] sm:$0x1]   ;;  %v6_v2 = vld [vmem:[#allocation1] sm:$0x1]  }
   0xa   :  { %11 = vrot.lane.b32.xlu0 %v10_v1, %s22_s0  ;;  %8 = vst.msk [vmem:[#allocation0] sm:$0x1] %vm7_vm0, %v6_v2  }
  0x7c   :  { %v12_v3 = vpop.permute.xlu0 %11  }
  0x7d   :  { %14 = vst.msk [vmem:[#allocation0] sm:$0x1] %vm13_vm1, %v12_v3  }
  0x84   :  { %v18_v4 = vld [vmem:[#allocation0] sm:$0x1] }
  0x85   :  { %20 = vst [vmem:[%s40_s1] sm:$0x1] %v18_v4 }

// kernel: vit_forward.1
= control target key start
LH: loop header
LB: loop body
LE: loop exit
PB: predicated region body
PF: predicated region fallthrough
CT: control target
= control target key end

     0   :  { %s7750_s0 = inlined_call_operand.vmem [shape: bf16[34,48], index: 0, kind: input, shape index: {}]   ;;  %s7751_s1 = inlined_call_operand.vmem [shape: f32[34,32], index: 1, kind: input, shape index: {}]   ;;  %s7752_s2 = inlined_call_operand.vmem [shape: f32[34,34], index: 2, kind: input, shape index: {}]   ;;  %s7753_s3 = inlined_call_operand.vmem [shape: bf16[48,32], index: 3, kind: input, shape index: {}]   ;;  %s7754_s4 = inlined_call_operand.vmem [shape: f32[2,1,32], index: 4, kind: input, shape index: {}]   ;;  %s7755_s5 = inlined_call_operand.vmem [shape: f32[2,1,32], index: 5, kind: input, shape index: {}]   ;;  %s7756_s6 = inlined_call_operand.vmem [shape: bf16[2,32,96], index: 6, kind: input, shape index: {}]   ;;  %s7757_s7 = inlined_call_operand.vmem [shape: f32[2,1,96], index: 7, kind: input, shape index: {}]   ;;  %s7758_s8 = inlined_call_operand.vmem [shape: bf16[2,32,32], index: 8, kind: input, shape index: {}]   ;;  %s7759_s9 = inlined_call_operand.vmem [shape: f32[2,1,32], index: 9, kind: input, shape index: {}]   ;;  %s7760_s10 = inlined_call_operand.vmem [shape: f32[2,1,32], index: 10, kind: input, shape index: {}]   ;;  %s7761_s11 = inlined_call_operand.vmem [shape: f32[2,1,32], index: 11, kind: input, shape index: {}]   ;;  %s7762_s12 = inlined_call_operand.vmem [shape: bf16[2,32,128], index: 12, kind: input, shape index: {}]   ;;  %s7763_s13 = inlined_call_operand.vmem [shape: f32[2,1,128], index: 13, kind: input, shape index: {}]   ;;  %s7764_s14 = inlined_call_operand.vmem [shape: bf16[2,128,32], index: 14, kind: input, shape index: {}]   ;;  %s7765_s15 = inlined_call_operand.vmem [shape: f32[2,1,32], index: 15, kind: input, shape index: {}]   ;;  %s7766_s16 = inlined_call_operand.vmem [shape: f32[1,32], index: 16, kind: input, shape index: {}]   ;;  %s7767_s17 = inlined_call_operand.vmem [shape: f32[1,32], index: 17, kind: input, shape index: {}]   ;;  %s7768_s18 = inlined_call_operand.vmem [shape: bf16[32,128], index: 18, kind: input, shape index: {}]   ;;  %s7769_s19 = inlined_call_operand.vmem [shape: f32[1,128], index: 19, kind: input, shape index: {}]   ;;  %s7770_s20 = inlined_call_operand.hbm [shape: f32[2,128], index: 20, kind: output, shape index: {}]  }
   0x1   :  { %7780 = sst [smem:[#allocation5_spill]] %s7750_s0 }
   0x2   :  { %7781 = sst [smem:[#allocation6_spill]] %s7751_s1 }
   0x3   :  { %7782 = sst [smem:[#allocation7_spill]] %s7752_s2 }
   0x4   :  { %7783 = sst [smem:[#allocation8_spill]] %s7753_s3 }
   0x5   :  { %7784 = sst [smem:[#allocation9_spill]] %s7754_s4 }
   0x6   :  { %s7785_s23 = sld [smem:[#allocation8_spill]]  ;;  %v5947_v1 = vmov 0.0   ;;  %vm5948_vm0 = vmmov 0   ;;  %vm114_vm1 = vcmask 392192   ;;  %s7786_s28 = sld [smem:[#allocation5_spill]] }
   0x7   :  { %4732 = vmatprep.subr.bf16.mxu0 %v5947_v1  ;;  %4750 = vmatprep.subr.bf16.mxu1 %v5947_v1 }
   0x8   :  { %4738 = vmatprep.mubr.msk.bf16.mxu0 %vm5948_vm0, %v5947_v1  ;;  %4754 = vmatprep.mubr.msk.bf16.mxu1 %vm5948_vm0, %v5947_v1 }
   0xc   :  { %v5660_v0 = vld [vmem:[%s7785_s23] sm:$0xff]   ;;  %v5661_v2 = vld [vmem:[%s7785_s23 + $0x8] sm:$0xff]   ;;  %v5662_v3 = vld [vmem:[%s7785_s23 + $0x10] sm:$0xff]  }
   0xd   :  { %4733 = vmatpush3.bf16.msra.mxu0 %v5660_v0  ;;  %v5663_v4 = vld [vmem:[%s7786_s28] sm:$0xff]   ;;  %v5664_v5 = vld [vmem:[%s7786_s28 + $0x8] sm:$0xff]   ;;  %v5665_v6 = vld [vmem:[%s7786_s28 + $0x10] ss:$0 sps:$4 sm:$0x11]  }
   0xe   :  { %4734 = vmatprep.subr.bf16.mxu0 %v5947_v1 }
  0x11   :  { %4735 = vmatpush3.bf16.msra.mxu0 %v5661_v2 }
  0x12   :  { %4736 = vmatprep.subr.bf16.mxu0 %v5947_v1 }
  0x15   :  { %4737 = vmatpush3.bf16.msra.mxu0 %v5662_v3 }
  0x18   :  { %4739 = vmatmul.mubr.msk.bf16.vlgmr.msra.gmra.mrb[0].mxu0 %vm114_vm1, %v5663_v4 }
  0x19   :  { %4742 = vmatprep.mubr.msk.bf16.mxu0 %vm5948_vm0, %v5947_v1 }
  0x20   :  { %4743 = vmatmul.mubr.msk.bf16.gmra.mrb[4].mxu0 %vm114_vm1, %v5664_v5 }
  0x21   :  { %4746 = vmatprep.mubr.msk.bf16.mxu0 %vm5948_vm0, %v5947_v1 }
  0x22   :  { %25 = vsyncpa [#allocation3], 0  ;;  %s7787_s22 = sld [smem:[#allocation6_spill]]  ;;  %vm187_vm2 = vcmask 261120   ;;  %vm200_vm3 = vcmask 254976   ;;  %v5666_v59 = vld [vmem:[%s7756_s6] sm:$0xff]  }
  0x23   :  { %4751 = vmatpush3.bf16.msra.mxu1 %v5666_v59  ;;  %v5667_v60 = vld [vmem:[%s7756_s6 + $0x8] sm:$0xff]   ;;  %s5949_s3 = smov 120   ;;  %s5950_s26 = smov 112   ;;  %vm413_vm4 = vcmask 64512   ;;  %vm1175_vm6 = vcmask 1041408   ;;  %vm924_vm7 = vcmask 277504  }
  0x24   :  { %4752 = vmatprep.subr.bf16.mxu1 %v5947_v1  ;;  %s5951_s27 = smov 104   ;;  %s5953_s28 = smov 96   ;;  %vm6282_vm5 = vmpackc.low %vm413_vm4, %vm413_vm4  ;;  %vm937_vm8 = vcmask 271360   ;;  %vm1696_vm9 = vcmask 130048   ;;  %vm1702_vm10 = vcmask 195584   ;;  %vm4157_vm11 = vcmask 1040384  }
  0x25   :  { %s5954_s4 = smov 64   ;;  %s7791_s0 = sld [smem:[#allocation7_spill]] }
  0x26   :  { %s5955_s21 = smov 8   ;;  %s7778_s25 = smov 16  }
  0x27   :  { %4753 = vmatpush3.bf16.msra.mxu1 %v5667_v60  ;;  %s7776_s29 = smov 24   ;;  %s7792_s2 = smov 16  }
  0x28   :  { %4747 = vmatmul.mubr.msk.bf16.gmra.mrb[8].mxu0 %vm114_vm1, %v5665_v6  ;;  %v78_v7 = vld [vmem:[%s7787_s22] sm:$0xff]  ;;  %v79_v9 = vld [vmem:[%s7787_s22 + $0x8] sm:$0xff]  ;;  %v80_v16 = vld [vmem:[%s7787_s22 + $0x10] sm:$0xff] }
  0x29   :  { %4801 = vmatprep.mubr.msk.f32.mxu0 %vm5948_vm0, %v5947_v1  ;;  %v81_v19 = vld [vmem:[%s7787_s22 + $0x18] sm:$0xff]  ;;  %v82_v26 = vld [vmem:[%s7787_s22 + $0x20] sm:$0x3]  ;;  %s7788_s22 = sld [smem:[#allocation9_spill]] }
  0xeb   :  { %v158_v8 = vpop.f32.mrb[0].mxu0 }
  0xec   :  { %v6102_v10 = vadd.f32 %v158_v8, %v78_v7  ;;  %v4740_v11 = vpop.f32.mrb[1].mxu0 }
  0xed   :  { %v161_v12 = vpop.f32.mrb[2].mxu0 }
  0xee   :  { %v6104_v13 = vadd.f32 %v161_v12, %v79_v9  ;;  %v4741_v14 = vpop.f32.mrb[3].mxu0  ;;  %v188_v15 = vsel %vm187_vm2, %v6102_v10, 0.0 }
  0xef   :  { %189 = vadd.xlane.f32.xlu0 %v188_v15 }
  0xf0   :  { %v191_v17 = vsel %vm187_vm2, %v6104_v13, 0.0 }
  0xf3   :  { %192 = vadd.xlane.f32.xlu0 %v191_v17  ;;  %v166_v18 = vpop.f32.mrb[4].mxu0 }
  0xf4   :  { %v6116_v20 = vadd.f32 %v166_v18, %v80_v16  ;;  %v4744_v21 = vpop.f32.mrb[5].mxu0  ;;  %v4279_v16 = vld [vmem:[%s7788_s22] ss:$0 sm:$0xff] }
  0xf5   :  { %v169_v22 = vpop.f32.mrb[6].mxu0 }
  0xf6   :  { %v6118_v23 = vadd.f32 %v169_v22, %v81_v19  ;;  %v4745_v24 = vpop.f32.mrb[7].mxu0  ;;  %v194_v25 = vsel %vm187_vm2, %v6116_v20, 0.0  ;;  %v4280_v22 = vld [vmem:[%s7755_s5] ss:$0 sm:$0xff] }
  0xf7   :  { %195 = vadd.xlane.f32.xlu1 %v194_v25 }
  0xf8   :  { %v197_v27 = vsel %vm187_vm2, %v6118_v23, 0.0 }
  0xfb   :  { %198 = vadd.xlane.f32.xlu1 %v197_v27  ;;  %v174_v28 = vpop.f32.mrb[8].mxu0 }
  0xfc   :  { %v6127_v29 = vadd.f32 %v174_v28, %v82_v26  ;;  %v4748_v30 = vpop.f32.mrb[9].mxu0 }
  0xfd   :  { %v177_v31 = vpop.f32.mrb[10].mxu0 }
  0xfe   :  { %v201_v32 = vsel %vm200_vm3, %v6127_v29, 0.0  ;;  %v4749_v33 = vpop.f32.mrb[11].mxu0 }
  0xff   :  { %202 = vadd.xlane.f32.xlu0 %v201_v32 }
 0x17c   :  { %v190_v34 = vpop.xlane.xlu0 %189 }
 0x17d   :  { %v205_v35 = vmul.f32 0.03125, %v190_v34 }
 0x17f   :  { %v210_v36 = vsub.f32 %v6102_v10, %v205_v35 }
 0x180   :  { %v193_v37 = vpop.xlane.xlu0 %192 }
 0x181   :  { %v206_v38 = vmul.f32 0.03125, %v193_v37  ;;  %v215_v39 = vmul.f32 %v210_v36, %v210_v36 }
 0x183   :  { %v211_v40 = vsub.f32 %v6104_v13, %v206_v38  ;;  %v220_v41 = vsel %vm187_vm2, %v215_v39, 0.0 }
 0x184   :  { %v196_v42 = vpop.xlane.xlu1 %195  ;;  %221 = vadd.xlane.f32.xlu1 %v220_v41 }
 0x185   :  { %v207_v43 = vmul.f32 0.03125, %v196_v42  ;;  %v216_v44 = vmul.f32 %v211_v40, %v211_v40 }
 0x187   :  { %v212_v45 = vsub.f32 %v6116_v20, %v207_v43  ;;  %v223_v46 = vsel %vm187_vm2, %v216_v44, 0.0  ;;  %v4281_v43 = vld [vmem:[%s7757_s7] ss:$0 sm:$0xff] }
 0x188   :  { %v199_v47 = vpop.xlane.xlu1 %198  ;;  %224 = vadd.xlane.f32.xlu0 %v223_v46 }
 0x189   :  { %v208_v48 = vmul.f32 0.03125, %v199_v47  ;;  %v217_v49 = vmul.f32 %v212_v45, %v212_v45 }
 0x18b   :  { %v213_v50 = vsub.f32 %v6118_v23, %v208_v48  ;;  %v226_v51 = vsel %vm187_vm2, %v217_v49, 0.0 }
 0x18c   :  { %227 = vadd.xlane.f32.xlu1 %v226_v51  ;;  %v203_v52 = vpop.xlane.xlu0 %202 }
 0x18d   :  { %v209_v53 = vmul.f32 0.03125, %v203_v52  ;;  %v218_v54 = vmul.f32 %v213_v50, %v213_v50 }
 0x18f   :  { %v214_v55 = vsub.f32 %v6127_v29, %v209_v53  ;;  %v229_v56 = vsel %vm187_vm2, %v218_v54, 0.0 }
 0x190   :  { %230 = vadd.xlane.f32.xlu0 %v229_v56 }
 0x191   :  { %v219_v57 = vmul.f32 %v214_v55, %v214_v55 }
 0x193   :  { %v232_v58 = vsel %vm200_vm3, %v219_v57, 0.0 }
 0x194   :  { %233 = vadd.xlane.f32.xlu1 %v232_v58 }
 0x211   :  { %v222_v61 = vpop.xlane.xlu1 %221 }
 0x212   :  { %v235_v62 = vmul.f32 0.03125, %v222_v61  ;;  %v5952_v61 = vmov 0.0|0.0  }
 0x213   :  { %5310 = vmatprep.subr.bf16.mxu1 %v5952_v61  ;;  %5318 = vmatprep.subr.bf16.mxu0 %v5952_v61 }
 0x214   :  { %v240_v63 = vadd.f32 1e-05, %v235_v62 }
 0x215   :  { %v225_v0 = vpop.xlane.xlu0 %224 }
 0x216   :  { %5696 = vrsqrt.f32 %v240_v63  ;;  %v236_v2 = vmul.f32 0.03125, %v225_v0 }
 0x218   :  { %v241_v3 = vadd.f32 1e-05, %v236_v2 }
 0x219   :  { %v228_v4 = vpop.xlane.xlu1 %227 }
 0x21a   :  { %5698 = vrsqrt.f32 %v241_v3  ;;  %v237_v5 = vmul.f32 0.03125, %v228_v4 }
 0x21c   :  { %v242_v6 = vadd.f32 1e-05, %v237_v5 }
 0x21d   :  { %v231_v7 = vpop.xlane.xlu0 %230 }
 0x21e   :  { %5700 = vrsqrt.f32 %v242_v6  ;;  %v238_v8 = vmul.f32 0.03125, %v231_v7 }
 0x220   :  { %v5697_v9 = vpop.eup %5696  ;;  %v243_v11 = vadd.f32 1e-05, %v238_v8 }
 0x221   :  { %v234_v12 = vpop.xlane.xlu1 %233  ;;  %v250_v14 = vmul.f32 %v5697_v9, %v210_v36 }
 0x222   :  { %5702 = vrsqrt.f32 %v243_v11  ;;  %v239_v15 = vmul.f32 0.03125, %v234_v12 }
 0x223   :  { %v261_v21 = vmul.f32 %v4279_v16, %v250_v14 }
 0x224   :  { %v5699_v17 = vpop.eup %5698  ;;  %v244_v18 = vadd.f32 1e-05, %v239_v15 }
 0x225   :  { %v251_v19 = vmul.f32 %v5699_v17, %v211_v40  ;;  %v272_v26 = vadd.f32 %v4280_v22, %v261_v21 }
 0x226   :  { %5704 = vrsqrt.f32 %v244_v18 }
 0x227   :  { %v262_v24 = vmul.f32 %v4279_v16, %v251_v19 }
 0x228   :  { %v5701_v25 = vpop.eup %5700 }
 0x229   :  { %v273_v27 = vadd.f32 %v4280_v22, %v262_v24  ;;  %v252_v28 = vmul.f32 %v5701_v25, %v212_v45 }
 0x22b   :  { %v277_v30 = vpack.c.bf16 %v273_v27, %v272_v26  ;;  %v263_v33 = vmul.f32 %v4279_v16, %v252_v28 }
 0x22c   :  { %v5703_v31 = vpop.eup %5702 }
 0x22d   :  { %4755 = vmatmul.mubr.msk.bf16.vlgmr.msra.gmra.mrb[0].mxu1 %vm187_vm2, %v277_v30  ;;  %v253_v32 = vmul.f32 %v5703_v31, %v213_v50  ;;  %v274_v36 = vadd.f32 %v4280_v22, %v263_v33 }
 0x22e   :  { %4758 = vmatprep.mubr.msk.bf16.mxu1 %vm5948_vm0, %v5947_v1 }
 0x22f   :  { %v264_v34 = vmul.f32 %v4279_v16, %v253_v32 }
 0x230   :  { %v5705_v35 = vpop.eup %5704 }
 0x231   :  { %v275_v37 = vadd.f32 %v4280_v22, %v264_v34  ;;  %v254_v38 = vmul.f32 %v5705_v35, %v214_v55 }
 0x233   :  { %v278_v39 = vpack.c.bf16 %v275_v37, %v274_v36  ;;  %v265_v40 = vmul.f32 %v4279_v16, %v254_v38 }
 0x235   :  { %4759 = vmatmul.mubr.msk.bf16.gmra.mrb[4].mxu1 %vm187_vm2, %v278_v39  ;;  %v276_v41 = vadd.f32 %v4280_v22, %v265_v40 }
 0x236   :  { %4762 = vmatprep.mubr.msk.bf16.mxu1 %vm5948_vm0, %v5947_v1 }
 0x237   :  { %v279_v42 = vpack.c.bf16 %v276_v41, %v276_v41 }
 0x23d   :  { %4763 = vmatmul.mubr.msk.bf16.gmra.mrb[8].mxu1 %vm187_vm2, %v279_v42 }
 0x23e   :  { %4776 = vmatprep.mubr.msk.f32.mxu1 %vm5948_vm0, %v5947_v1 }
 0x300   :  { %v346_v44 = vpop.f32.mrb[0].mxu1 }
 0x301   :  { %v6166_v45 = vadd.f32 %v4281_v43, %v346_v44  ;;  %v4756_v46 = vpop.f32.mrb[1].mxu1 }
 0x302   :  { %v349_v47 = vpop.f32.mrb[2].mxu1 }
 0x303   :  { %v6168_v48 = vadd.f32 %v4281_v43, %v349_v47  ;;  %373 = vrot.lane.b32.xlu0 %v6166_v45, %s5949_s3  ;;  %v4757_v49 = vpop.f32.mrb[3].mxu1 }
 0x305   :  { %375 = vrot.lane.b32.xlu1 %v6168_v48, %s5949_s3  ;;  %v5440_v63 = vpack.i.bf16 %v6168_v48, %v6166_v45 }
 0x307   :  { %383 = vrot.lane.b32.xlu0 %v6166_v45, %s5950_s26 }
 0x308   :  { %v354_v50 = vpop.f32.mrb[4].mxu1 }
 0x309   :  { %v6176_v51 = vadd.f32 %v4281_v43, %v354_v50  ;;  %v4760_v52 = vpop.f32.mrb[5].mxu1 }
 0x30a   :  { %v357_v53 = vpop.f32.mrb[6].mxu1 }
 0x30b   :  { %v6178_v54 = vadd.f32 %v4281_v43, %v357_v53  ;;  %377 = vrot.lane.b32.xlu1 %v6176_v51, %s5949_s3  ;;  %v4761_v55 = vpop.f32.mrb[7].mxu1 }
 0x30d   :  { %389 = vrot.lane.b32.xlu0 %v6178_v54, %s5950_s26  ;;  %v5445_v62 = vpack.i.bf16 %v6178_v54, %v6176_v51 }
 0x30f   :  { %379 = vrot.lane.b32.xlu1 %v6178_v54, %s5949_s3 }
 0x310   :  { %v362_v56 = vpop.f32.mrb[8].mxu1 }
 0x311   :  { %v6186_v57 = vadd.f32 %v4281_v43, %v362_v56  ;;  %v4764_v58 = vpop.f32.mrb[9].mxu1 }
 0x312   :  { %v365_v59 = vpop.f32.mrb[10].mxu1 }
 0x313   :  { %385 = vrot.lane.b32.xlu1 %v6168_v48, %s5950_s26  ;;  %381 = vrot.lane.b32.xlu0 %v6186_v57, %s5949_s3  ;;  %v4765_v60 = vpop.f32.mrb[11].mxu1 }
 0x317   :  { %387 = vrot.lane.b32.xlu1 %v6176_v51, %s5950_s26  ;;  %395 = vrot.lane.b32.xlu0 %v6168_v48, %s5951_s27 }
 0x31b   :  { %393 = vrot.lane.b32.xlu1 %v6166_v45, %s5951_s27  ;;  %399 = vrot.lane.b32.xlu0 %v6178_v54, %s5951_s27 }
 0x31f   :  { %397 = vrot.lane.b32.xlu1 %v6176_v51, %s5951_s27  ;;  %401 = vrot.lane.b32.xlu0 %v6186_v57, %s5951_s27 }
 0x323   :  { %391 = vrot.lane.b32.xlu1 %v6186_v57, %s5950_s26  ;;  %5446 = vrot.lane.b32.xlu0 %v5445_v62, %s5953_s28 }
 0x327   :  { %5441 = vrot.lane.b32.xlu1 %v5440_v63, %s5953_s28 }
 0x375   :  { %v6214_v0 = vpop.permute.xlu0 %373 }
 0x377   :  { %v6216_v2 = vpop.permute.xlu1 %375 }
 0x378   :  { %v5450_v3 = vpack.i.bf16 %v6216_v2, %v6214_v0 }
 0x379   :  { %v6221_v4 = vpop.permute.xlu0 %383 }
 0x37a   :  { %5451 = vrot.lane.b32.xlu1 %v5450_v3, %s5953_s28 }
 0x37d   :  { %v6223_v5 = vpop.permute.xlu1 %377 }
 0x37e   :  { %411 = vrot.lane.b32.xlu1 %v6186_v57, %s5953_s28 }
 0x37f   :  { %v6227_v6 = vpop.permute.xlu0 %389 }
 0x381   :  { %v6229_v7 = vpop.permute.xlu1 %379 }
 0x382   :  { %v5455_v8 = vpack.i.bf16 %v6229_v7, %v6223_v5 }
 0x384   :  { %5456 = vrot.lane.b32.xlu0 %v5455_v8, %s5953_s28 }
 0x385   :  { %v6234_v9 = vpop.permute.xlu1 %385  ;;  %v6236_v11 = vpop.permute.xlu0 %381 }
 0x386   :  { %532 = vrot.lane.b32.xlu1 %v6236_v11, %s5953_s28  ;;  %v5460_v12 = vpack.i.bf16 %v6234_v9, %v6221_v4 }
 0x388   :  { %5461 = vrot.lane.b32.xlu0 %v5460_v12, %s5953_s28 }
 0x389   :  { %v6243_v14 = vpop.permute.xlu1 %387  ;;  %v6249_v16 = vpop.permute.xlu0 %395 }
 0x38a   :  { %v6247_v15 = vpack.i.bf16 %v6227_v6, %v6243_v14 }
 0x38c   :  { %5466 = vrot.lane.b32.xlu0 %v6247_v15, %s5953_s28 }
 0x38d   :  { %v6253_v17 = vpop.permute.xlu1 %393  ;;  %v6261_v19 = vpop.permute.xlu0 %399 }
 0x38e   :  { %v6257_v18 = vpack.i.bf16 %v6249_v16, %v6253_v17 }
 0x390   :  { %5471 = vrot.lane.b32.xlu1 %v6257_v18, %s5953_s28 }
 0x391   :  { %v6263_v21 = vpop.permute.xlu1 %397  ;;  %v6275_v25 = vpop.permute.xlu0 %401 }
 0x392   :  { %v6267_v22 = vpack.i.bf16 %v6261_v19, %v6263_v21 }
 0x394   :  { %5476 = vrot.lane.b32.xlu0 %v6267_v22, %s5953_s28 }
 0x395   :  { %v6271_v24 = vpop.permute.xlu1 %391  ;;  %v5447_v32 = vpop.permute.xlu0 %5446 }
 0x396   :  { %652 = vrot.lane.b32.xlu1 %v6271_v24, %s5953_s28  ;;  %v5449_v33 = vunpack.i.h.bf16 %v5447_v32  ;;  %v5448_v34 = vunpack.i.l.bf16 %v5447_v32  ;;  %v6425_v32 = vld [vmem:[%s7791_s0] sm:$0xff] }
 0x398   :  { %772 = vrot.lane.b32.xlu0 %v6275_v25, %s5953_s28  ;;  %v5315_v35 = vpack.c.bf16 %v5449_v33, %v5448_v34 }
 0x399   :  { %v5442_v26 = vpop.permute.xlu1 %5441 }
 0x39a   :  { %v5444_v27 = vunpack.i.h.bf16 %v5442_v26  ;;  %v5443_v28 = vunpack.i.l.bf16 %v5442_v26  ;;  %5486 = vrot.lane.b32.xlu1 %v5450_v3, %s5954_s4 }
 0x39c   :  { %v5311_v31 = vpack.c.bf16 %v5444_v27, %v5443_v28  ;;  %5481 = vrot.lane.b32.xlu0 %v5440_v63, %s5954_s4 }
 0x39e   :  { %5313 = vmatpush3.bf16.xpose.msk.msra.mxu1 %vm6282_vm5, %v5311_v31  ;;  %1154 = vrot.lane.b32.xlu1 %v6186_v57, %s5954_s4 }
 0x39f   :  { %5314 = vmatprep.subr.bf16.mxu1 %v5952_v61 }
 0x3a0   :  { %5491 = vrot.lane.b32.xlu0 %v5445_v62, %s5954_s4 }
 0x3a2   :  { %5501 = vrot.lane.b32.xlu1 %v5460_v12, %s5954_s4 }
 0x3a4   :  { %5496 = vrot.lane.b32.xlu0 %v5455_v8, %s5954_s4 }
 0x3a6   :  { %5317 = vmatpush3.bf16.xpose.msk.msra.mxu1 %vm6282_vm5, %v5315_v35 }
 0x3a7   :  { %4774 = vmatprep.subr.mxu1 %v5947_v1 }
 0x3a8   :  { %1276 = vrot.lane.b32.xlu0 %v6236_v11, %s5954_s4 }
 0x3ec   :  { %v5452_v36 = vpop.permute.xlu1 %5451 }
 0x3ed   :  { %v5454_v37 = vunpack.i.h.bf16 %v5452_v36  ;;  %v5453_v38 = vunpack.i.l.bf16 %v5452_v36 }
 0x3ef   :  { %v5319_v39 = vpack.c.bf16 %v5454_v37, %v5453_v38  ;;  %v6433_v37 = vld [vmem:[%s7791_s0 + $0x8] sm:$0xff] }
 0x3f0   :  { %v412_v40 = vpop.permute.xlu1 %411 }
 0x3f1   :  { %4775 = vmatpush3.xpose.msk.msra.mxu1 %vm413_vm4, %v412_v40  ;;  %5321 = vmatpush3.bf16.xpose.msk.msra.mxu0 %vm6282_vm5, %v5319_v39 }
 0x3f2   :  { %5322 = vmatprep.subr.bf16.mxu0 %v5952_v61  ;;  %5326 = vmatprep.subr.bf16.mxu1 %v5952_v61 }
 0x3f4   :  { %4777 = vmatmul.mubr.msk.f32.vlgmr.msra.gmra.mrb[12].mxu1 %vm413_vm4, %v6166_v45 }
 0x3f5   :  { %4779 = vmatprep.mubr.msk.f32.mxu1 %vm5948_vm0, %v5947_v1 }
 0x3f6   :  { %v5457_v41 = vpop.permute.xlu0 %5456 }
 0x3f7   :  { %v5459_v42 = vunpack.i.h.bf16 %v5457_v41  ;;  %v5458_v43 = vunpack.i.l.bf16 %v5457_v41 }
 0x3f8   :  { %4780 = vmatmul.mubr.msk.f32.gmra.mrb[14].mxu1 %vm413_vm4, %v6168_v48  ;;  %v533_v48 = vpop.permute.xlu1 %532 }
 0x3f9   :  { %v5323_v44 = vpack.c.bf16 %v5459_v42, %v5458_v43  ;;  %4782 = vmatprep.mubr.msk.f32.mxu1 %vm5948_vm0, %v5947_v1  ;;  %v6443_v43 = vld [vmem:[%s7791_s0 + $0x10] sm:$0xff] }
 0x3fa   :  { %v5462_v46 = vpop.permute.xlu0 %5461 }
 0x3fb   :  { %v5464_v47 = vunpack.i.h.bf16 %v5462_v46  ;;  %v5463_v49 = vunpack.i.l.bf16 %v5462_v46  ;;  %5325 = vmatpush3.bf16.xpose.msk.msra.mxu0 %vm6282_vm5, %v5323_v44 }
 0x3fc   :  { %4783 = vmatmul.mubr.msk.f32.gmra.mrb[16].mxu1 %vm413_vm4, %v6176_v51  ;;  %4799 = vmatprep.subr.mxu0 %v5947_v1 }
 0x3fd   :  { %v5327_v45 = vpack.c.bf16 %v5464_v47, %v5463_v49  ;;  %4785 = vmatprep.mubr.msk.f32.mxu1 %vm5948_vm0, %v5947_v1 }
 0x3fe   :  { %v5467_v50 = vpop.permute.xlu0 %5466 }
 0x3ff   :  { %5329 = vmatpush3.bf16.xpose.msk.msra.mxu1 %vm6282_vm5, %v5327_v45  ;;  %v5469_v52 = vunpack.i.h.bf16 %v5467_v50  ;;  %v5468_v53 = vunpack.i.l.bf16 %v5467_v50 }
 0x400   :  { %4786 = vmatmul.mubr.msk.f32.gmra.mrb[18].mxu1 %vm413_vm4, %v6178_v54  ;;  %5330 = vmatprep.subr.bf16.mxu1 %v5952_v61 }
 0x401   :  { %4788 = vmatprep.mubr.msk.f32.mxu1 %vm5948_vm0, %v5947_v1  ;;  %v5331_v58 = vpack.c.bf16 %v5469_v52, %v5468_v53 }
 0x402   :  { %v5472_v51 = vpop.permute.xlu1 %5471 }
 0x403   :  { %v5474_v55 = vunpack.i.h.bf16 %v5472_v51  ;;  %v5473_v56 = vunpack.i.l.bf16 %v5472_v51  ;;  %4800 = vmatpush3.xpose.msk.msra.mxu0 %vm413_vm4, %v533_v48  ;;  %v6453_v48 = vld [vmem:[%s7791_s0 + $0x18] sm:$0xff] }
 0x404   :  { %4789 = vmatmul.mubr.msk.f32.gmra.mrb[20].mxu1 %vm413_vm4, %v6186_v57  ;;  %5334 = vmatprep.subr.bf16.mxu0 %v5952_v61 }
 0x405   :  { %v5335_v59 = vpack.c.bf16 %v5474_v55, %v5473_v56  ;;  %4826 = vmatprep.mubr.msk.f32.mxu1 %vm5948_vm0, %v5947_v1  ;;  %v6463_v56 = vld [vmem:[%s7791_s0 + $0x20] sm:$0x3] }
 0x406   :  { %v5477_v54 = vpop.permute.xlu0 %5476  ;;  %4802 = vmatmul.mubr.msk.f32.vlgmr.msra.gmra.mrb[12].mxu0 %vm413_vm4, %v6214_v0 }
 0x407   :  { %5333 = vmatpush3.bf16.xpose.msk.msra.mxu1 %vm6282_vm5, %v5331_v58  ;;  %5337 = vmatpush3.bf16.xpose.msk.msra.mxu0 %vm6282_vm5, %v5335_v59  ;;  %v5479_v57 = vunpack.i.h.bf16 %v5477_v54  ;;  %v5478_v60 = vunpack.i.l.bf16 %v5477_v54 }
 0x408   :  { %4804 = vmatprep.mubr.msk.f32.mxu0 %vm5948_vm0, %v5947_v1  ;;  %4824 = vmatprep.subr.mxu1 %v5947_v1  ;;  %v653_v63 = vpop.permute.xlu1 %652 }
 0x409   :  { %5338 = vmatprep.subr.bf16.mxu0 %v5952_v61  ;;  %v5339_v0 = vpack.c.bf16 %v5479_v57, %v5478_v60 }
 0x40a   :  { %v773_v62 = vpop.permute.xlu0 %772  ;;  %4805 = vmatmul.mubr.msk.f32.gmra.mrb[14].mxu0 %vm413_vm4, %v6216_v2 }
 0x40b   :  { %4807 = vmatprep.mubr.msk.f32.mxu0 %vm5948_vm0, %v5947_v1 }
 0x40c   :  { %v5487_v2 = vpop.permute.xlu1 %5486 }
 0x40d   :  { %v5488_v12 = vunpack.i.l.bf16 %v5487_v2 }
 0x40e   :  { %v5482_v3 = vpop.permute.xlu0 %5481  ;;  %4808 = vmatmul.mubr.msk.f32.gmra.mrb[16].mxu0 %vm413_vm4, %v6223_v5  ;;  %v5489_v5 = vunpack.i.h.bf16 %v5487_v2 }
 0x40f   :  { %4825 = vmatpush3.xpose.msk.msra.mxu1 %vm413_vm4, %v653_v63  ;;  %5341 = vmatpush3.bf16.xpose.msk.msra.mxu0 %vm6282_vm5, %v5339_v0 }
 0x410   :  { %4810 = vmatprep.mubr.msk.f32.mxu0 %vm5948_vm0, %v5947_v1  ;;  %5422 = vmatprep.subr.bf16.mxu1 %v5952_v61  ;;  %v1155_v31 = vpop.permute.xlu1 %1154 }
 0x411   :  { %4849 = vmatprep.subr.mxu0 %v5947_v1 }
 0x412   :  { %v5492_v8 = vpop.permute.xlu0 %5491  ;;  %4811 = vmatmul.mubr.msk.f32.gmra.mrb[18].mxu0 %vm413_vm4, %v6229_v7  ;;  %4827 = vmatmul.mubr.msk.f32.vlgmr.msra.gmra.mrb[22].mxu1 %vm413_vm4, %v6221_v4  ;;  %v5349_v4 = vpack.c.bf16 %v5489_v5, %v5488_v12 }
 0x413   :  { %5425 = vmatpush3.bf16.xpose.msk.msra.mxu1 %vm6282_vm5, %v5335_v59  ;;  %4813 = vmatprep.mubr.msk.f32.mxu0 %vm5948_vm0, %v5947_v1  ;;  %v5493_v28 = vunpack.i.l.bf16 %v5492_v8 }
 0x414   :  { %4829 = vmatprep.mubr.msk.f32.mxu1 %vm5948_vm0, %v5947_v1  ;;  %5423 = vmatprep.subr.bf16.mxu1 %v5952_v61 }
 0x416   :  { %v5497_v26 = vpop.permute.xlu0 %5496  ;;  %4814 = vmatmul.mubr.msk.f32.gmra.mrb[20].mxu0 %vm413_vm4, %v6236_v11  ;;  %4830 = vmatmul.mubr.msk.f32.gmra.mrb[24].mxu1 %vm413_vm4, %v6234_v9  ;;  %v5484_v11 = vunpack.i.h.bf16 %v5482_v3 }
 0x417   :  { %4850 = vmatpush3.xpose.msk.msra.mxu0 %vm413_vm4, %v773_v62  ;;  %4832 = vmatprep.mubr.msk.f32.mxu1 %vm5948_vm0, %v5947_v1  ;;  %v5499_v7 = vunpack.i.h.bf16 %v5497_v26  ;;  %v5498_v27 = vunpack.i.l.bf16 %v5497_v26 }
 0x418   :  { %4851 = vmatprep.mubr.msk.f32.mxu0 %vm5948_vm0, %v5947_v1  ;;  %5348 = vmatprep.subr.bf16.mxu0 %v5952_v61 }
 0x419   :  { %v5352_v9 = vpack.c.bf16 %v5499_v7, %v5498_v27 }
 0x41a   :  { %4833 = vmatmul.mubr.msk.f32.gmra.mrb[26].mxu1 %vm413_vm4, %v6243_v14  ;;  %4852 = vmatmul.mubr.msk.f32.vlgmr.msra.gmra.mrb[22].mxu0 %vm413_vm4, %v6253_v17  ;;  %v5483_v14 = vunpack.i.l.bf16 %v5482_v3  ;;  %v1277_v17 = vpop.permute.xlu0 %1276 }
 0x41b   :  { %5426 = vmatpush3.bf16.xpose.msk.msra.mxu1 %vm6282_vm5, %v5339_v0  ;;  %5350 = vmatpush3.bf16.msra.mxu0 %v5349_v4 }
 0x41c   :  { %4835 = vmatprep.mubr.msk.f32.mxu1 %vm5948_vm0, %v5947_v1  ;;  %4854 = vmatprep.mubr.msk.f32.mxu0 %vm5948_vm0, %v5947_v1 }
 0x41d   :  { %5351 = vmatprep.subr.bf16.mxu0 %v5952_v61  ;;  %5424 = vmatprep.subr.mxu1 %v5947_v1 }
 0x41e   :  { %4836 = vmatmul.mubr.msk.f32.gmra.mrb[28].mxu1 %vm413_vm4, %v6227_v6  ;;  %4855 = vmatmul.mubr.msk.f32.gmra.mrb[24].mxu0 %vm413_vm4, %v6249_v16  ;;  %v5343_v6 = vpack.c.bf16 %v5484_v11, %v5483_v14  ;;  %v5494_v16 = vunpack.i.h.bf16 %v5492_v8 }
 0x41f   :  { %5353 = vmatpush3.bf16.msra.mxu0 %v5352_v9  ;;  %4838 = vmatprep.mubr.msk.f32.mxu1 %vm5948_vm0, %v5947_v1 }
 0x420   :  { %4857 = vmatprep.mubr.msk.f32.mxu0 %vm5948_vm0, %v5947_v1  ;;  %4899 = vmatprep.subr.mxu0 %v5947_v1 }
 0x422   :  { %4839 = vmatmul.mubr.msk.f32.gmra.mrb[30].mxu1 %vm413_vm4, %v6271_v24  ;;  %4858 = vmatmul.mubr.msk.f32.gmra.mrb[26].mxu0 %vm413_vm4, %v6263_v21  ;;  %v5346_v21 = vpack.c.bf16 %v5494_v16, %v5493_v28 }
 0x423   :  { %5427 = vmatpush3.xpose.msk.msra.mxu1 %vm413_vm4, %v773_v62  ;;  %4900 = vmatpush3.msk.msra.mxu0 %vm1175_vm6, %v1277_v17 }
 0x424   :  { %4860 = vmatprep.mubr.msk.f32.mxu1 %vm5948_vm0, %v5947_v1  ;;  %5342 = vmatprep.subr.bf16.mxu1 %v5952_v61 }
 0x425   :  { %4901 = vmatprep.mubr.msk.f32.mxu0 %vm5948_vm0, %v5947_v1  ;;  %5360 = vmatprep.subr.bf16.mxu0 %v5952_v61 }
 0x426   :  { %4861 = vmatmul.mubr.msk.f32.vlgmr.msra.gmra.mrb[32].mxu1 %vm413_vm4, %v6261_v19 }
 0x427   :  { %5344 = vmatpush3.bf16.msra.mxu1 %v5343_v6  ;;  %4863 = vmatprep.mubr.msk.f32.mxu1 %vm5948_vm0, %v5947_v1 }
 0x428   :  { %5345 = vmatprep.subr.bf16.mxu1 %v5952_v61 }
 0x42a   :  { %4864 = vmatmul.mubr.msk.f32.gmra.mrb[34].mxu1 %vm413_vm4, %v6275_v25 }
 0x42b   :  { %5347 = vmatpush3.bf16.msra.mxu1 %v5346_v21  ;;  %4876 = vmatprep.mubr.msk.f32.mxu1 %vm5948_vm0, %v5947_v1 }
 0x42c   :  { %4874 = vmatprep.subr.mxu1 %v5947_v1 }
 0x42f   :  { %4875 = vmatpush3.msk.msra.mxu1 %vm1175_vm6, %v1155_v31 }
 0x430   :  { %5354 = vmatprep.subr.bf16.mxu1 %v5952_v61 }
 0x4c7   :  { %v500_v19 = vpop.f32.mrb[12].mxu1 }
 0x4c8   :  { %v884_v33 = vmul.f32 0.35355338, %v500_v19  ;;  %v4778_v34 = vpop.f32.mrb[13].mxu1 }
 0x4ca   :  { %v6428_v35 = vadd.f32 %v884_v33, %v6425_v32 }
 0x4cb   :  { %v505_v36 = vpop.f32.mrb[14].mxu1 }
 0x4cc   :  { %v885_v38 = vmul.f32 0.35355338, %v505_v36  ;;  %v4781_v39 = vpop.f32.mrb[15].mxu1  ;;  %v925_v40 = vsel %vm924_vm7, %v6428_v35, -inf }
 0x4cd   :  { %926 = vmax.xlane.f32.xlu1 %v925_v40 }
 0x4ce   :  { %v6438_v41 = vadd.f32 %v885_v38, %v6433_v37 }
 0x4cf   :  { %v510_v42 = vpop.f32.mrb[16].mxu1 }
 0x4d0   :  { %v886_v44 = vmul.f32 0.35355338, %v510_v42  ;;  %v4784_v46 = vpop.f32.mrb[17].mxu1  ;;  %v928_v47 = vsel %vm924_vm7, %v6438_v41, -inf }
 0x4d1   :  { %929 = vmax.xlane.f32.xlu0 %v928_v47 }
 0x4d2   :  { %v6448_v49 = vadd.f32 %v886_v44, %v6443_v43 }
 0x4d3   :  { %v515_v45 = vpop.f32.mrb[18].mxu1 }
 0x4d4   :  { %v887_v50 = vmul.f32 0.35355338, %v515_v45  ;;  %v4787_v52 = vpop.f32.mrb[19].mxu1  ;;  %v931_v53 = vsel %vm924_vm7, %v6448_v49, -inf }
 0x4d5   :  { %932 = vmax.xlane.f32.xlu1 %v931_v53 }
 0x4d6   :  { %v6458_v51 = vadd.f32 %v887_v50, %v6453_v48 }
 0x4d7   :  { %v520_v55 = vpop.f32.mrb[20].mxu1 }
 0x4d8   :  { %v888_v58 = vmul.f32 0.35355338, %v520_v55  ;;  %v4790_v59 = vpop.f32.mrb[21].mxu1  ;;  %v934_v54 = vsel %vm924_vm7, %v6458_v51, -inf }
 0x4d9   :  { %935 = vmax.xlane.f32.xlu1 %v934_v54  ;;  %v620_v57 = vpop.f32.mrb[12].mxu0 }
 0x4da   :  { %v889_v60 = vmul.f32 0.35355338, %v620_v57  ;;  %v4803_v62 = vpop.f32.mrb[13].mxu0  ;;  %v6468_v63 = vadd.f32 %v888_v58, %v6463_v56 }
 0x4dc   :  { %v938_v0 = vsel %vm937_vm8, %v6468_v63, -inf  ;;  %v6473_v3 = vadd.f32 %v889_v60, %v6425_v32 }
 0x4dd   :  { %939 = vmax.xlane.f32.xlu1 %v938_v0  ;;  %v625_v2 = vpop.f32.mrb[14].mxu0 }
 0x4de   :  { %v890_v8 = vmul.f32 0.35355338, %v625_v2  ;;  %v4806_v5 = vpop.f32.mrb[15].mxu0  ;;  %v941_v12 = vsel %vm924_vm7, %v6473_v3, -inf }
 0x4df   :  { %942 = vmax.xlane.f32.xlu0 %v941_v12 }
 0x4e0   :  { %v6478_v26 = vadd.f32 %v890_v8, %v6433_v37 }
 0x4e1   :  { %v630_v4 = vpop.f32.mrb[16].mxu0 }
 0x4e2   :  { %v891_v7 = vmul.f32 0.35355338, %v630_v4  ;;  %v4809_v27 = vpop.f32.mrb[17].mxu0  ;;  %v944_v9 = vsel %vm924_vm7, %v6478_v26, -inf }
 0x4e3   :  { %945 = vmax.xlane.f32.xlu0 %v944_v9 }
 0x4e4   :  { %v6483_v11 = vadd.f32 %v891_v7, %v6443_v43 }
 0x4e5   :  { %v635_v14 = vpop.f32.mrb[18].mxu0  ;;  %v740_v17 = vpop.f32.mrb[22].mxu1 }
 0x4e6   :  { %v892_v6 = vmul.f32 0.35355338, %v635_v14  ;;  %v894_v16 = vmul.f32 0.35355338, %v740_v17  ;;  %v4812_v28 = vpop.f32.mrb[19].mxu0  ;;  %v4828_v21 = vpop.f32.mrb[23].mxu1 }
 0x4e7   :  { %v947_v31 = vsel %vm924_vm7, %v6483_v11, -inf }
 0x4e8   :  { %948 = vmax.xlane.f32.xlu0 %v947_v31  ;;  %v6488_v19 = vadd.f32 %v894_v16, %v6425_v32  ;;  %v6491_v33 = vadd.f32 %v892_v6, %v6453_v48 }
 0x4e9   :  { %v640_v34 = vpop.f32.mrb[20].mxu0  ;;  %v745_v36 = vpop.f32.mrb[24].mxu1 }
 0x4ea   :  { %v893_v38 = vmul.f32 0.35355338, %v640_v34  ;;  %v895_v39 = vmul.f32 0.35355338, %v745_v36  ;;  %v4815_v40 = vpop.f32.mrb[21].mxu0  ;;  %v4831_v42 = vpop.f32.mrb[25].mxu1 }
 0x4eb   :  { %v956_v44 = vsel %vm924_vm7, %v6488_v19, -inf  ;;  %v950_v46 = vsel %vm924_vm7, %v6491_v33, -inf }
 0x4ec   :  { %957 = vmax.xlane.f32.xlu1 %v956_v44  ;;  %951 = vmax.xlane.f32.xlu0 %v950_v46  ;;  %v6498_v47 = vadd.f32 %v895_v39, %v6433_v37  ;;  %v6501_v45 = vadd.f32 %v893_v38, %v6463_v56 }
 0x4ed   :  { %v750_v50 = vpop.f32.mrb[26].mxu1  ;;  %v860_v52 = vpop.f32.mrb[22].mxu0 }
 0x4ee   :  { %v896_v53 = vmul.f32 0.35355338, %v750_v50  ;;  %v899_v55 = vmul.f32 0.35355338, %v860_v52  ;;  %v4834_v58 = vpop.f32.mrb[27].mxu1  ;;  %v4853_v59 = vpop.f32.mrb[23].mxu0 }
 0x4ef   :  { %v959_v54 = vsel %vm924_vm7, %v6498_v47, -inf  ;;  %v953_v57 = vsel %vm937_vm8, %v6501_v45, -inf }
 0x4f0   :  { %960 = vmax.xlane.f32.xlu1 %v959_v54  ;;  %954 = vmax.xlane.f32.xlu0 %v953_v57  ;;  %v6508_v60 = vadd.f32 %v896_v53, %v6443_v43  ;;  %v6511_v62 = vadd.f32 %v899_v55, %v6425_v32 }
 0x4f1   :  { %v755_v0 = vpop.f32.mrb[28].mxu1  ;;  %v865_v2 = vpop.f32.mrb[24].mxu0 }
 0x4f2   :  { %v897_v8 = vmul.f32 0.35355338, %v755_v0  ;;  %v4837_v5 = vpop.f32.mrb[29].mxu1  ;;  %v4856_v12 = vpop.f32.mrb[25].mxu0  ;;  %v962_v4 = vsel %vm924_vm7, %v6508_v60, -inf  ;;  %v971_v7 = vsel %vm924_vm7, %v6511_v62, -inf }
 0x4f3   :  { %v900_v31 = vmul.f32 0.35355338, %v865_v2 }
 0x4f4   :  { %963 = vmax.xlane.f32.xlu1 %v962_v4  ;;  %972 = vmax.xlane.f32.xlu0 %v971_v7  ;;  %v6518_v27 = vadd.f32 %v897_v8, %v6453_v48 }
 0x4f5   :  { %v760_v9 = vpop.f32.mrb[30].mxu1  ;;  %v870_v14 = vpop.f32.mrb[26].mxu0  ;;  %v6533_v50 = vadd.f32 %v900_v31, %v6433_v37 }
 0x4f6   :  { %v898_v32 = vmul.f32 0.35355338, %v760_v9  ;;  %v4840_v17 = vpop.f32.mrb[31].mxu1  ;;  %v4859_v6 = vpop.f32.mrb[27].mxu0  ;;  %v965_v16 = vsel %vm924_vm7, %v6518_v27, -inf }
 0x4f7   :  { %v901_v52 = vmul.f32 0.35355338, %v870_v14  ;;  %v974_v53 = vsel %vm924_vm7, %v6533_v50, -inf }
 0x4f8   :  { %966 = vmax.xlane.f32.xlu1 %v965_v16  ;;  %v6523_v28 = vadd.f32 %v898_v32, %v6463_v56 }
 0x4f9   :  { %v875_v21 = vpop.f32.mrb[32].mxu1  ;;  %v6543_v58 = vadd.f32 %v901_v52, %v6443_v43 }
 0x4fa   :  { %v902_v34 = vmul.f32 0.35355338, %v875_v21  ;;  %v4862_v36 = vpop.f32.mrb[33].mxu1  ;;  %v968_v38 = vsel %vm937_vm8, %v6523_v28, -inf }
 0x4fb   :  { %v977_v37 = vsel %vm924_vm7, %v6543_v58, -inf }
 0x4fc   :  { %969 = vmax.xlane.f32.xlu1 %v968_v38  ;;  %v6528_v39 = vadd.f32 %v902_v34, %v6453_v48 }
 0x4fd   :  { %v880_v40 = vpop.f32.mrb[34].mxu1 }
 0x4fe   :  { %v903_v42 = vmul.f32 0.35355338, %v880_v40  ;;  %v4865_v44 = vpop.f32.mrb[35].mxu1  ;;  %v980_v46 = vsel %vm924_vm7, %v6528_v39, -inf }
 0x4ff   :  { %981 = vmax.xlane.f32.xlu0 %v980_v46 }
 0x500   :  { %v6538_v55 = vadd.f32 %v903_v42, %v6463_v56  ;;  %v6553_v56 = vpop.permute.xlu1 %5501 }
 0x502   :  { %v983_v48 = vsel %vm937_vm8, %v6538_v55, -inf }
 0x503   :  { %975 = vmax.xlane.f32.xlu0 %v974_v53 }
 0x507   :  { %984 = vmax.xlane.f32.xlu0 %v983_v48 }
 0x50b   :  { %978 = vmax.xlane.f32.xlu0 %v977_v37 }
 0x50d   :  { %5511 = vrot.lane.b32.xlu1 %v6247_v15, %s5954_s4 }
 0x511   :  { %5516 = vrot.lane.b32.xlu1 %v6267_v22, %s5954_s4 }
 0x521   :  { %5506 = vrot.lane.b32.xlu0 %v6257_v18, %s5954_s4 }
 0x55a   :  { %v927_v59 = vpop.xlane.xlu1 %926 }
 0x55b   :  { %v986_v43 = vsub.f32 %v6428_v35, %v927_v59 }
 0x55d   :  { %v1006_v54 = vmul.f32 1.442695, %v986_v43 }
 0x55e   :  { %v930_v57 = vpop.xlane.xlu0 %929 }
 0x55f   :  { %5706 = vpow2.f32 %v1006_v54  ;;  %v987_v0 = vsub.f32 %v6438_v41, %v930_v57 }
 0x561   :  { %v1008_v2 = vmul.f32 1.442695, %v987_v0 }
 0x562   :  { %v933_v8 = vpop.xlane.xlu1 %932 }
 0x563   :  { %5708 = vpow2.f32 %v1008_v2  ;;  %v988_v15 = vsub.f32 %v6448_v49, %v933_v8 }
 0x565   :  { %v1010_v5 = vmul.f32 1.442695, %v988_v15 }
 0x566   :  { %v936_v22 = vpop.xlane.xlu1 %935 }
 0x567   :  { %5710 = vpow2.f32 %v1010_v5  ;;  %v989_v18 = vsub.f32 %v6458_v51, %v936_v22 }
 0x569   :  { %v6559_v12 = vpop.eup %5706  ;;  %v1012_v4 = vmul.f32 1.442695, %v989_v18 }
 0x56a   :  { %v940_v7 = vpop.xlane.xlu1 %939  ;;  %v1046_v35 = vsel %vm924_vm7, %v6559_v12, 0.0 }
 0x56b   :  { %5712 = vpow2.f32 %v1012_v4  ;;  %v990_v41 = vsub.f32 %v6468_v63, %v940_v7  ;;  %1047 = vadd.xlane.f32.xlu1 %v1046_v35 }
 0x56c   :  { %v943_v9 = vpop.xlane.xlu0 %942 }
 0x56d   :  { %v6564_v14 = vpop.eup %5708  ;;  %v1014_v49 = vmul.f32 1.442695, %v990_v41  ;;  %v991_v32 = vsub.f32 %v6473_v3, %v943_v9 }
 0x56e   :  { %v1049_v51 = vsel %vm924_vm7, %v6564_v14, 0.0 }
 0x56f   :  { %5714 = vpow2.f32 %v1014_v49  ;;  %v1016_v17 = vmul.f32 1.442695, %v991_v32  ;;  %1050 = vadd.xlane.f32.xlu1 %v1049_v51 }
 0x570   :  { %v946_v6 = vpop.xlane.xlu0 %945 }
 0x571   :  { %v6569_v16 = vpop.eup %5710  ;;  %5716 = vpow2.f32 %v1016_v17  ;;  %v992_v21 = vsub.f32 %v6478_v26, %v946_v6 }
 0x572   :  { %v1052_v63 = vsel %vm924_vm7, %v6569_v16, 0.0 }
 0x573   :  { %v1018_v31 = vmul.f32 1.442695, %v992_v21  ;;  %1053 = vadd.xlane.f32.xlu1 %v1052_v63 }
 0x575   :  { %v6574_v34 = vpop.eup %5712  ;;  %5718 = vpow2.f32 %v1018_v31  ;;  %v949_v3 = vpop.xlane.xlu0 %948 }
 0x576   :  { %v993_v36 = vsub.f32 %v6483_v11, %v949_v3  ;;  %v1055_v38 = vsel %vm924_vm7, %v6574_v34, 0.0 }
 0x577   :  { %1056 = vadd.xlane.f32.xlu1 %v1055_v38 }
 0x578   :  { %v1020_v40 = vmul.f32 1.442695, %v993_v36 }
 0x579   :  { %v6579_v42 = vpop.eup %5714  ;;  %v958_v44 = vpop.xlane.xlu1 %957 }
 0x57a   :  { %v952_v26 = vpop.xlane.xlu0 %951  ;;  %5720 = vpow2.f32 %v1020_v40  ;;  %v996_v46 = vsub.f32 %v6488_v19, %v958_v44  ;;  %v1058_v53 = vsel %vm937_vm8, %v6579_v42, 0.0 }
 0x57b   :  { %v994_v52 = vsub.f32 %v6491_v33, %v952_v26  ;;  %v6585_v48 = vpop.eup %5716  ;;  %1059 = vadd.xlane.f32.xlu1 %v1058_v53 }
 0x57c   :  { %v1026_v11 = vmul.f32 1.442695, %v996_v46  ;;  %v1061_v59 = vsel %vm924_vm7, %v6585_v48, 0.0 }
 0x57d   :  { %v1022_v37 = vmul.f32 1.442695, %v994_v52  ;;  %v961_v43 = vpop.xlane.xlu1 %960  ;;  %1062 = vadd.xlane.f32.xlu0 %v1061_v59 }
 0x57e   :  { %v955_v54 = vpop.xlane.xlu0 %954  ;;  %5722 = vpow2.f32 %v1026_v11  ;;  %v997_v57 = vsub.f32 %v6498_v47, %v961_v43 }
 0x57f   :  { %v6590_v19 = vpop.eup %5718  ;;  %5724 = vpow2.f32 %v1022_v37  ;;  %v995_v0 = vsub.f32 %v6501_v45, %v955_v54 }
 0x580   :  { %v1028_v33 = vmul.f32 1.442695, %v997_v57  ;;  %v1064_v2 = vsel %vm924_vm7, %v6590_v19, 0.0 }
 0x581   :  { %v964_v8 = vpop.xlane.xlu1 %963  ;;  %1065 = vadd.xlane.f32.xlu0 %v1064_v2  ;;  %v1024_v18 = vmul.f32 1.442695, %v995_v0 }
 0x582   :  { %v973_v15 = vpop.xlane.xlu0 %972  ;;  %5726 = vpow2.f32 %v1028_v33  ;;  %v998_v5 = vsub.f32 %v6508_v60, %v964_v8 }
 0x583   :  { %v1001_v47 = vsub.f32 %v6511_v62, %v973_v15 }
 0x584   :  { %v6596_v22 = vpop.eup %5720  ;;  %v1030_v4 = vmul.f32 1.442695, %v998_v5 }
 0x585   :  { %v967_v7 = vpop.xlane.xlu1 %966  ;;  %v1067_v35 = vsel %vm924_vm7, %v6596_v22, 0.0  ;;  %v1036_v9 = vmul.f32 1.442695, %v1001_v47 }
 0x586   :  { %5728 = vpow2.f32 %v1030_v4  ;;  %v999_v45 = vsub.f32 %v6518_v27, %v967_v7  ;;  %1068 = vadd.xlane.f32.xlu0 %v1067_v35 }
 0x587   :  { %5730 = vpow2.f32 %v1024_v18 }
 0x588   :  { %v6602_v41 = vpop.eup %5722  ;;  %v1032_v49 = vmul.f32 1.442695, %v999_v45  ;;  %v5504_v45 = vunpack.i.h.bf16 %v6553_v56 }
 0x589   :  { %v6604_v60 = vpop.eup %5724  ;;  %v1076_v32 = vsel %vm924_vm7, %v6602_v41, 0.0  ;;  %v970_v0 = vpop.xlane.xlu1 %969 }
 0x58a   :  { %5732 = vpow2.f32 %v1032_v49  ;;  %1077 = vadd.xlane.f32.xlu1 %v1076_v32  ;;  %v1070_v62 = vsel %vm924_vm7, %v6604_v60, 0.0  ;;  %v1000_v2 = vsub.f32 %v6523_v28, %v970_v0 }
 0x58b   :  { %1071 = vadd.xlane.f32.xlu0 %v1070_v62  ;;  %5734 = vpow2.f32 %v1036_v9  ;;  %v5503_v9 = vunpack.i.l.bf16 %v6553_v56 }
 0x58c   :  { %v6610_v51 = vpop.eup %5726  ;;  %v982_v27 = vpop.xlane.xlu0 %981  ;;  %v1034_v8 = vmul.f32 1.442695, %v1000_v2 }
 0x58d   :  { %v1004_v17 = vsub.f32 %v6528_v39, %v982_v27  ;;  %v1079_v6 = vsel %vm924_vm7, %v6610_v51, 0.0  ;;  %v5355_v27 = vpack.c.bf16 %v5504_v45, %v5503_v9 }
 0x58e   :  { %1080 = vadd.xlane.f32.xlu1 %v1079_v6 }
 0x58f   :  { %v1042_v21 = vmul.f32 1.442695, %v1004_v17 }
 0x590   :  { %v6615_v63 = vpop.eup %5728  ;;  %v976_v31 = vpop.xlane.xlu0 %975 }
 0x591   :  { %5736 = vpow2.f32 %v1042_v21  ;;  %v1002_v3 = vsub.f32 %v6533_v50, %v976_v31  ;;  %v1082_v36 = vsel %vm924_vm7, %v6615_v63, 0.0  ;;  %v6620_v38 = vpop.eup %5730 }
 0x592   :  { %1083 = vadd.xlane.f32.xlu1 %v1082_v36  ;;  %v1073_v26 = vsel %vm937_vm8, %v6620_v38, 0.0 }
 0x593   :  { %v1038_v40 = vmul.f32 1.442695, %v1002_v3 }
 0x594   :  { %v6622_v44 = vpop.eup %5732  ;;  %v985_v39 = vpop.xlane.xlu0 %984 }
 0x595   :  { %5738 = vpow2.f32 %v1038_v40  ;;  %v1085_v46 = vsel %vm924_vm7, %v6622_v44, 0.0  ;;  %v6628_v52 = vpop.eup %5734  ;;  %v1005_v15 = vsub.f32 %v6538_v55, %v985_v39 }
 0x596   :  { %1074 = vadd.xlane.f32.xlu1 %v1073_v26  ;;  %1086 = vadd.xlane.f32.xlu0 %v1085_v46  ;;  %v1091_v11 = vsel %vm924_vm7, %v6628_v52, 0.0 }
 0x597   :  { %v1044_v5 = vmul.f32 1.442695, %v1005_v15 }
 0x598   :  { %v979_v50 = vpop.xlane.xlu0 %978 }
 0x599   :  { %v1003_v53 = vsub.f32 %v6543_v58, %v979_v50 }
 0x59a   :  { %1092 = vadd.xlane.f32.xlu0 %v1091_v11 }
 0x59b   :  { %v6633_v37 = vpop.eup %5736  ;;  %v1040_v59 = vmul.f32 1.442695, %v1003_v53 }
 0x59c   :  { %v1100_v43 = vsel %vm924_vm7, %v6633_v37, 0.0  ;;  %v5507_v21 = vpop.permute.xlu0 %5506 }
 0x59d   :  { %5740 = vpow2.f32 %v1040_v59  ;;  %v5509_v53 = vunpack.i.h.bf16 %v5507_v21  ;;  %v5508_v11 = vunpack.i.l.bf16 %v5507_v21 }
 0x59e   :  { %1101 = vadd.xlane.f32.xlu0 %v1100_v43  ;;  %5742 = vpow2.f32 %v1034_v8 }
 0x59f   :  { %v6637_v54 = vpop.eup %5738  ;;  %5744 = vpow2.f32 %v1044_v5  ;;  %v5361_v0 = vpack.c.bf16 %v5509_v53, %v5508_v11 }
 0x5a0   :  { %v1094_v57 = vsel %vm924_vm7, %v6637_v54, 0.0 }
 0x5a1   :  { %1095 = vadd.xlane.f32.xlu1 %v1094_v57 }
 0x5a7   :  { %v6641_v33 = vpop.eup %5740 }
 0x5a8   :  { %v1097_v58 = vsel %vm924_vm7, %v6641_v33, 0.0  ;;  %v6651_v18 = vpop.eup %5742 }
 0x5a9   :  { %1098 = vadd.xlane.f32.xlu0 %v1097_v58  ;;  %v1088_v4 = vsel %vm937_vm8, %v6651_v18, 0.0  ;;  %v6655_v47 = vpop.eup %5744 }
 0x5b2   :  { %1397 = vrot.lane.b32.xlu1 %v6271_v24, %s5954_s4  ;;  %v1103_v24 = vsel %vm937_vm8, %v6655_v47, 0.0 }
 0x5bf   :  { %1518 = vrot.lane.b32.xlu0 %v6275_v25, %s5954_s4  ;;  %v5512_v25 = vpop.permute.xlu1 %5511 }
 0x5c0   :  { %v5514_v17 = vunpack.i.h.bf16 %v5512_v25  ;;  %v5513_v6 = vunpack.i.l.bf16 %v5512_v25 }
 0x5c2   :  { %v5358_v36 = vpack.c.bf16 %v5514_v17, %v5513_v6 }
 0x5c3   :  { %v6659_v28 = vpop.permute.xlu1 %5516 }
 0x5c4   :  { %v5519_v58 = vunpack.i.h.bf16 %v6659_v28 }
 0x5d6   :  { %1089 = vadd.xlane.f32.xlu1 %v1088_v4 }
 0x5de   :  { %1104 = vadd.xlane.f32.xlu0 %v1103_v24 }
 0x5f8   :  { %v1048_v7 = vpop.xlane.xlu1 %1047 }
 0x5f9   :  { %5746 = vrcp.f32 %v1048_v7 }
 0x5fc   :  { %v1051_v55 = vpop.xlane.xlu1 %1050 }
 0x5fd   :  { %5748 = vrcp.f32 %v1051_v55 }
 0x600   :  { %v1054_v35 = vpop.xlane.xlu1 %1053 }
 0x601   :  { %5750 = vrcp.f32 %v1054_v35 }
 0x603   :  { %v5747_v49 = vpop.eup %5746 }
 0x604   :  { %v1126_v32 = vmul.f32 %v5747_v49, %v6559_v12  ;;  %v1057_v62 = vpop.xlane.xlu1 %1056 }
 0x605   :  { %5752 = vrcp.f32 %v1057_v62 }
 0x606   :  { %4877 = vmatmul.mubr.msk.f32.vlgmr.msra.gmra.mrb[36].mxu1 %vm924_vm7, %v1126_v32 }
 0x607   :  { %v5749_v31 = vpop.eup %5748  ;;  %5356 = vmatpush3.bf16.msra.mxu1 %v5355_v27  ;;  %4879 = vmatprep.mubr.msk.f32.mxu1 %vm5948_vm0, %v5947_v1 }
 0x608   :  { %v1060_v3 = vpop.xlane.xlu1 %1059  ;;  %5357 = vmatprep.subr.bf16.mxu1 %v5952_v61  ;;  %v1127_v56 = vmul.f32 %v5749_v31, %v6564_v14 }
 0x609   :  { %5754 = vrcp.f32 %v1060_v3 }
 0x60a   :  { %4880 = vmatmul.mubr.msk.f32.gmra.mrb[38].mxu1 %vm924_vm7, %v1127_v56  ;;  %v1063_v12 = vpop.xlane.xlu0 %1062 }
 0x60b   :  { %v5751_v40 = vpop.eup %5750  ;;  %5359 = vmatpush3.bf16.msra.mxu1 %v5358_v36  ;;  %5756 = vrcp.f32 %v1063_v12  ;;  %4882 = vmatprep.mubr.msk.f32.mxu1 %vm5948_vm0, %v5947_v1 }
 0x60c   :  { %v1128_v39 = vmul.f32 %v5751_v40, %v6569_v16  ;;  %4924 = vmatprep.subr.mxu1 %v5947_v1 }
 0x60e   :  { %4883 = vmatmul.mubr.msk.f32.gmra.mrb[40].mxu1 %vm924_vm7, %v1128_v39  ;;  %v1066_v26 = vpop.xlane.xlu0 %1065 }
 0x60f   :  { %v5753_v46 = vpop.eup %5752  ;;  %5758 = vrcp.f32 %v1066_v26  ;;  %4885 = vmatprep.mubr.msk.f32.mxu1 %vm5948_vm0, %v5947_v1 }
 0x610   :  { %v1129_v14 = vmul.f32 %v5753_v46, %v6574_v34  ;;  %v5518_v34 = vunpack.i.l.bf16 %v6659_v28 }
 0x612   :  { %4886 = vmatmul.mubr.msk.f32.gmra.mrb[42].mxu1 %vm924_vm7, %v1129_v14 }
 0x613   :  { %v5755_v50 = vpop.eup %5754  ;;  %v1069_v59 = vpop.xlane.xlu0 %1068  ;;  %4888 = vmatprep.mubr.msk.f32.mxu1 %vm5948_vm0, %v5947_v1 }
 0x614   :  { %5760 = vrcp.f32 %v1069_v59  ;;  %v1130_v16 = vmul.f32 %v5755_v50, %v6579_v42 }
 0x615   :  { %v5757_v43 = vpop.eup %5756 }
 0x616   :  { %v1131_v57 = vmul.f32 %v5757_v43, %v6585_v48  ;;  %4889 = vmatmul.mubr.msk.f32.gmra.mrb[44].mxu1 %vm924_vm7, %v1130_v16  ;;  %v5364_v48 = vpack.c.bf16 %v5519_v58, %v5518_v34 }
 0x617   :  { %v1078_v2 = vpop.xlane.xlu1 %1077  ;;  %4926 = vmatprep.mubr.msk.f32.mxu1 %vm5948_vm0, %v5947_v1 }
 0x618   :  { %v1072_v8 = vpop.xlane.xlu0 %1071  ;;  %4902 = vmatmul.mubr.msk.f32.vlgmr.msra.gmra.mrb[28].mxu0 %vm924_vm7, %v1131_v57 }
 0x619   :  { %v5759_v15 = vpop.eup %5758  ;;  %5762 = vrcp.f32 %v1072_v8  ;;  %5362 = vmatpush3.bf16.msra.mxu0 %v5361_v0  ;;  %4904 = vmatprep.mubr.msk.f32.mxu0 %vm5948_vm0, %v5947_v1 }
 0x61a   :  { %5363 = vmatprep.subr.bf16.mxu0 %v5952_v61  ;;  %v1132_v42 = vmul.f32 %v5759_v15, %v6590_v19 }
 0x61b   :  { %v1081_v5 = vpop.xlane.xlu1 %1080 }
 0x61c   :  { %4905 = vmatmul.mubr.msk.f32.gmra.mrb[30].mxu0 %vm924_vm7, %v1132_v42 }
 0x61d   :  { %5365 = vmatpush3.bf16.msra.mxu0 %v5364_v48  ;;  %4907 = vmatprep.mubr.msk.f32.mxu0 %vm5948_vm0, %v5947_v1 }
 0x61e   :  { %v5761_v4 = vpop.eup %5760  ;;  %4949 = vmatprep.subr.mxu0 %v5947_v1 }
 0x61f   :  { %v1084_v24 = vpop.xlane.xlu1 %1083  ;;  %v1133_v25 = vmul.f32 %v5761_v4, %v6596_v22 }
 0x621   :  { %4908 = vmatmul.mubr.msk.f32.gmra.mrb[32].mxu0 %vm924_vm7, %v1133_v25 }
 0x622   :  { %4910 = vmatprep.mubr.msk.f32.mxu0 %vm5948_vm0, %v5947_v1 }
 0x623   :  { %v5763_v19 = vpop.eup %5762  ;;  %v1075_v28 = vpop.xlane.xlu1 %1074 }
 0x624   :  { %5764 = vrcp.f32 %v1075_v28  ;;  %v1087_v7 = vpop.xlane.xlu0 %1086  ;;  %v1134_v55 = vmul.f32 %v5763_v19, %v6604_v60 }
 0x625   :  { %5766 = vrcp.f32 %v1078_v2 }
 0x626   :  { %4911 = vmatmul.mubr.msk.f32.gmra.mrb[34].mxu0 %vm924_vm7, %v1134_v55  ;;  %5768 = vrcp.f32 %v1081_v5 }
 0x627   :  { %4913 = vmatprep.mubr.msk.f32.mxu0 %vm5948_vm0, %v5947_v1  ;;  %5770 = vrcp.f32 %v1084_v24  ;;  %v5668_v24 = vld [vmem:[%s7758_s8] sm:$0xff]  }
 0x628   :  { %v1093_v35 = vpop.xlane.xlu0 %1092 }
 0x629   :  { %5772 = vrcp.f32 %v1093_v35  ;;  %v5669_v35 = vld [vmem:[%s7758_s8 + $0x8] sm:$0xff]  }
 0x62a   :  { %5774 = vrcp.f32 %v1087_v7 }
 0x62c   :  { %v1102_v32 = vpop.xlane.xlu0 %1101 }
 0x62e   :  { %v5765_v22 = vpop.eup %5764  ;;  %v1096_v45 = vpop.xlane.xlu1 %1095 }
 0x62f   :  { %v5767_v9 = vpop.eup %5766  ;;  %v1135_v49 = vmul.f32 %v5765_v22, %v6620_v38  ;;  %5776 = vrcp.f32 %v1096_v45 }
 0x630   :  { %v1136_v60 = vmul.f32 %v5767_v9, %v6602_v41  ;;  %v5769_v27 = vpop.eup %5768 }
 0x631   :  { %4914 = vmatmul.mubr.msk.f32.gmra.mrb[36].mxu0 %vm924_vm7, %v1135_v49  ;;  %v5771_v38 = vpop.eup %5770  ;;  %v1137_v6 = vmul.f32 %v5769_v27, %v6610_v51 }
 0x632   :  { %v1398_v62 = vpop.permute.xlu1 %1397  ;;  %4951 = vmatprep.mubr.msk.f32.mxu0 %vm5948_vm0, %v5947_v1  ;;  %v1138_v56 = vmul.f32 %v5771_v38, %v6615_v63 }
 0x633   :  { %4925 = vmatpush3.msk.msra.mxu1 %vm1175_vm6, %v1398_v62  ;;  %v5773_v41 = vpop.eup %5772 }
 0x634   :  { %4927 = vmatmul.mubr.msk.f32.vlgmr.msra.gmra.mrb[46].mxu1 %vm924_vm7, %v1136_v60  ;;  %4966 = vmatprep.subr.bf16.mxu1 %v5947_v1  ;;  %v5775_v21 = vpop.eup %5774  ;;  %v1141_v31 = vmul.f32 %v5773_v41, %v6628_v52 }
 0x635   :  { %4929 = vmatprep.mubr.msk.f32.mxu1 %vm5948_vm0, %v5947_v1  ;;  %v1139_v51 = vmul.f32 %v5775_v21, %v6622_v44  ;;  %4967 = vmatpush3.bf16.msra.mxu1 %v5668_v24 }
 0x636   :  { %v1099_v17 = vpop.xlane.xlu0 %1098  ;;  %4968 = vmatprep.subr.bf16.mxu1 %v5947_v1 }
 0x637   :  { %5778 = vrcp.f32 %v1099_v17 }
 0x638   :  { %4930 = vmatmul.mubr.msk.f32.gmra.mrb[48].mxu1 %vm924_vm7, %v1137_v6  ;;  %5780 = vrcp.f32 %v1102_v32 }
 0x639   :  { %4932 = vmatprep.mubr.msk.f32.mxu1 %vm5948_vm0, %v5947_v1  ;;  %v5777_v36 = vpop.eup %5776  ;;  %4969 = vmatpush3.bf16.msra.mxu1 %v5669_v35 }
 0x63a   :  { %v1519_v3 = vpop.permute.xlu0 %1518  ;;  %v1142_v52 = vmul.f32 %v5777_v36, %v6637_v54  ;;  %4998 = vmatprep.subr.bf16.mxu1 %v5947_v1 }
 0x63b   :  { %4950 = vmatpush3.msk.msra.mxu0 %vm1175_vm6, %v1519_v3 }
 0x63c   :  { %4933 = vmatmul.mubr.msk.f32.gmra.mrb[50].mxu1 %vm924_vm7, %v1138_v56  ;;  %4952 = vmatmul.mubr.msk.f32.vlgmr.msra.gmra.mrb[38].mxu0 %vm924_vm7, %v1141_v31 }
 0x63d   :  { %4935 = vmatprep.mubr.msk.f32.mxu1 %vm5948_vm0, %v5947_v1  ;;  %4954 = vmatprep.mubr.msk.f32.mxu0 %vm5948_vm0, %v5947_v1 }
 0x63e   :  { %4982 = vmatprep.subr.bf16.mxu0 %v5947_v1 }
 0x640   :  { %4936 = vmatmul.mubr.msk.f32.gmra.mrb[52].mxu1 %vm924_vm7, %v1139_v51  ;;  %4955 = vmatmul.mubr.msk.f32.gmra.mrb[40].mxu0 %vm924_vm7, %v1142_v52 }
 0x641   :  { %v5779_v63 = vpop.eup %5778  ;;  %4957 = vmatprep.mubr.msk.f32.mxu0 %vm5948_vm0, %v5947_v1  ;;  %4938 = vmatprep.mubr.msk.f32.mxu1 %vm5948_vm0, %v5947_v1 }
 0x642   :  { %v1143_v12 = vmul.f32 %v5779_v63, %v6641_v33  ;;  %v5781_v40 = vpop.eup %5780 }
 0x643   :  { %v1144_v44 = vmul.f32 %v5781_v40, %v6633_v37 }
 0x644   :  { %4958 = vmatmul.mubr.msk.f32.gmra.mrb[42].mxu0 %vm924_vm7, %v1143_v12 }
 0x645   :  { %4960 = vmatprep.mubr.msk.f32.mxu0 %vm5948_vm0, %v5947_v1 }
 0x648   :  { %4961 = vmatmul.mubr.msk.f32.gmra.mrb[44].mxu0 %vm924_vm7, %v1144_v44 }
 0x649   :  { %4963 = vmatprep.mubr.msk.f32.mxu0 %vm5948_vm0, %v5947_v1 }
 0x663   :  { %v1090_v54 = vpop.xlane.xlu1 %1089 }
 0x664   :  { %5782 = vrcp.f32 %v1090_v54 }
 0x66b   :  { %v1105_v39 = vpop.xlane.xlu0 %1104 }
 0x66c   :  { %5784 = vrcp.f32 %v1105_v39 }
 0x66e   :  { %v5783_v26 = vpop.eup %5782 }
 0x66f   :  { %v1140_v33 = vmul.f32 %v5783_v26, %v6651_v18 }
 0x671   :  { %4939 = vmatmul.mubr.msk.f32.gmra.mrb[54].mxu1 %vm924_vm7, %v1140_v33 }
 0x672   :  { %4970 = vmatprep.mubr.msk.bf16.mxu1 %vm5948_vm0, %v5947_v1 }
 0x676   :  { %v5785_v46 = vpop.eup %5784 }
 0x677   :  { %v1145_v37 = vmul.f32 %v5785_v46, %v6655_v47 }
 0x679   :  { %4964 = vmatmul.mubr.msk.f32.gmra.mrb[46].mxu0 %vm924_vm7, %v1145_v37 }
 0x67a   :  { %4986 = vmatprep.mubr.msk.bf16.mxu0 %vm5948_vm0, %v5947_v1 }
 0x6d9   :  { %v6753_v14 = vpop.f32.mrb[36].mxu1 }
 0x6da   :  { %v4878_v50 = vpop.f32.mrb[37].mxu1 }
 0x6dd   :  { %v6755_v53 = vpop.f32.mrb[38].mxu1 }
 0x6de   :  { %v4881_v11 = vpop.f32.mrb[39].mxu1 }
 0x6e1   :  { %v6757_v18 = vpop.f32.mrb[40].mxu1 }
 0x6e2   :  { %v4884_v59 = vpop.f32.mrb[41].mxu1 }
 0x6e5   :  { %v6759_v16 = vpop.f32.mrb[42].mxu1 }
 0x6e6   :  { %v4887_v43 = vpop.f32.mrb[43].mxu1 }
 0x6e9   :  { %v6761_v57 = vpop.f32.mrb[44].mxu1 }
 0x6ea   :  { %v4890_v47 = vpop.f32.mrb[45].mxu1 }
 0x6eb   :  { %v1365_v58 = vpop.f32.mrb[28].mxu0 }
 0x6ec   :  { %v4903_v34 = vpop.f32.mrb[29].mxu0 }
 0x6ef   :  { %v1370_v0 = vpop.f32.mrb[30].mxu0 }
 0x6f0   :  { %v5520_v2 = vpack.i.bf16 %v1370_v0, %v1365_v58  ;;  %v4906_v8 = vpop.f32.mrb[31].mxu0 }
 0x6f2   :  { %5521 = vrot.lane.b32.xlu0 %v5520_v2, %s5955_s21 }
 0x6f4   :  { %v1375_v15 = vpop.f32.mrb[32].mxu0 }
 0x6f5   :  { %v4909_v42 = vpop.f32.mrb[33].mxu0 }
 0x6f9   :  { %v1380_v48 = vpop.f32.mrb[34].mxu0 }
 0x6fa   :  { %v5535_v5 = vpack.i.bf16 %v1380_v48, %v1375_v15  ;;  %v4912_v4 = vpop.f32.mrb[35].mxu0 }
 0x6fc   :  { %5536 = vrot.lane.b32.xlu0 %v5535_v5, %s5955_s21 }
 0x704   :  { %v1385_v25 = vpop.f32.mrb[36].mxu0 }
 0x705   :  { %v4915_v19 = vpop.f32.mrb[37].mxu0 }
 0x707   :  { %v1486_v28 = vpop.f32.mrb[46].mxu1 }
 0x708   :  { %v4928_v7 = vpop.f32.mrb[47].mxu1 }
 0x70b   :  { %v1491_v55 = vpop.f32.mrb[48].mxu1 }
 0x70c   :  { %v5525_v22 = vpack.i.bf16 %v1491_v55, %v1486_v28  ;;  %v4931_v45 = vpop.f32.mrb[49].mxu1 }
 0x70e   :  { %5526 = vrot.lane.b32.xlu1 %v5525_v22, %s7778_s25 }
 0x70f   :  { %v1496_v9 = vpop.f32.mrb[50].mxu1  ;;  %v1607_v49 = vpop.f32.mrb[38].mxu0 }
 0x710   :  { %v4934_v60 = vpop.f32.mrb[51].mxu1  ;;  %v4953_v32 = vpop.f32.mrb[39].mxu0 }
 0x713   :  { %v1501_v62 = vpop.f32.mrb[52].mxu1  ;;  %v1612_v27 = vpop.f32.mrb[40].mxu0 }
 0x714   :  { %v5540_v38 = vpack.i.bf16 %v1501_v62, %v1496_v9  ;;  %v5530_v17 = vpack.i.bf16 %v1612_v27, %v1607_v49  ;;  %v4937_v6 = vpop.f32.mrb[53].mxu1  ;;  %v4956_v41 = vpop.f32.mrb[41].mxu0  ;;  %v4356_v62 = vld [vmem:[%s7759_s9] ss:$0 sm:$0xff] }
 0x716   :  { %5531 = vrot.lane.b32.xlu1 %v5530_v17, %s7776_s29 }
 0x717   :  { %v1617_v21 = vpop.f32.mrb[42].mxu0 }
 0x718   :  { %v4959_v31 = vpop.f32.mrb[43].mxu0 }
 0x71a   :  { %5541 = vrot.lane.b32.xlu1 %v5540_v38, %s7778_s25 }
 0x71b   :  { %v1622_v3 = vpop.f32.mrb[44].mxu0 }
 0x71c   :  { %v5545_v56 = vpack.i.bf16 %v1622_v3, %v1617_v21  ;;  %v4962_v36 = vpop.f32.mrb[45].mxu0 }
 0x71e   :  { %1644 = vrot.lane.b32.xlu1 %v1385_v25, %s5955_s21  ;;  %5546 = vrot.lane.b32.xlu0 %v5545_v56, %s7776_s29 }
 0x744   :  { %v1506_v51 = vpop.f32.mrb[54].mxu1 }
 0x745   :  { %v4940_v52 = vpop.f32.mrb[55].mxu1  ;;  %1664 = vrot.lane.b32.xlu0 %v1506_v51, %s7778_s25  ;;  %s5958_s25 = smov [#allocation2]  }
 0x74c   :  { %v1627_v63 = vpop.f32.mrb[46].mxu0 }
 0x74d   :  { %1684 = vrot.lane.b32.xlu1 %v1627_v63, %s7776_s29  ;;  %v4965_v12 = vpop.f32.mrb[47].mxu0 }
 0x764   :  { %v5522_v40 = vpop.permute.xlu0 %5521 }
 0x765   :  { %v5524_v54 = vunpack.i.h.bf16 %v5522_v40  ;;  %v5523_v39 = vunpack.i.l.bf16 %v5522_v40 }
 0x767   :  { %v1692_v37 = vsel %vm413_vm4, %v6755_v53, %v5524_v54  ;;  %v1691_v50 = vsel %vm413_vm4, %v6753_v14, %v5523_v39 }
 0x76e   :  { %v5537_v43 = vpop.permute.xlu0 %5536 }
 0x76f   :  { %v5539_v15 = vunpack.i.h.bf16 %v5537_v43  ;;  %v5538_v42 = vunpack.i.l.bf16 %v5537_v43 }
 0x771   :  { %v1694_v5 = vsel %vm413_vm4, %v6759_v16, %v5539_v15  ;;  %v1693_v4 = vsel %vm413_vm4, %v6757_v18, %v5538_v42 }
 0x780   :  { %v5527_v44 = vpop.permute.xlu1 %5526 }
 0x781   :  { %v5529_v26 = vunpack.i.h.bf16 %v5527_v44  ;;  %v5528_v33 = vunpack.i.l.bf16 %v5527_v44 }
 0x783   :  { %v1697_v47 = vsel %vm1696_vm9, %v1691_v50, %v5528_v33  ;;  %v1698_v58 = vsel %vm1696_vm9, %v1692_v37, %v5529_v26 }
 0x788   :  { %v5532_v46 = vpop.permute.xlu1 %5531 }
 0x789   :  { %v5534_v11 = vunpack.i.h.bf16 %v5532_v46  ;;  %v5533_v59 = vunpack.i.l.bf16 %v5532_v46 }
 0x78b   :  { %v1704_v34 = vsel %vm1702_vm10, %v1698_v58, %v5534_v11  ;;  %v1703_v0 = vsel %vm1702_vm10, %v1697_v47, %v5533_v59 }
 0x78c   :  { %v1708_v2 = vpack.c.bf16 %v1704_v34, %v1703_v0  ;;  %v5542_v8 = vpop.permute.xlu1 %5541 }
 0x78d   :  { %v5544_v48 = vunpack.i.h.bf16 %v5542_v8  ;;  %v5543_v53 = vunpack.i.l.bf16 %v5542_v8 }
 0x78e   :  { %4971 = vmatmul.mubr.msk.bf16.vlgmr.msra.gmra.mrb[56].mxu1 %vm187_vm2, %v1708_v2 }
 0x78f   :  { %4974 = vmatprep.mubr.msk.bf16.mxu1 %vm5948_vm0, %v5947_v1  ;;  %v1700_v19 = vsel %vm1696_vm9, %v1694_v5, %v5544_v48  ;;  %v1699_v28 = vsel %vm1696_vm9, %v1693_v4, %v5543_v53 }
 0x790   :  { %v5547_v14 = vpop.permute.xlu0 %5546  ;;  %v1645_v16 = vpop.permute.xlu1 %1644 }
 0x791   :  { %v5549_v24 = vunpack.i.h.bf16 %v5547_v14  ;;  %v5548_v25 = vunpack.i.l.bf16 %v5547_v14  ;;  %v1695_v18 = vsel %vm413_vm4, %v6761_v57, %v1645_v16 }
 0x793   :  { %v1706_v7 = vsel %vm1702_vm10, %v1700_v19, %v5549_v24  ;;  %v1705_v55 = vsel %vm1702_vm10, %v1699_v28, %v5548_v25  ;;  %v5670_v25 = vld [vmem:[%s7762_s12] sm:$0xff]   ;;  %v5671_v19 = vld [vmem:[%s7762_s12 + $0x8] sm:$0xff]  }
 0x794   :  { %v1709_v35 = vpack.c.bf16 %v1706_v7, %v1705_v55  ;;  %4983 = vmatpush3.bf16.msra.mxu0 %v5670_v25 }
 0x795   :  { %4984 = vmatprep.subr.bf16.mxu0 %v5947_v1 }
 0x796   :  { %4975 = vmatmul.mubr.msk.bf16.gmra.mrb[60].mxu1 %vm187_vm2, %v1709_v35 }
 0x797   :  { %4978 = vmatprep.mubr.msk.bf16.mxu1 %vm5948_vm0, %v5947_v1 }
 0x798   :  { %4985 = vmatpush3.bf16.msra.mxu0 %v5671_v19 }
 0x799   :  { %5026 = vmatprep.subr.bf16.mxu0 %v5947_v1 }
 0x7b7   :  { %v1665_v22 = vpop.permute.xlu0 %1664 }
 0x7b8   :  { %v1701_v45 = vsel %vm1696_vm9, %v1695_v18, %v1665_v22 }
 0x7bf   :  { %v1685_v9 = vpop.permute.xlu1 %1684 }
 0x7c0   :  { %v1707_v49 = vsel %vm1702_vm10, %v1701_v45, %v1685_v9 }
 0x7c1   :  { %v1710_v60 = vpack.c.bf16 %v1707_v49, %v1707_v49 }
 0x7c3   :  { %4979 = vmatmul.mubr.msk.bf16.gmra.mrb[64].mxu1 %vm187_vm2, %v1710_v60 }
 0x7c4   :  { %5014 = vmatprep.mubr.msk.bf16.mxu1 %vm5948_vm0, %v5947_v1 }
 0x861   :  { %v1770_v32 = vpop.f32.mrb[56].mxu1 }
 0x862   :  { %v1792_v27 = vadd.f32 %v1770_v32, %v6102_v10  ;;  %v4972_v38 = vpop.f32.mrb[57].mxu1 }
 0x863   :  { %v1773_v57 = vpop.f32.mrb[58].mxu1 }
 0x864   :  { %v6813_v17 = vadd.f32 %v4356_v62, %v1792_v27  ;;  %v1793_v6 = vadd.f32 %v1773_v57, %v6104_v13  ;;  %v4973_v41 = vpop.f32.mrb[59].mxu1 }
 0x865   :  { %v4357_v41 = vld [vmem:[%s7760_s10] ss:$0 sm:$0xff] }
 0x866   :  { %v6816_v21 = vadd.f32 %v4356_v62, %v1793_v6  ;;  %v1811_v31 = vsel %vm187_vm2, %v6813_v17, 0.0 }
 0x867   :  { %1812 = vadd.xlane.f32.xlu0 %v1811_v31 }
 0x868   :  { %v1814_v3 = vsel %vm187_vm2, %v6816_v21, 0.0 }
 0x869   :  { %v1778_v56 = vpop.f32.mrb[60].mxu1  ;;  %1815 = vadd.xlane.f32.xlu1 %v1814_v3 }
 0x86a   :  { %v1794_v10 = vadd.f32 %v1778_v56, %v6116_v20  ;;  %v4976_v36 = vpop.f32.mrb[61].mxu1 }
 0x86b   :  { %v1781_v51 = vpop.f32.mrb[62].mxu1 }
 0x86c   :  { %v6823_v52 = vadd.f32 %v4356_v62, %v1794_v10  ;;  %v1795_v13 = vadd.f32 %v1781_v51, %v6118_v23  ;;  %v4977_v63 = vpop.f32.mrb[63].mxu1  ;;  %v4358_v51 = vld [vmem:[%s7761_s11] ss:$0 sm:$0xff] }
 0x86e   :  { %v6826_v12 = vadd.f32 %v4356_v62, %v1795_v13  ;;  %v1817_v40 = vsel %vm187_vm2, %v6823_v52, 0.0 }
 0x86f   :  { %1818 = vadd.xlane.f32.xlu0 %v1817_v40 }
 0x870   :  { %v1820_v44 = vsel %vm187_vm2, %v6826_v12, 0.0 }
 0x873   :  { %1821 = vadd.xlane.f32.xlu0 %v1820_v44 }
 0x896   :  { %v1786_v54 = vpop.f32.mrb[64].mxu1 }
 0x897   :  { %v1796_v20 = vadd.f32 %v1786_v54, %v6127_v29  ;;  %v4980_v39 = vpop.f32.mrb[65].mxu1 }
 0x898   :  { %v1789_v26 = vpop.f32.mrb[66].mxu1 }
 0x899   :  { %v6833_v33 = vadd.f32 %v4356_v62, %v1796_v20  ;;  %v4981_v46 = vpop.f32.mrb[67].mxu1 }
 0x89b   :  { %v1823_v23 = vsel %vm200_vm3, %v6833_v33, 0.0 }
 0x89c   :  { %1824 = vadd.xlane.f32.xlu0 %v1823_v23 }
 0x8f4   :  { %v1813_v37 = vpop.xlane.xlu0 %1812 }
 0x8f5   :  { %v1826_v50 = vmul.f32 0.03125, %v1813_v37 }
 0x8f6   :  { %v1816_v11 = vpop.xlane.xlu1 %1815 }
 0x8f7   :  { %v1831_v59 = vsub.f32 %v6813_v17, %v1826_v50  ;;  %v1827_v43 = vmul.f32 0.03125, %v1816_v11 }
 0x8f9   :  { %v1832_v47 = vsub.f32 %v6816_v21, %v1827_v43  ;;  %v1836_v58 = vmul.f32 %v1831_v59, %v1831_v59 }
 0x8fb   :  { %v1841_v29 = vsel %vm187_vm2, %v1836_v58, 0.0  ;;  %v1837_v34 = vmul.f32 %v1832_v47, %v1832_v47 }
 0x8fc   :  { %v1819_v0 = vpop.xlane.xlu0 %1818  ;;  %1842 = vadd.xlane.f32.xlu1 %v1841_v29 }
 0x8fd   :  { %v1828_v2 = vmul.f32 0.03125, %v1819_v0  ;;  %v1844_v8 = vsel %vm187_vm2, %v1837_v34, 0.0 }
 0x8fe   :  { %1845 = vadd.xlane.f32.xlu0 %v1844_v8  ;;  %v5672_v8 = vld [vmem:[%s7764_s14] sm:$0xff]  }
 0x8ff   :  { %v1833_v15 = vsub.f32 %v6823_v52, %v1828_v2  ;;  %4999 = vmatpush3.bf16.msra.mxu1 %v5672_v8 }
 0x900   :  { %v1822_v42 = vpop.xlane.xlu0 %1821  ;;  %5000 = vmatprep.subr.bf16.mxu1 %v5947_v1 }
 0x901   :  { %v1829_v48 = vmul.f32 0.03125, %v1822_v42  ;;  %v1838_v53 = vmul.f32 %v1833_v15, %v1833_v15  ;;  %v5674_v42 = vld [vmem:[%s7764_s14 + $0x10] sm:$0xff]  }
 0x903   :  { %v1834_v14 = vsub.f32 %v6826_v12, %v1829_v48  ;;  %v1847_v5 = vsel %vm187_vm2, %v1838_v53, 0.0  ;;  %v5675_v48 = vld [vmem:[%s7764_s14 + $0x18] sm:$0xff]   ;;  %v5676_v53 = vld [vmem:[%s7764_s14 + $0x20] sm:$0xff]  }
 0x904   :  { %1848 = vadd.xlane.f32.xlu1 %v1847_v5  ;;  %v5678_v5 = vld [vmem:[%s7764_s14 + $0x30] sm:$0xff]  }
 0x905   :  { %v1839_v4 = vmul.f32 %v1834_v14, %v1834_v14 }
 0x907   :  { %v1850_v24 = vsel %vm187_vm2, %v1839_v4, 0.0  ;;  %v5679_v4 = vld [vmem:[%s7764_s14 + $0x38] sm:$0xff]  }
 0x908   :  { %1851 = vadd.xlane.f32.xlu0 %v1850_v24  ;;  %v4359_v24 = vld [vmem:[%s7763_s13] ss:$0 sm:$0xff] }
 0x929   :  { %v1825_v28 = vpop.xlane.xlu0 %1824 }
 0x92a   :  { %v1830_v7 = vmul.f32 0.03125, %v1825_v28 }
 0x92c   :  { %v1835_v55 = vsub.f32 %v6833_v33, %v1830_v7 }
 0x92e   :  { %v1840_v35 = vmul.f32 %v1835_v55, %v1835_v55 }
 0x930   :  { %v1853_v16 = vsel %vm200_vm3, %v1840_v35, 0.0 }
 0x931   :  { %1854 = vadd.xlane.f32.xlu1 %v1853_v16 }
 0x989   :  { %v1843_v22 = vpop.xlane.xlu1 %1842 }
 0x98a   :  { %v1856_v18 = vmul.f32 0.03125, %v1843_v22 }
 0x98b   :  { %v1846_v45 = vpop.xlane.xlu0 %1845 }
 0x98c   :  { %v1861_v9 = vadd.f32 1e-05, %v1856_v18  ;;  %v1857_v49 = vmul.f32 0.03125, %v1846_v45 }
 0x98e   :  { %5786 = vrsqrt.f32 %v1861_v9  ;;  %v1862_v60 = vadd.f32 1e-05, %v1857_v49 }
 0x990   :  { %5788 = vrsqrt.f32 %v1862_v60 }
 0x991   :  { %v1849_v32 = vpop.xlane.xlu1 %1848 }
 0x992   :  { %v1858_v62 = vmul.f32 0.03125, %v1849_v32 }
 0x994   :  { %v1863_v27 = vadd.f32 1e-05, %v1858_v62 }
 0x995   :  { %v1852_v38 = vpop.xlane.xlu0 %1851 }
 0x996   :  { %5790 = vrsqrt.f32 %v1863_v27  ;;  %v1859_v57 = vmul.f32 0.03125, %v1852_v38 }
 0x998   :  { %v5787_v6 = vpop.eup %5786  ;;  %v1864_v31 = vadd.f32 1e-05, %v1859_v57 }
 0x999   :  { %v1871_v3 = vmul.f32 %v5787_v6, %v1831_v59 }
 0x99a   :  { %v5789_v56 = vpop.eup %5788  ;;  %5792 = vrsqrt.f32 %v1864_v31 }
 0x99b   :  { %v1882_v10 = vmul.f32 %v4357_v41, %v1871_v3  ;;  %v1872_v36 = vmul.f32 %v5789_v56, %v1832_v47 }
 0x99d   :  { %v1883_v13 = vmul.f32 %v4357_v41, %v1872_v36  ;;  %v1893_v63 = vadd.f32 %v4358_v51, %v1882_v10 }
 0x99f   :  { %v1894_v40 = vadd.f32 %v4358_v51, %v1883_v13 }
 0x9a0   :  { %v5791_v44 = vpop.eup %5790 }
 0x9a1   :  { %v1898_v54 = vpack.c.bf16 %v1894_v40, %v1893_v63  ;;  %v1873_v20 = vmul.f32 %v5791_v44, %v1833_v15  ;;  %v5673_v15 = vld [vmem:[%s7764_s14 + $0x8] sm:$0xff]  }
 0x9a2   :  { %5001 = vmatpush3.bf16.msra.mxu1 %v5673_v15 }
 0x9a3   :  { %4987 = vmatmul.mubr.msk.bf16.vlgmr.msra.gmra.mrb[48].mxu0 %vm187_vm2, %v1898_v54  ;;  %v1884_v46 = vmul.f32 %v4357_v41, %v1873_v20  ;;  %5002 = vmatprep.subr.bf16.mxu1 %v5947_v1 }
 0x9a4   :  { %v5793_v39 = vpop.eup %5792  ;;  %4990 = vmatprep.mubr.msk.bf16.mxu0 %vm5948_vm0, %v5947_v1 }
 0x9a5   :  { %v1874_v26 = vmul.f32 %v5793_v39, %v1834_v14  ;;  %v1895_v37 = vadd.f32 %v4358_v51, %v1884_v46  ;;  %v5677_v14 = vld [vmem:[%s7764_s14 + $0x28] sm:$0xff]  }
 0x9a6   :  { %5003 = vmatpush3.bf16.msra.mxu1 %v5674_v42 }
 0x9a7   :  { %v1885_v23 = vmul.f32 %v4357_v41, %v1874_v26  ;;  %5004 = vmatprep.subr.bf16.mxu1 %v5947_v1 }
 0x9a9   :  { %v1896_v50 = vadd.f32 %v4358_v51, %v1885_v23 }
 0x9aa   :  { %5005 = vmatpush3.bf16.msra.mxu1 %v5675_v48 }
 0x9ab   :  { %v1899_v11 = vpack.c.bf16 %v1896_v50, %v1895_v37  ;;  %5006 = vmatprep.subr.bf16.mxu1 %v5947_v1 }
 0x9ad   :  { %4991 = vmatmul.mubr.msk.bf16.gmra.mrb[52].mxu0 %vm187_vm2, %v1899_v11 }
 0x9ae   :  { %4994 = vmatprep.mubr.msk.bf16.mxu0 %vm5948_vm0, %v5947_v1  ;;  %5007 = vmatpush3.bf16.msra.mxu1 %v5676_v53 }
 0x9af   :  { %5008 = vmatprep.subr.bf16.mxu1 %v5947_v1 }
 0x9b2   :  { %5009 = vmatpush3.bf16.msra.mxu1 %v5677_v14 }
 0x9b3   :  { %5010 = vmatprep.subr.bf16.mxu1 %v5947_v1 }
 0x9b6   :  { %5011 = vmatpush3.bf16.msra.mxu1 %v5678_v5 }
 0x9b7   :  { %5012 = vmatprep.subr.bf16.mxu1 %v5947_v1 }
 0x9ba   :  { %5013 = vmatpush3.bf16.msra.mxu1 %v5679_v4 }
 0x9bb   :  { %5374 = vmatprep.subr.bf16.mxu1 %v5952_v61 }
 0x9be   :  { %v1855_v59 = vpop.xlane.xlu1 %1854 }
 0x9bf   :  { %v1860_v43 = vmul.f32 0.03125, %v1855_v59 }
 0x9c1   :  { %v1865_v47 = vadd.f32 1e-05, %v1860_v43 }
 0x9c3   :  { %5794 = vrsqrt.f32 %v1865_v47 }
 0x9cd   :  { %v5795_v58 = vpop.eup %5794 }
 0x9ce   :  { %v1875_v29 = vmul.f32 %v5795_v58, %v1835_v55 }
 0x9d0   :  { %v1886_v34 = vmul.f32 %v4357_v41, %v1875_v29 }
 0x9d2   :  { %v1897_v0 = vadd.f32 %v4358_v51, %v1886_v34 }
 0x9d4   :  { %v1900_v2 = vpack.c.bf16 %v1897_v0, %v1897_v0 }
 0x9d6   :  { %4995 = vmatmul.mubr.msk.bf16.gmra.mrb[56].mxu0 %vm187_vm2, %v1900_v2 }
 0x9d7   :  { %5030 = vmatprep.mubr.msk.bf16.mxu0 %vm5948_vm0, %v5947_v1 }
 0xa76   :  { %v1967_v25 = vpop.f32.mrb[48].mxu0 }
 0xa77   :  { %v1968_v19 = vadd.f32 %v4359_v24, %v1967_v25  ;;  %v4988_v28 = vpop.f32.mrb[49].mxu0 }
 0xa78   :  { %v1970_v7 = vpop.f32.mrb[50].mxu0 }
 0xa79   :  { %v1989_v55 = vmul.f32 %v1968_v19, %v1968_v19  ;;  %v1971_v35 = vadd.f32 %v4359_v24, %v1970_v7  ;;  %v4989_v16 = vpop.f32.mrb[51].mxu0 }
 0xa7b   :  { %v1994_v22 = vmul.f32 %v1989_v55, %v1968_v19  ;;  %v1990_v18 = vmul.f32 %v1971_v35, %v1971_v35 }
 0xa7d   :  { %v1999_v45 = vmul.f32 0.044715, %v1994_v22  ;;  %v1995_v9 = vmul.f32 %v1990_v18, %v1971_v35 }
 0xa7f   :  { %v2004_v49 = vadd.f32 %v1999_v45, %v1968_v19  ;;  %v2000_v60 = vmul.f32 0.044715, %v1995_v9 }
 0xa80   :  { %v1975_v32 = vpop.f32.mrb[52].mxu0 }
 0xa81   :  { %v2009_v62 = vmul.f32 0.7978846, %v2004_v49  ;;  %v2005_v27 = vadd.f32 %v2000_v60, %v1971_v35  ;;  %v1976_v38 = vadd.f32 %v4359_v24, %v1975_v32  ;;  %v4992_v57 = vpop.f32.mrb[53].mxu0 }
 0xa82   :  { %v1978_v6 = vpop.f32.mrb[54].mxu0 }
 0xa83   :  { %5796 = vtanh.f32 %v2009_v62  ;;  %v2010_v41 = vmul.f32 0.7978846, %v2005_v27  ;;  %v1991_v31 = vmul.f32 %v1976_v38, %v1976_v38  ;;  %v1979_v3 = vadd.f32 %v4359_v24, %v1978_v6  ;;  %v4993_v56 = vpop.f32.mrb[55].mxu0 }
 0xa85   :  { %5798 = vtanh.f32 %v2010_v41  ;;  %v1996_v10 = vmul.f32 %v1991_v31, %v1976_v38  ;;  %v1992_v36 = vmul.f32 %v1979_v3, %v1979_v3 }
 0xa87   :  { %v2001_v51 = vmul.f32 0.044715, %v1996_v10  ;;  %v1997_v13 = vmul.f32 %v1992_v36, %v1979_v3 }
 0xa89   :  { %v2006_v63 = vadd.f32 %v2001_v51, %v1976_v38  ;;  %v2002_v40 = vmul.f32 0.044715, %v1997_v13 }
 0xa8b   :  { %v2011_v44 = vmul.f32 0.7978846, %v2006_v63  ;;  %v2007_v54 = vadd.f32 %v2002_v40, %v1979_v3 }
 0xa8d   :  { %v5797_v20 = vpop.eup %5796  ;;  %5800 = vtanh.f32 %v2011_v44  ;;  %v2012_v39 = vmul.f32 0.7978846, %v2007_v54 }
 0xa8e   :  { %v2019_v26 = vadd.f32 1.0, %v5797_v20 }
 0xa8f   :  { %v5799_v46 = vpop.eup %5798  ;;  %5802 = vtanh.f32 %v2012_v39 }
 0xa90   :  { %v2024_v23 = vmul.f32 0.5, %v2019_v26  ;;  %v2020_v37 = vadd.f32 1.0, %v5799_v46 }
 0xa92   :  { %v2025_v50 = vmul.f32 0.5, %v2020_v37  ;;  %v2029_v11 = vmul.f32 %v2024_v23, %v1968_v19 }
 0xa94   :  { %v2030_v59 = vmul.f32 %v2025_v50, %v1971_v35 }
 0xa96   :  { %v2034_v43 = vpack.c.bf16 %v2030_v59, %v2029_v11 }
 0xa97   :  { %v5801_v47 = vpop.eup %5800 }
 0xa98   :  { %5015 = vmatmul.mubr.bf16.vlgmr.msra.gmra.mrb[68].mxu1 %v2034_v43  ;;  %v2021_v58 = vadd.f32 1.0, %v5801_v47 }
 0xa99   :  { %v5803_v29 = vpop.eup %5802  ;;  %5018 = vmatprep.mubr.msk.bf16.mxu1 %vm5948_vm0, %v5947_v1 }
 0xa9a   :  { %v2022_v34 = vadd.f32 1.0, %v5803_v29  ;;  %v2026_v0 = vmul.f32 0.5, %v2021_v58 }
 0xa9c   :  { %v2027_v2 = vmul.f32 0.5, %v2022_v34  ;;  %v2031_v8 = vmul.f32 %v2026_v0, %v1976_v38 }
 0xa9e   :  { %v2032_v15 = vmul.f32 %v2027_v2, %v1979_v3 }
 0xaa0   :  { %v2035_v42 = vpack.c.bf16 %v2032_v15, %v2031_v8 }
 0xaa2   :  { %5019 = vmatmul.mubr.bf16.gmra.mrb[72].mxu1 %v2035_v42 }
 0xaa3   :  { %5022 = vmatprep.mubr.msk.bf16.mxu1 %vm5948_vm0, %v5947_v1 }
 0xaa9   :  { %v1983_v48 = vpop.f32.mrb[56].mxu0 }
 0xaaa   :  { %v1984_v53 = vadd.f32 %v4359_v24, %v1983_v48  ;;  %v4996_v14 = vpop.f32.mrb[57].mxu0  ;;  %v4373_v24 = vld [vmem:[%s7765_s15] ss:$0 sm:$0xff] }
 0xaab   :  { %v1986_v5 = vpop.f32.mrb[58].mxu0  ;;  %v5680_v14 = vld [vmem:[%s7756_s6 + $0x10] sm:$0xff]  }
 0xaac   :  { %v1993_v4 = vmul.f32 %v1984_v53, %v1984_v53  ;;  %v4997_v25 = vpop.f32.mrb[59].mxu0  ;;  %5027 = vmatpush3.bf16.msra.mxu0 %v5680_v14  ;;  %v5681_v5 = vld [vmem:[%s7756_s6 + $0x18] sm:$0xff]  }
 0xaad   :  { %5028 = vmatprep.subr.bf16.mxu0 %v5947_v1 }
 0xaae   :  { %v1998_v19 = vmul.f32 %v1993_v4, %v1984_v53 }
 0xab0   :  { %v2003_v28 = vmul.f32 0.044715, %v1998_v19  ;;  %5029 = vmatpush3.bf16.msra.mxu0 %v5681_v5 }
 0xab1   :  { %5366 = vmatprep.subr.bf16.mxu0 %v5952_v61 }
 0xab2   :  { %v2008_v7 = vadd.f32 %v2003_v28, %v1984_v53 }
 0xab4   :  { %v2013_v55 = vmul.f32 0.7978846, %v2008_v7 }
 0xab6   :  { %5804 = vtanh.f32 %v2013_v55 }
 0xac0   :  { %v5805_v35 = vpop.eup %5804 }
 0xac1   :  { %v2023_v16 = vadd.f32 1.0, %v5805_v35 }
 0xac3   :  { %v2028_v22 = vmul.f32 0.5, %v2023_v16 }
 0xac5   :  { %v2033_v18 = vmul.f32 %v2028_v22, %v1984_v53 }
 0xac7   :  { %v2036_v45 = vpack.c.bf16 %v2033_v18, %v2033_v18 }
 0xac9   :  { %5023 = vmatmul.mubr.bf16.gmra.mrb[76].mxu1 %v2036_v45 }
 0xaca   :  { %5077 = vmatprep.mubr.msk.f32.mxu1 %vm5948_vm0, %v5947_v1 }
 0xb6b   :  { %v2135_v9 = vpop.f32.mrb[68].mxu1 }
 0xb6c   :  { %v2157_v49 = vadd.f32 %v2135_v9, %v6813_v17  ;;  %v5016_v60 = vpop.f32.mrb[69].mxu1 }
 0xb6d   :  { %v2138_v32 = vpop.f32.mrb[70].mxu1 }
 0xb6e   :  { %v6915_v62 = vadd.f32 %v4373_v24, %v2157_v49  ;;  %v2158_v27 = vadd.f32 %v2138_v32, %v6816_v21  ;;  %v5017_v38 = vpop.f32.mrb[71].mxu1 }
 0xb6f   :  { %v4376_v38 = vld [vmem:[%s7788_s22 + $0x1] ss:$0 sm:$0xff] }
 0xb70   :  { %v6918_v57 = vadd.f32 %v4373_v24, %v2158_v27  ;;  %v2178_v6 = vsel %vm187_vm2, %v6915_v62, 0.0 }
 0xb71   :  { %2179 = vadd.xlane.f32.xlu0 %v2178_v6 }
 0xb72   :  { %v2181_v41 = vsel %vm187_vm2, %v6918_v57, 0.0 }
 0xb73   :  { %2182 = vadd.xlane.f32.xlu1 %v2181_v41 }
 0xb75   :  { %v2143_v31 = vpop.f32.mrb[72].mxu1 }
 0xb76   :  { %v2159_v17 = vadd.f32 %v2143_v31, %v6823_v52  ;;  %v5020_v3 = vpop.f32.mrb[73].mxu1 }
 0xb77   :  { %v2146_v56 = vpop.f32.mrb[74].mxu1 }
 0xb78   :  { %v6925_v10 = vadd.f32 %v4373_v24, %v2159_v17  ;;  %v2160_v21 = vadd.f32 %v2146_v56, %v6826_v12  ;;  %v5021_v36 = vpop.f32.mrb[75].mxu1  ;;  %v4377_v56 = vld [vmem:[%s7755_s5 + $0x1] ss:$0 sm:$0xff] }
 0xb7a   :  { %v6928_v51 = vadd.f32 %v4373_v24, %v2160_v21  ;;  %v2184_v13 = vsel %vm187_vm2, %v6925_v10, 0.0 }
 0xb7b   :  { %2185 = vadd.xlane.f32.xlu0 %v2184_v13 }
 0xb7c   :  { %v2187_v63 = vsel %vm187_vm2, %v6928_v51, 0.0 }
 0xb7d   :  { %2188 = vadd.xlane.f32.xlu1 %v2187_v63 }
 0xb9c   :  { %v2151_v40 = vpop.f32.mrb[76].mxu1 }
 0xb9d   :  { %v2161_v52 = vadd.f32 %v2151_v40, %v6833_v33  ;;  %v5024_v44 = vpop.f32.mrb[77].mxu1 }
 0xb9e   :  { %v2154_v54 = vpop.f32.mrb[78].mxu1 }
 0xb9f   :  { %v6935_v20 = vadd.f32 %v4373_v24, %v2161_v52  ;;  %v5025_v39 = vpop.f32.mrb[79].mxu1 }
 0xba1   :  { %v2190_v12 = vsel %vm200_vm3, %v6935_v20, 0.0 }
 0xba2   :  { %2191 = vadd.xlane.f32.xlu0 %v2190_v12 }
 0xbfe   :  { %v2180_v26 = vpop.xlane.xlu0 %2179 }
 0xbff   :  { %v2193_v46 = vmul.f32 0.03125, %v2180_v26 }
 0xc00   :  { %v2183_v23 = vpop.xlane.xlu1 %2182 }
 0xc01   :  { %v2198_v37 = vsub.f32 %v6915_v62, %v2193_v46  ;;  %v2194_v50 = vmul.f32 0.03125, %v2183_v23 }
 0xc03   :  { %v2199_v11 = vsub.f32 %v6918_v57, %v2194_v50  ;;  %v2203_v59 = vmul.f32 %v2198_v37, %v2198_v37 }
 0xc05   :  { %v2208_v33 = vsel %vm187_vm2, %v2203_v59, 0.0  ;;  %v2204_v43 = vmul.f32 %v2199_v11, %v2199_v11 }
 0xc06   :  { %2209 = vadd.xlane.f32.xlu1 %v2208_v33 }
 0xc07   :  { %v2211_v47 = vsel %vm187_vm2, %v2204_v43, 0.0 }
 0xc08   :  { %v2186_v58 = vpop.xlane.xlu0 %2185  ;;  %2212 = vadd.xlane.f32.xlu0 %v2211_v47 }
 0xc09   :  { %v2195_v29 = vmul.f32 0.03125, %v2186_v58 }
 0xc0a   :  { %v2189_v34 = vpop.xlane.xlu1 %2188 }
 0xc0b   :  { %v2200_v0 = vsub.f32 %v6925_v10, %v2195_v29  ;;  %v2196_v2 = vmul.f32 0.03125, %v2189_v34  ;;  %v4383_v29 = vld [vmem:[%s7757_s7 + $0x1] ss:$0 sm:$0xff] }
 0xc0d   :  { %v2201_v8 = vsub.f32 %v6928_v51, %v2196_v2  ;;  %v2205_v15 = vmul.f32 %v2200_v0, %v2200_v0 }
 0xc0f   :  { %v2214_v42 = vsel %vm187_vm2, %v2205_v15, 0.0  ;;  %v2206_v48 = vmul.f32 %v2201_v8, %v2201_v8 }
 0xc10   :  { %2215 = vadd.xlane.f32.xlu1 %v2214_v42 }
 0xc11   :  { %v2217_v53 = vsel %vm187_vm2, %v2206_v48, 0.0 }
 0xc12   :  { %2218 = vadd.xlane.f32.xlu0 %v2217_v53 }
 0xc2f   :  { %v2192_v4 = vpop.xlane.xlu0 %2191 }
 0xc30   :  { %v2197_v25 = vmul.f32 0.03125, %v2192_v4 }
 0xc32   :  { %v2202_v19 = vsub.f32 %v6935_v20, %v2197_v25 }
 0xc34   :  { %v2207_v28 = vmul.f32 %v2202_v19, %v2202_v19 }
 0xc36   :  { %v2220_v7 = vsel %vm200_vm3, %v2207_v28, 0.0 }
 0xc37   :  { %2221 = vadd.xlane.f32.xlu1 %v2220_v7 }
 0xc93   :  { %v2210_v55 = vpop.xlane.xlu1 %2209 }
 0xc94   :  { %v2223_v35 = vmul.f32 0.03125, %v2210_v55 }
 0xc95   :  { %v2213_v16 = vpop.xlane.xlu0 %2212 }
 0xc96   :  { %v2228_v22 = vadd.f32 1e-05, %v2223_v35  ;;  %v2224_v18 = vmul.f32 0.03125, %v2213_v16 }
 0xc98   :  { %5806 = vrsqrt.f32 %v2228_v22  ;;  %v2229_v45 = vadd.f32 1e-05, %v2224_v18 }
 0xc9a   :  { %5808 = vrsqrt.f32 %v2229_v45 }
 0xc9d   :  { %v2216_v9 = vpop.xlane.xlu1 %2215 }
 0xc9e   :  { %v2225_v24 = vmul.f32 0.03125, %v2216_v9 }
 0xc9f   :  { %v2219_v49 = vpop.xlane.xlu0 %2218 }
 0xca0   :  { %v2230_v60 = vadd.f32 1e-05, %v2225_v24  ;;  %v2226_v32 = vmul.f32 0.03125, %v2219_v49 }
 0xca2   :  { %v5807_v27 = vpop.eup %5806  ;;  %5810 = vrsqrt.f32 %v2230_v60  ;;  %v2231_v6 = vadd.f32 1e-05, %v2226_v32 }
 0xca3   :  { %v2238_v41 = vmul.f32 %v5807_v27, %v2198_v37 }
 0xca4   :  { %v5809_v31 = vpop.eup %5808  ;;  %5812 = vrsqrt.f32 %v2231_v6 }
 0xca5   :  { %v2249_v17 = vmul.f32 %v4376_v38, %v2238_v41  ;;  %v2239_v3 = vmul.f32 %v5809_v31, %v2199_v11 }
 0xca7   :  { %v2250_v21 = vmul.f32 %v4376_v38, %v2239_v3  ;;  %v2260_v36 = vadd.f32 %v4377_v56, %v2249_v17 }
 0xca9   :  { %v2261_v13 = vadd.f32 %v4377_v56, %v2250_v21 }
 0xcab   :  { %v2265_v63 = vpack.c.bf16 %v2261_v13, %v2260_v36 }
 0xcac   :  { %v5811_v40 = vpop.eup %5810 }
 0xcad   :  { %5031 = vmatmul.mubr.msk.bf16.vlgmr.msra.gmra.mrb[60].mxu0 %vm187_vm2, %v2265_v63  ;;  %v2240_v52 = vmul.f32 %v5811_v40, %v2200_v0 }
 0xcae   :  { %v5813_v44 = vpop.eup %5812  ;;  %5034 = vmatprep.mubr.msk.bf16.mxu0 %vm5948_vm0, %v5947_v1 }
 0xcaf   :  { %v2241_v54 = vmul.f32 %v5813_v44, %v2201_v8  ;;  %v2251_v39 = vmul.f32 %v4376_v38, %v2240_v52 }
 0xcb1   :  { %v2252_v12 = vmul.f32 %v4376_v38, %v2241_v54  ;;  %v2262_v26 = vadd.f32 %v4377_v56, %v2251_v39 }
 0xcb3   :  { %v2263_v46 = vadd.f32 %v4377_v56, %v2252_v12 }
 0xcb5   :  { %v2266_v23 = vpack.c.bf16 %v2263_v46, %v2262_v26 }
 0xcb7   :  { %5035 = vmatmul.mubr.msk.bf16.gmra.mrb[64].mxu0 %vm187_vm2, %v2266_v23 }
 0xcb8   :  { %5038 = vmatprep.mubr.msk.bf16.mxu0 %vm5948_vm0, %v5947_v1 }
 0xcc4   :  { %v2222_v37 = vpop.xlane.xlu1 %2221 }
 0xcc5   :  { %v2227_v50 = vmul.f32 0.03125, %v2222_v37 }
 0xcc7   :  { %v2232_v11 = vadd.f32 1e-05, %v2227_v50 }
 0xcc9   :  { %5814 = vrsqrt.f32 %v2232_v11 }
 0xcd3   :  { %v5815_v59 = vpop.eup %5814 }
 0xcd4   :  { %v2242_v33 = vmul.f32 %v5815_v59, %v2202_v19 }
 0xcd6   :  { %v2253_v43 = vmul.f32 %v4376_v38, %v2242_v33 }
 0xcd8   :  { %v2264_v47 = vadd.f32 %v4377_v56, %v2253_v43 }
 0xcda   :  { %v2267_v58 = vpack.c.bf16 %v2264_v47, %v2264_v47 }
 0xcdc   :  { %5039 = vmatmul.mubr.msk.bf16.gmra.mrb[68].mxu0 %vm187_vm2, %v2267_v58 }
 0xcdd   :  { %5052 = vmatprep.mubr.msk.f32.mxu0 %vm5948_vm0, %v5947_v1 }
 0xd80   :  { %v2336_v34 = vpop.f32.mrb[60].mxu0 }
 0xd81   :  { %v6975_v0 = vadd.f32 %v4383_v29, %v2336_v34  ;;  %v5032_v2 = vpop.f32.mrb[61].mxu0 }
 0xd82   :  { %v2339_v8 = vpop.f32.mrb[62].mxu0 }
 0xd83   :  { %v6977_v15 = vadd.f32 %v4383_v29, %v2339_v8  ;;  %2363 = vrot.lane.b32.xlu0 %v6975_v0, %s5949_s3  ;;  %v5033_v42 = vpop.f32.mrb[63].mxu0 }
 0xd85   :  { %2365 = vrot.lane.b32.xlu1 %v6977_v15, %s5949_s3  ;;  %v5550_v16 = vpack.i.bf16 %v6977_v15, %v6975_v0 }
 0xd87   :  { %2375 = vrot.lane.b32.xlu0 %v6977_v15, %s5950_s26 }
 0xd8a   :  { %v2344_v48 = vpop.f32.mrb[64].mxu0 }
 0xd8b   :  { %v6985_v53 = vadd.f32 %v4383_v29, %v2344_v48  ;;  %v5036_v14 = vpop.f32.mrb[65].mxu0 }
 0xd8c   :  { %v2347_v5 = vpop.f32.mrb[66].mxu0 }
 0xd8d   :  { %2367 = vrot.lane.b32.xlu1 %v6985_v53, %s5949_s3  ;;  %v5037_v4 = vpop.f32.mrb[67].mxu0  ;;  %v6989_v25 = vadd.f32 %v4383_v29, %v2347_v5 }
 0xd8f   :  { %v5560_v22 = vpack.i.bf16 %v6989_v25, %v6985_v53 }
 0xd91   :  { %2369 = vrot.lane.b32.xlu1 %v6989_v25, %s5949_s3 }
 0xd95   :  { %2373 = vrot.lane.b32.xlu1 %v6975_v0, %s5950_s26 }
 0xd99   :  { %2383 = vrot.lane.b32.xlu1 %v6975_v0, %s5951_s27 }
 0xd9d   :  { %2377 = vrot.lane.b32.xlu1 %v6985_v53, %s5950_s26 }
 0xda1   :  { %2387 = vrot.lane.b32.xlu1 %v6985_v53, %s5951_s27 }
 0xdaf   :  { %v2352_v19 = vpop.f32.mrb[68].mxu0 }
 0xdb0   :  { %v7001_v28 = vadd.f32 %v4383_v29, %v2352_v19  ;;  %v5040_v7 = vpop.f32.mrb[69].mxu0 }
 0xdb1   :  { %v2355_v55 = vpop.f32.mrb[70].mxu0 }
 0xdb2   :  { %2381 = vrot.lane.b32.xlu1 %v7001_v28, %s5950_s26  ;;  %2371 = vrot.lane.b32.xlu0 %v7001_v28, %s5949_s3  ;;  %v5041_v35 = vpop.f32.mrb[71].mxu0 }
 0xdb6   :  { %5551 = vrot.lane.b32.xlu1 %v5550_v16, %s5953_s28  ;;  %2385 = vrot.lane.b32.xlu0 %v6977_v15, %s5951_s27 }
 0xdba   :  { %5561 = vrot.lane.b32.xlu1 %v5560_v22, %s5953_s28  ;;  %2379 = vrot.lane.b32.xlu0 %v6989_v25, %s5950_s26 }
 0xdbe   :  { %2401 = vrot.lane.b32.xlu1 %v7001_v28, %s5953_s28  ;;  %2389 = vrot.lane.b32.xlu0 %v6989_v25, %s5951_s27 }
 0xdc2   :  { %2391 = vrot.lane.b32.xlu0 %v7001_v28, %s5951_s27 }
 0xdf5   :  { %v7023_v18 = vpop.permute.xlu0 %2363 }
 0xdf7   :  { %v7025_v45 = vpop.permute.xlu1 %2365 }
 0xdf8   :  { %v5555_v9 = vpack.i.bf16 %v7025_v45, %v7023_v18 }
 0xdf9   :  { %v7037_v32 = vpop.permute.xlu0 %2375 }
 0xdfa   :  { %5556 = vrot.lane.b32.xlu0 %v5555_v9, %s5953_s28 }
 0xdff   :  { %v7030_v24 = vpop.permute.xlu1 %2367 }
 0xe03   :  { %v7032_v49 = vpop.permute.xlu1 %2369 }
 0xe04   :  { %v5565_v60 = vpack.i.bf16 %v7032_v49, %v7030_v24 }
 0xe06   :  { %5566 = vrot.lane.b32.xlu0 %v5565_v60, %s5953_s28 }
 0xe07   :  { %v7039_v27 = vpop.permute.xlu1 %2373 }
 0xe08   :  { %v5570_v38 = vpack.i.bf16 %v7037_v32, %v7039_v27 }
 0xe0a   :  { %5571 = vrot.lane.b32.xlu1 %v5570_v38, %s5953_s28 }
 0xe0b   :  { %v7044_v6 = vpop.permute.xlu1 %2383 }
 0xe0f   :  { %v7046_v41 = vpop.permute.xlu1 %2377 }
 0xe13   :  { %v7048_v31 = vpop.permute.xlu1 %2387 }
 0xe24   :  { %v7050_v17 = vpop.permute.xlu1 %2381  ;;  %v7052_v3 = vpop.permute.xlu0 %2371 }
 0xe25   :  { %2521 = vrot.lane.b32.xlu0 %v7052_v3, %s5953_s28 }
 0xe28   :  { %v5552_v56 = vpop.permute.xlu1 %5551  ;;  %v7056_v21 = vpop.permute.xlu0 %2385 }
 0xe29   :  { %v5554_v36 = vunpack.i.h.bf16 %v5552_v56  ;;  %v5553_v13 = vunpack.i.l.bf16 %v5552_v56  ;;  %v7060_v63 = vpack.i.bf16 %v7056_v21, %v7044_v6 }
 0xe2b   :  { %v5367_v40 = vpack.c.bf16 %v5554_v36, %v5553_v13  ;;  %5576 = vrot.lane.b32.xlu0 %v7060_v63, %s5953_s28 }
 0xe2c   :  { %v5562_v52 = vpop.permute.xlu1 %5561  ;;  %v7064_v44 = vpop.permute.xlu0 %2379 }
 0xe2d   :  { %v7068_v54 = vpack.i.bf16 %v7064_v44, %v7046_v41  ;;  %5369 = vmatpush3.bf16.xpose.msk.msra.mxu0 %vm6282_vm5, %v5367_v40  ;;  %v5564_v39 = vunpack.i.h.bf16 %v5562_v52  ;;  %v5563_v12 = vunpack.i.l.bf16 %v5562_v52 }
 0xe2e   :  { %5370 = vmatprep.subr.bf16.mxu0 %v5952_v61 }
 0xe2f   :  { %5581 = vrot.lane.b32.xlu1 %v7068_v54, %s5953_s28  ;;  %v5371_v23 = vpack.c.bf16 %v5564_v39, %v5563_v12 }
 0xe30   :  { %v7075_v26 = vpop.permute.xlu0 %2389  ;;  %v2402_v50 = vpop.permute.xlu1 %2401 }
 0xe31   :  { %v7079_v46 = vpack.i.bf16 %v7075_v26, %v7048_v31 }
 0xe33   :  { %2641 = vrot.lane.b32.xlu1 %v7050_v17, %s5953_s28  ;;  %5586 = vrot.lane.b32.xlu0 %v7079_v46, %s5953_s28 }
 0xe34   :  { %v7087_v37 = vpop.permute.xlu0 %2391 }
 0xe35   :  { %5373 = vmatpush3.bf16.xpose.msk.msra.mxu0 %vm6282_vm5, %v5371_v23 }
 0xe36   :  { %5050 = vmatprep.subr.mxu0 %v5947_v1 }
 0xe37   :  { %5596 = vrot.lane.b32.xlu1 %v5555_v9, %s5954_s4  ;;  %2761 = vrot.lane.b32.xlu0 %v7087_v37, %s5953_s28 }
 0xe3b   :  { %3141 = vrot.lane.b32.xlu1 %v7001_v28, %s5954_s4  ;;  %5591 = vrot.lane.b32.xlu0 %v5550_v16, %s5954_s4 }
 0xe3d   :  { %5051 = vmatpush3.xpose.msk.msra.mxu0 %vm413_vm4, %v2402_v50 }
 0xe3e   :  { %5382 = vmatprep.subr.bf16.mxu0 %v5952_v61 }
 0xe3f   :  { %5611 = vrot.lane.b32.xlu1 %v5570_v38, %s5954_s4  ;;  %5601 = vrot.lane.b32.xlu0 %v5560_v22, %s5954_s4 }
 0xe40   :  { %5053 = vmatmul.mubr.msk.f32.vlgmr.msra.gmra.mrb[72].mxu0 %vm413_vm4, %v6975_v0 }
 0xe41   :  { %5055 = vmatprep.mubr.msk.f32.mxu0 %vm5948_vm0, %v5947_v1 }
 0xe43   :  { %5606 = vrot.lane.b32.xlu0 %v5565_v60, %s5954_s4 }
 0xe44   :  { %5056 = vmatmul.mubr.msk.f32.gmra.mrb[74].mxu0 %vm413_vm4, %v6977_v15 }
 0xe45   :  { %5058 = vmatprep.mubr.msk.f32.mxu0 %vm5948_vm0, %v5947_v1 }
 0xe47   :  { %3262 = vrot.lane.b32.xlu0 %v7052_v3, %s5954_s4 }
 0xe48   :  { %5059 = vmatmul.mubr.msk.f32.gmra.mrb[76].mxu0 %vm413_vm4, %v6985_v53 }
 0xe49   :  { %5061 = vmatprep.mubr.msk.f32.mxu0 %vm5948_vm0, %v5947_v1 }
 0xe4c   :  { %5062 = vmatmul.mubr.msk.f32.gmra.mrb[78].mxu0 %vm413_vm4, %v6989_v25 }
 0xe4d   :  { %5064 = vmatprep.mubr.msk.f32.mxu0 %vm5948_vm0, %v5947_v1 }
 0xe50   :  { %5065 = vmatmul.mubr.msk.f32.gmra.mrb[80].mxu0 %vm413_vm4, %v7001_v28 }
 0xe51   :  { %5102 = vmatprep.mubr.msk.f32.mxu0 %vm5948_vm0, %v5947_v1 }
 0xe6c   :  { %v5557_v11 = vpop.permute.xlu0 %5556 }
 0xe6d   :  { %v5559_v59 = vunpack.i.h.bf16 %v5557_v11  ;;  %v5558_v33 = vunpack.i.l.bf16 %v5557_v11 }
 0xe6f   :  { %v5375_v43 = vpack.c.bf16 %v5559_v59, %v5558_v33  ;;  %v7228_v33 = vld [vmem:[%s7791_s0 + $0x8] sm:$0xff] }
 0xe71   :  { %5377 = vmatpush3.bf16.xpose.msk.msra.mxu1 %vm6282_vm5, %v5375_v43 }
 0xe72   :  { %5378 = vmatprep.subr.bf16.mxu1 %v5952_v61 }
 0xe78   :  { %v5567_v47 = vpop.permute.xlu0 %5566 }
 0xe79   :  { %v5569_v58 = vunpack.i.h.bf16 %v5567_v47  ;;  %v5568_v29 = vunpack.i.l.bf16 %v5567_v47 }
 0xe7b   :  { %v5379_v34 = vpack.c.bf16 %v5569_v58, %v5568_v29 }
 0xe7c   :  { %v5572_v0 = vpop.permute.xlu1 %5571 }
 0xe7d   :  { %v5574_v2 = vunpack.i.h.bf16 %v5572_v0  ;;  %v5573_v8 = vunpack.i.l.bf16 %v5572_v0  ;;  %5381 = vmatpush3.bf16.xpose.msk.msra.mxu1 %vm6282_vm5, %v5379_v34  ;;  %v7238_v0 = vld [vmem:[%s7791_s0 + $0x10] sm:$0xff] }
 0xe7e   :  { %5075 = vmatprep.subr.mxu1 %v5947_v1 }
 0xe7f   :  { %v5383_v15 = vpack.c.bf16 %v5574_v2, %v5573_v8 }
 0xe81   :  { %5385 = vmatpush3.bf16.xpose.msk.msra.mxu0 %vm6282_vm5, %v5383_v15 }
 0xe82   :  { %5386 = vmatprep.subr.bf16.mxu0 %v5952_v61 }
 0xe97   :  { %v2522_v42 = vpop.permute.xlu0 %2521 }
 0xe98   :  { %5076 = vmatpush3.xpose.msk.msra.mxu1 %vm413_vm4, %v2522_v42 }
 0xe99   :  { %5390 = vmatprep.subr.bf16.mxu1 %v5952_v61 }
 0xe9b   :  { %5078 = vmatmul.mubr.msk.f32.vlgmr.msra.gmra.mrb[80].mxu1 %vm413_vm4, %v7023_v18 }
 0xe9c   :  { %5080 = vmatprep.mubr.msk.f32.mxu1 %vm5948_vm0, %v5947_v1 }
 0xe9d   :  { %v5577_v48 = vpop.permute.xlu0 %5576 }
 0xe9e   :  { %v5579_v53 = vunpack.i.h.bf16 %v5577_v48  ;;  %v5578_v14 = vunpack.i.l.bf16 %v5577_v48 }
 0xe9f   :  { %5081 = vmatmul.mubr.msk.f32.gmra.mrb[82].mxu1 %vm413_vm4, %v7025_v45 }
 0xea0   :  { %v5391_v5 = vpack.c.bf16 %v5579_v53, %v5578_v14  ;;  %5083 = vmatprep.mubr.msk.f32.mxu1 %vm5948_vm0, %v5947_v1  ;;  %v7248_v53 = vld [vmem:[%s7791_s0 + $0x18] sm:$0xff] }
 0xea1   :  { %v5582_v4 = vpop.permute.xlu1 %5581 }
 0xea2   :  { %v5584_v25 = vunpack.i.h.bf16 %v5582_v4  ;;  %v5583_v19 = vunpack.i.l.bf16 %v5582_v4  ;;  %5393 = vmatpush3.bf16.xpose.msk.msra.mxu1 %vm6282_vm5, %v5391_v5 }
 0xea3   :  { %5084 = vmatmul.mubr.msk.f32.gmra.mrb[84].mxu1 %vm413_vm4, %v7030_v24  ;;  %5394 = vmatprep.subr.bf16.mxu1 %v5952_v61 }
 0xea4   :  { %v5387_v28 = vpack.c.bf16 %v5584_v25, %v5583_v19  ;;  %5086 = vmatprep.mubr.msk.f32.mxu1 %vm5948_vm0, %v5947_v1 }
 0xea5   :  { %v5587_v7 = vpop.permute.xlu0 %5586  ;;  %v2642_v16 = vpop.permute.xlu1 %2641 }
 0xea6   :  { %v5589_v55 = vunpack.i.h.bf16 %v5587_v7  ;;  %v5588_v35 = vunpack.i.l.bf16 %v5587_v7  ;;  %5389 = vmatpush3.bf16.xpose.msk.msra.mxu0 %vm6282_vm5, %v5387_v28  ;;  %v7258_v28 = vld [vmem:[%s7791_s0 + $0x20] sm:$0x3] }
 0xea7   :  { %5087 = vmatmul.mubr.msk.f32.gmra.mrb[86].mxu1 %vm413_vm4, %v7032_v49  ;;  %5100 = vmatprep.subr.mxu0 %v5947_v1 }
 0xea8   :  { %v5395_v22 = vpack.c.bf16 %v5589_v55, %v5588_v35  ;;  %5089 = vmatprep.mubr.msk.f32.mxu1 %vm5948_vm0, %v5947_v1 }
 0xea9   :  { %v2762_v18 = vpop.permute.xlu0 %2761  ;;  %v5597_v45 = vpop.permute.xlu1 %5596 }
 0xeaa   :  { %5397 = vmatpush3.bf16.xpose.msk.msra.mxu1 %vm6282_vm5, %v5395_v22  ;;  %v5599_v60 = vunpack.i.h.bf16 %v5597_v45  ;;  %v5598_v38 = vunpack.i.l.bf16 %v5597_v45 }
 0xeab   :  { %5090 = vmatmul.mubr.msk.f32.gmra.mrb[88].mxu1 %vm413_vm4, %v7052_v3  ;;  %5125 = vmatprep.subr.mxu1 %v5947_v1 }
 0xeac   :  { %5127 = vmatprep.mubr.msk.f32.mxu1 %vm5948_vm0, %v5947_v1  ;;  %v5405_v13 = vpack.c.bf16 %v5599_v60, %v5598_v38 }
 0xead   :  { %v5592_v9 = vpop.permute.xlu0 %5591 }
 0xeae   :  { %v5594_v24 = vunpack.i.h.bf16 %v5592_v9  ;;  %v5593_v49 = vunpack.i.l.bf16 %v5592_v9  ;;  %5101 = vmatpush3.xpose.msk.msra.mxu0 %vm413_vm4, %v2642_v16 }
 0xeaf   :  { %5398 = vmatprep.subr.bf16.mxu0 %v5952_v61 }
 0xeb0   :  { %v5399_v30 = vpack.c.bf16 %v5594_v24, %v5593_v49 }
 0xeb1   :  { %5103 = vmatmul.mubr.msk.f32.vlgmr.msra.gmra.mrb[82].mxu0 %vm413_vm4, %v7039_v27  ;;  %v5602_v3 = vpop.permute.xlu0 %5601 }
 0xeb2   :  { %v5604_v56 = vunpack.i.h.bf16 %v5602_v3  ;;  %v5603_v36 = vunpack.i.l.bf16 %v5602_v3  ;;  %5126 = vmatpush3.xpose.msk.msra.mxu1 %vm413_vm4, %v2762_v18  ;;  %5400 = vmatpush3.bf16.msra.mxu0 %v5399_v30 }
 0xeb3   :  { %5105 = vmatprep.mubr.msk.f32.mxu0 %vm5948_vm0, %v5947_v1  ;;  %5401 = vmatprep.subr.bf16.mxu0 %v5952_v61 }
 0xeb4   :  { %v5402_v40 = vpack.c.bf16 %v5604_v56, %v5603_v36  ;;  %5404 = vmatprep.subr.bf16.mxu1 %v5952_v61 }
 0xeb5   :  { %5106 = vmatmul.mubr.msk.f32.gmra.mrb[84].mxu0 %vm413_vm4, %v7037_v32  ;;  %v5607_v52 = vpop.permute.xlu0 %5606  ;;  %5128 = vmatmul.mubr.msk.f32.vlgmr.msra.gmra.mrb[90].mxu1 %vm413_vm4, %v7044_v6  ;;  %v3142_v32 = vpop.permute.xlu1 %3141 }
 0xeb6   :  { %v5609_v27 = vunpack.i.h.bf16 %v5607_v52  ;;  %v5608_v39 = vunpack.i.l.bf16 %v5607_v52  ;;  %5403 = vmatpush3.bf16.msra.mxu0 %v5402_v40  ;;  %5406 = vmatpush3.bf16.msra.mxu1 %v5405_v13 }
 0xeb7   :  { %5108 = vmatprep.mubr.msk.f32.mxu0 %vm5948_vm0, %v5947_v1  ;;  %5130 = vmatprep.mubr.msk.f32.mxu1 %vm5948_vm0, %v5947_v1 }
 0xeb8   :  { %v5408_v12 = vpack.c.bf16 %v5609_v27, %v5608_v39  ;;  %5150 = vmatprep.subr.mxu0 %v5947_v1  ;;  %5407 = vmatprep.subr.bf16.mxu1 %v5952_v61 }
 0xeb9   :  { %5109 = vmatmul.mubr.msk.f32.gmra.mrb[86].mxu0 %vm413_vm4, %v7046_v41  ;;  %5131 = vmatmul.mubr.msk.f32.gmra.mrb[92].mxu1 %vm413_vm4, %v7056_v21  ;;  %v3263_v6 = vpop.permute.xlu0 %3262 }
 0xeba   :  { %5151 = vmatpush3.msk.msra.mxu0 %vm1175_vm6, %v3142_v32  ;;  %5409 = vmatpush3.bf16.msra.mxu1 %v5408_v12 }
 0xebb   :  { %5111 = vmatprep.mubr.msk.f32.mxu0 %vm5948_vm0, %v5947_v1  ;;  %5133 = vmatprep.mubr.msk.f32.mxu1 %vm5948_vm0, %v5947_v1 }
 0xebc   :  { %5175 = vmatprep.subr.mxu1 %v5947_v1  ;;  %5410 = vmatprep.subr.bf16.mxu0 %v5952_v61 }
 0xebd   :  { %5112 = vmatmul.mubr.msk.f32.gmra.mrb[88].mxu0 %vm413_vm4, %v7064_v44  ;;  %5134 = vmatmul.mubr.msk.f32.gmra.mrb[94].mxu1 %vm413_vm4, %v7048_v31  ;;  %v7218_v44 = vld [vmem:[%s7791_s0] sm:$0xff] }
 0xebe   :  { %5176 = vmatpush3.msk.msra.mxu1 %vm1175_vm6, %v3263_v6  ;;  %5114 = vmatprep.mubr.msk.f32.mxu0 %vm5948_vm0, %v5947_v1 }
 0xebf   :  { %5136 = vmatprep.mubr.msk.f32.mxu1 %vm5948_vm0, %v5947_v1  ;;  %5416 = vmatprep.subr.bf16.mxu1 %v5952_v61 }
 0xec1   :  { %5115 = vmatmul.mubr.msk.f32.gmra.mrb[90].mxu0 %vm413_vm4, %v7050_v17  ;;  %5137 = vmatmul.mubr.msk.f32.gmra.mrb[96].mxu1 %vm413_vm4, %v7075_v26 }
 0xec2   :  { %5139 = vmatprep.mubr.msk.f32.mxu1 %vm5948_vm0, %v5947_v1  ;;  %5152 = vmatprep.mubr.msk.f32.mxu0 %vm5948_vm0, %v5947_v1 }
 0xec5   :  { %5140 = vmatmul.mubr.msk.f32.gmra.mrb[98].mxu1 %vm413_vm4, %v7087_v37 }
 0xec6   :  { %5177 = vmatprep.mubr.msk.f32.mxu1 %vm5948_vm0, %v5947_v1 }
 0xf13   :  { %v2489_v41 = vpop.f32.mrb[72].mxu0 }
 0xf14   :  { %v2873_v31 = vmul.f32 0.35355338, %v2489_v41  ;;  %v5054_v21 = vpop.f32.mrb[73].mxu0 }
 0xf16   :  { %v7221_v26 = vadd.f32 %v7218_v44, %v2873_v31 }
 0xf17   :  { %v2494_v23 = vpop.f32.mrb[74].mxu0 }
 0xf18   :  { %v2874_v50 = vmul.f32 0.35355338, %v2494_v23  ;;  %v5057_v11 = vpop.f32.mrb[75].mxu0  ;;  %v2913_v59 = vsel %vm924_vm7, %v7221_v26, -inf }
 0xf19   :  { %2914 = vmax.xlane.f32.xlu1 %v2913_v59 }
 0xf1a   :  { %v7231_v43 = vadd.f32 %v7228_v33, %v2874_v50 }
 0xf1b   :  { %v2499_v47 = vpop.f32.mrb[76].mxu0 }
 0xf1c   :  { %v2875_v58 = vmul.f32 0.35355338, %v2499_v47  ;;  %v5060_v29 = vpop.f32.mrb[77].mxu0  ;;  %v2916_v34 = vsel %vm924_vm7, %v7231_v43, -inf }
 0xf1d   :  { %2917 = vmax.xlane.f32.xlu0 %v2916_v34 }
 0xf1e   :  { %v7241_v2 = vadd.f32 %v7238_v0, %v2875_v58 }
 0xf1f   :  { %v2504_v8 = vpop.f32.mrb[78].mxu0 }
 0xf20   :  { %v2876_v15 = vmul.f32 0.35355338, %v2504_v8  ;;  %v5063_v42 = vpop.f32.mrb[79].mxu0  ;;  %v2919_v48 = vsel %vm924_vm7, %v7241_v2, -inf }
 0xf21   :  { %2920 = vmax.xlane.f32.xlu1 %v2919_v48 }
 0xf22   :  { %v7251_v14 = vadd.f32 %v7248_v53, %v2876_v15 }
 0xf23   :  { %v2509_v5 = vpop.f32.mrb[80].mxu0 }
 0xf24   :  { %v2877_v4 = vmul.f32 0.35355338, %v2509_v5  ;;  %v5066_v25 = vpop.f32.mrb[81].mxu0  ;;  %v2922_v19 = vsel %vm924_vm7, %v7251_v14, -inf }
 0xf25   :  { %2923 = vmax.xlane.f32.xlu1 %v2922_v19 }
 0xf26   :  { %v7261_v7 = vadd.f32 %v7258_v28, %v2877_v4 }
 0xf28   :  { %v2925_v55 = vsel %vm937_vm8, %v7261_v7, -inf }
 0xf29   :  { %2926 = vmax.xlane.f32.xlu1 %v2925_v55 }
 0xf6e   :  { %v2609_v35 = vpop.f32.mrb[80].mxu1 }
 0xf6f   :  { %v2878_v16 = vmul.f32 0.35355338, %v2609_v35  ;;  %v5079_v22 = vpop.f32.mrb[81].mxu1 }
 0xf71   :  { %v7266_v18 = vadd.f32 %v7218_v44, %v2878_v16 }
 0xf72   :  { %v2614_v45 = vpop.f32.mrb[82].mxu1 }
 0xf73   :  { %v2879_v9 = vmul.f32 0.35355338, %v2614_v45  ;;  %v5082_v24 = vpop.f32.mrb[83].mxu1  ;;  %v2928_v49 = vsel %vm924_vm7, %v7266_v18, -inf }
 0xf74   :  { %2929 = vmax.xlane.f32.xlu0 %v2928_v49 }
 0xf75   :  { %v7271_v60 = vadd.f32 %v7228_v33, %v2879_v9 }
 0xf76   :  { %v2619_v38 = vpop.f32.mrb[84].mxu1 }
 0xf77   :  { %v2880_v30 = vmul.f32 0.35355338, %v2619_v38  ;;  %v5085_v3 = vpop.f32.mrb[85].mxu1  ;;  %v2931_v56 = vsel %vm924_vm7, %v7271_v60, -inf }
 0xf78   :  { %2932 = vmax.xlane.f32.xlu0 %v2931_v56 }
 0xf79   :  { %v7276_v36 = vadd.f32 %v7238_v0, %v2880_v30 }
 0xf7a   :  { %v2624_v13 = vpop.f32.mrb[86].mxu1 }
 0xf7b   :  { %v2881_v40 = vmul.f32 0.35355338, %v2624_v13  ;;  %v5088_v52 = vpop.f32.mrb[87].mxu1  ;;  %v2934_v27 = vsel %vm924_vm7, %v7276_v36, -inf }
 0xf7c   :  { %2935 = vmax.xlane.f32.xlu0 %v2934_v27 }
 0xf7d   :  { %v7281_v39 = vadd.f32 %v7248_v53, %v2881_v40 }
 0xf7e   :  { %v2629_v12 = vpop.f32.mrb[88].mxu1 }
 0xf7f   :  { %v2882_v32 = vmul.f32 0.35355338, %v2629_v12  ;;  %v5091_v6 = vpop.f32.mrb[89].mxu1  ;;  %v2937_v41 = vsel %vm924_vm7, %v7281_v39, -inf }
 0xf80   :  { %2938 = vmax.xlane.f32.xlu0 %v2937_v41 }
 0xf81   :  { %v7286_v31 = vadd.f32 %v7258_v28, %v2882_v32 }
 0xf83   :  { %v2940_v21 = vsel %vm937_vm8, %v7286_v31, -inf }
 0xf84   :  { %2941 = vmax.xlane.f32.xlu0 %v2940_v21  ;;  %v2729_v23 = vpop.f32.mrb[82].mxu0 }
 0xf85   :  { %v2883_v50 = vmul.f32 0.35355338, %v2729_v23  ;;  %v5104_v11 = vpop.f32.mrb[83].mxu0 }
 0xf87   :  { %v7291_v59 = vadd.f32 %v7218_v44, %v2883_v50 }
 0xf88   :  { %v2734_v47 = vpop.f32.mrb[84].mxu0  ;;  %v2849_v58 = vpop.f32.mrb[90].mxu1 }
 0xf89   :  { %v2884_v29 = vmul.f32 0.35355338, %v2734_v47  ;;  %v2888_v34 = vmul.f32 0.35355338, %v2849_v58  ;;  %v5107_v8 = vpop.f32.mrb[85].mxu0  ;;  %v5129_v15 = vpop.f32.mrb[91].mxu1 }
 0xf8a   :  { %v2943_v42 = vsel %vm924_vm7, %v7291_v59, -inf }
 0xf8b   :  { %v7296_v48 = vadd.f32 %v7228_v33, %v2884_v29  ;;  %v7299_v5 = vadd.f32 %v7218_v44, %v2888_v34  ;;  %2944 = vmax.xlane.f32.xlu1 %v2943_v42 }
 0xf8c   :  { %v2739_v4 = vpop.f32.mrb[86].mxu0  ;;  %v2854_v25 = vpop.f32.mrb[92].mxu1 }
 0xf8d   :  { %v2885_v19 = vmul.f32 0.35355338, %v2739_v4  ;;  %v2889_v55 = vmul.f32 0.35355338, %v2854_v25  ;;  %v5110_v35 = vpop.f32.mrb[87].mxu0  ;;  %v5132_v16 = vpop.f32.mrb[93].mxu1 }
 0xf8e   :  { %v2958_v22 = vsel %vm924_vm7, %v7299_v5, -inf  ;;  %v2946_v45 = vsel %vm924_vm7, %v7296_v48, -inf }
 0xf8f   :  { %v7306_v9 = vadd.f32 %v7238_v0, %v2885_v19  ;;  %v7309_v24 = vadd.f32 %v7228_v33, %v2889_v55  ;;  %2959 = vmax.xlane.f32.xlu0 %v2958_v22  ;;  %2947 = vmax.xlane.f32.xlu1 %v2946_v45 }
 0xf90   :  { %v2744_v44 = vpop.f32.mrb[88].mxu0  ;;  %v2859_v49 = vpop.f32.mrb[94].mxu1 }
 0xf91   :  { %v2886_v38 = vmul.f32 0.35355338, %v2744_v44  ;;  %v2890_v30 = vmul.f32 0.35355338, %v2859_v49  ;;  %v5113_v3 = vpop.f32.mrb[89].mxu0  ;;  %v5135_v56 = vpop.f32.mrb[95].mxu1 }
 0xf92   :  { %v2961_v13 = vsel %vm924_vm7, %v7309_v24, -inf  ;;  %v2949_v40 = vsel %vm924_vm7, %v7306_v9, -inf }
 0xf93   :  { %v7316_v52 = vadd.f32 %v7248_v53, %v2886_v38  ;;  %v7319_v33 = vadd.f32 %v7238_v0, %v2890_v30  ;;  %2962 = vmax.xlane.f32.xlu0 %v2961_v13  ;;  %2950 = vmax.xlane.f32.xlu1 %v2949_v40 }
 0xf94   :  { %v7321_v27 = vpop.f32.mrb[90].mxu0  ;;  %v2864_v12 = vpop.f32.mrb[96].mxu1 }
 0xf95   :  { %v2891_v32 = vmul.f32 0.35355338, %v2864_v12  ;;  %v5116_v6 = vpop.f32.mrb[91].mxu0  ;;  %v5138_v41 = vpop.f32.mrb[97].mxu1  ;;  %v2964_v21 = vsel %vm924_vm7, %v7319_v33, -inf  ;;  %v2952_v23 = vsel %vm924_vm7, %v7316_v52, -inf }
 0xf97   :  { %v7328_v50 = vadd.f32 %v7248_v53, %v2891_v32  ;;  %2965 = vmax.xlane.f32.xlu0 %v2964_v21  ;;  %2953 = vmax.xlane.f32.xlu1 %v2952_v23  ;;  %v7340_v53 = vpop.permute.xlu1 %5611 }
 0xf98   :  { %v7330_v0 = vpop.f32.mrb[98].mxu1 }
 0xf99   :  { %v5141_v11 = vpop.f32.mrb[99].mxu1  ;;  %v2967_v47 = vsel %vm924_vm7, %v7328_v50, -inf }
 0xf9b   :  { %2968 = vmax.xlane.f32.xlu0 %v2967_v47 }
 0xfa6   :  { %v2915_v58 = vpop.xlane.xlu1 %2914 }
 0xfa7   :  { %v2973_v29 = vsub.f32 %v7221_v26, %v2915_v58 }
 0xfa8   :  { %5621 = vrot.lane.b32.xlu1 %v7068_v54, %s5954_s4 }
 0xfa9   :  { %v2993_v15 = vmul.f32 1.442695, %v2973_v29 }
 0xfaa   :  { %v2918_v34 = vpop.xlane.xlu0 %2917 }
 0xfab   :  { %v2974_v42 = vsub.f32 %v7231_v43, %v2918_v34  ;;  %5816 = vpow2.f32 %v2993_v15 }
 0xfac   :  { %5626 = vrot.lane.b32.xlu1 %v7079_v46, %s5954_s4 }
 0xfad   :  { %v2995_v25 = vmul.f32 1.442695, %v2974_v42 }
 0xfae   :  { %v2921_v8 = vpop.xlane.xlu1 %2920 }
 0xfaf   :  { %v2975_v54 = vsub.f32 %v7241_v2, %v2921_v8  ;;  %5818 = vpow2.f32 %v2995_v25 }
 0xfb1   :  { %5616 = vrot.lane.b32.xlu0 %v7060_v63, %s5954_s4  ;;  %v2997_v46 = vmul.f32 1.442695, %v2975_v54 }
 0xfb2   :  { %v2924_v4 = vpop.xlane.xlu1 %2923 }
 0xfb3   :  { %v2976_v19 = vsub.f32 %v7251_v14, %v2924_v4  ;;  %5820 = vpow2.f32 %v2997_v46 }
 0xfb5   :  { %v2999_v55 = vmul.f32 1.442695, %v2976_v19  ;;  %v7347_v26 = vpop.eup %5816 }
 0xfb6   :  { %v2927_v63 = vpop.xlane.xlu1 %2926  ;;  %v3033_v43 = vsel %vm924_vm7, %v7347_v26, 0.0 }
 0xfb7   :  { %v2977_v35 = vsub.f32 %v7261_v7, %v2927_v63  ;;  %5822 = vpow2.f32 %v2999_v55 }
 0xfb9   :  { %v3001_v16 = vmul.f32 1.442695, %v2977_v35  ;;  %v7351_v22 = vpop.eup %5818 }
 0xfba   :  { %v3036_v2 = vsel %vm924_vm7, %v7351_v22, 0.0 }
 0xfbb   :  { %5824 = vpow2.f32 %v3001_v16 }
 0xfbd   :  { %v7355_v14 = vpop.eup %5820 }
 0xfbe   :  { %v3039_v7 = vsel %vm924_vm7, %v7355_v14, 0.0 }
 0xfc1   :  { %v7359_v45 = vpop.eup %5822 }
 0xfc2   :  { %v3042_v44 = vsel %vm924_vm7, %v7359_v45, 0.0 }
 0xfc5   :  { %v7363_v49 = vpop.eup %5824 }
 0xfc6   :  { %v3045_v38 = vsel %vm937_vm8, %v7363_v49, 0.0 }
 0xfd0   :  { %3034 = vadd.xlane.f32.xlu1 %v3033_v43 }
 0xfd4   :  { %3037 = vadd.xlane.f32.xlu1 %v3036_v2 }
 0xfd8   :  { %3040 = vadd.xlane.f32.xlu1 %v3039_v7 }
 0xfdc   :  { %3043 = vadd.xlane.f32.xlu1 %v3042_v44 }
 0xfe0   :  { %3046 = vadd.xlane.f32.xlu1 %v3045_v38 }
0x1001   :  { %v2930_v30 = vpop.xlane.xlu0 %2929 }
0x1002   :  { %v2978_v3 = vsub.f32 %v7266_v18, %v2930_v30 }
0x1004   :  { %v3003_v56 = vmul.f32 1.442695, %v2978_v3 }
0x1005   :  { %v2933_v13 = vpop.xlane.xlu0 %2932 }
0x1006   :  { %5826 = vpow2.f32 %v3003_v56  ;;  %v2979_v40 = vsub.f32 %v7271_v60, %v2933_v13 }
0x1008   :  { %v3005_v12 = vmul.f32 1.442695, %v2979_v40 }
0x1009   :  { %v2936_v32 = vpop.xlane.xlu0 %2935 }
0x100a   :  { %5828 = vpow2.f32 %v3005_v12  ;;  %v2980_v6 = vsub.f32 %v7276_v36, %v2936_v32 }
0x100c   :  { %v3007_v41 = vmul.f32 1.442695, %v2980_v6 }
0x100d   :  { %v2939_v21 = vpop.xlane.xlu0 %2938 }
0x100e   :  { %5830 = vpow2.f32 %v3007_v41  ;;  %v2981_v23 = vsub.f32 %v7281_v39, %v2939_v21 }
0x1010   :  { %v7371_v11 = vpop.eup %5826  ;;  %v3009_v47 = vmul.f32 1.442695, %v2981_v23 }
0x1011   :  { %v3048_v18 = vsel %vm924_vm7, %v7371_v11, 0.0  ;;  %v2942_v29 = vpop.xlane.xlu0 %2941 }
0x1012   :  { %5832 = vpow2.f32 %v3009_v47  ;;  %3049 = vadd.xlane.f32.xlu0 %v3048_v18 }
0x1014   :  { %v7375_v58 = vpop.eup %5828 }
0x1015   :  { %v3051_v60 = vsel %vm924_vm7, %v7375_v58, 0.0 }
0x1016   :  { %3052 = vadd.xlane.f32.xlu0 %v3051_v60 }
0x1018   :  { %v7379_v36 = vpop.eup %5830  ;;  %v2945_v34 = vpop.xlane.xlu1 %2944 }
0x1019   :  { %v2983_v39 = vsub.f32 %v7291_v59, %v2945_v34  ;;  %v3054_v8 = vsel %vm924_vm7, %v7379_v36, 0.0  ;;  %v2982_v59 = vsub.f32 %v7286_v31, %v2942_v29 }
0x101a   :  { %3055 = vadd.xlane.f32.xlu0 %v3054_v8 }
0x101b   :  { %v3013_v15 = vmul.f32 1.442695, %v2983_v39  ;;  %v3011_v44 = vmul.f32 1.442695, %v2982_v59  ;;  %v2887_v59 = vmul.f32 0.35355338, %v7321_v27 }
0x101c   :  { %v7384_v42 = vpop.eup %5832  ;;  %v2960_v4 = vpop.xlane.xlu0 %2959 }
0x101d   :  { %v2948_v25 = vpop.xlane.xlu1 %2947  ;;  %5834 = vpow2.f32 %v3013_v15  ;;  %v3057_v46 = vsel %vm924_vm7, %v7384_v42, 0.0  ;;  %v2988_v43 = vsub.f32 %v7299_v5, %v2960_v4 }
0x101e   :  { %v2984_v54 = vsub.f32 %v7296_v48, %v2948_v25  ;;  %3058 = vadd.xlane.f32.xlu0 %v3057_v46 }
0x101f   :  { %v3023_v56 = vmul.f32 1.442695, %v2988_v43 }
0x1020   :  { %v3015_v19 = vmul.f32 1.442695, %v2984_v54  ;;  %v2963_v63 = vpop.xlane.xlu0 %2962 }
0x1021   :  { %v2951_v55 = vpop.xlane.xlu1 %2950  ;;  %v2989_v48 = vsub.f32 %v7309_v24, %v2963_v63  ;;  %v5614_v63 = vunpack.i.h.bf16 %v7340_v53 }
0x1022   :  { %v2985_v35 = vsub.f32 %v7306_v9, %v2951_v55  ;;  %5836 = vpow2.f32 %v3015_v19  ;;  %v5613_v55 = vunpack.i.l.bf16 %v7340_v53 }
0x1023   :  { %v3025_v13 = vmul.f32 1.442695, %v2989_v48 }
0x1024   :  { %v3017_v16 = vmul.f32 1.442695, %v2985_v35  ;;  %v2966_v2 = vpop.xlane.xlu0 %2965  ;;  %v5411_v43 = vpack.c.bf16 %v5614_v63, %v5613_v55 }
0x1025   :  { %v2954_v7 = vpop.xlane.xlu1 %2953  ;;  %v2990_v31 = vsub.f32 %v7319_v33, %v2966_v2 }
0x1026   :  { %v2986_v38 = vsub.f32 %v7316_v52, %v2954_v7  ;;  %5838 = vpow2.f32 %v3017_v16  ;;  %v7443_v7 = vadd.f32 %v7258_v28, %v2887_v59 }
0x1027   :  { %v7394_v30 = vpop.eup %5834  ;;  %5840 = vpow2.f32 %v3011_v44  ;;  %v3027_v24 = vmul.f32 1.442695, %v2990_v31 }
0x1028   :  { %v3019_v3 = vmul.f32 1.442695, %v2986_v38  ;;  %v3063_v9 = vsel %vm924_vm7, %v7394_v30, 0.0  ;;  %v2969_v5 = vpop.xlane.xlu0 %2968  ;;  %v2955_v48 = vsel %vm937_vm8, %v7443_v7, -inf }
0x1029   :  { %3064 = vadd.xlane.f32.xlu1 %v3063_v9  ;;  %v2991_v52 = vsub.f32 %v7328_v50, %v2969_v5  ;;  %v5622_v4 = vpop.permute.xlu1 %5621 }
0x102a   :  { %5842 = vpow2.f32 %v3019_v3  ;;  %v5623_v2 = vunpack.i.l.bf16 %v5622_v4 }
0x102b   :  { %5844 = vpow2.f32 %v3023_v56  ;;  %v3029_v32 = vmul.f32 1.442695, %v2991_v52 }
0x102c   :  { %v7399_v40 = vpop.eup %5836  ;;  %5846 = vpow2.f32 %v3025_v13 }
0x102d   :  { %v3066_v12 = vsel %vm924_vm7, %v7399_v40, 0.0  ;;  %5848 = vpow2.f32 %v3027_v24  ;;  %v7436_v25 = vpop.permute.xlu1 %5626 }
0x102e   :  { %3067 = vadd.xlane.f32.xlu1 %v3066_v12  ;;  %5850 = vpow2.f32 %v3029_v32 }
0x1030   :  { %v7404_v33 = vpop.eup %5838 }
0x1031   :  { %v3069_v6 = vsel %vm924_vm7, %v7404_v33, 0.0  ;;  %v7408_v41 = vpop.eup %5840 }
0x1032   :  { %3070 = vadd.xlane.f32.xlu1 %v3069_v6  ;;  %v3060_v47 = vsel %vm937_vm8, %v7408_v41, 0.0 }
0x1034   :  { %v7410_v21 = vpop.eup %5842 }
0x1035   :  { %v3072_v50 = vsel %vm924_vm7, %v7410_v21, 0.0  ;;  %v7414_v23 = vpop.eup %5844 }
0x1036   :  { %3073 = vadd.xlane.f32.xlu0 %v3072_v50  ;;  %v7418_v18 = vpop.eup %5846  ;;  %3061 = vadd.xlane.f32.xlu1 %v3060_v47  ;;  %v3078_v60 = vsel %vm924_vm7, %v7414_v23, 0.0  ;;  %v5628_v47 = vunpack.i.l.bf16 %v7436_v25 }
0x1037   :  { %v7422_v29 = vpop.eup %5848  ;;  %v3081_v34 = vsel %vm924_vm7, %v7418_v18, 0.0 }
0x1038   :  { %v3084_v39 = vsel %vm924_vm7, %v7422_v29, 0.0  ;;  %v7428_v8 = vpop.eup %5850 }
0x1039   :  { %v3087_v15 = vsel %vm924_vm7, %v7428_v8, 0.0 }
0x103a   :  { %3079 = vadd.xlane.f32.xlu0 %v3078_v60  ;;  %3082 = vadd.xlane.f32.xlu1 %v3081_v34 }
0x103e   :  { %3085 = vadd.xlane.f32.xlu0 %v3084_v39 }
0x1042   :  { %3088 = vadd.xlane.f32.xlu0 %v3087_v15 }
0x104b   :  { %3383 = vrot.lane.b32.xlu1 %v7050_v17, %s5954_s4 }
0x1058   :  { %3504 = vrot.lane.b32.xlu0 %v7087_v37, %s5954_s4  ;;  %v5624_v37 = vunpack.i.h.bf16 %v5622_v4 }
0x105d   :  { %v3035_v54 = vpop.xlane.xlu1 %3034 }
0x105e   :  { %5852 = vrcp.f32 %v3035_v54 }
0x1061   :  { %v3038_v46 = vpop.xlane.xlu1 %3037 }
0x1062   :  { %5854 = vrcp.f32 %v3038_v46 }
0x1065   :  { %v3041_v19 = vpop.xlane.xlu1 %3040 }
0x1066   :  { %5856 = vrcp.f32 %v3041_v19 }
0x1068   :  { %v5853_v35 = vpop.eup %5852 }
0x1069   :  { %v3113_v17 = vmul.f32 %v5853_v35, %v7347_v26  ;;  %v3044_v16 = vpop.xlane.xlu1 %3043  ;;  %v5414_v26 = vpack.c.bf16 %v5624_v37, %v5623_v2 }
0x106a   :  { %5858 = vrcp.f32 %v3044_v16 }
0x106b   :  { %5153 = vmatmul.mubr.msk.f32.vlgmr.msra.gmra.mrb[92].mxu0 %vm924_vm7, %v3113_v17 }
0x106c   :  { %v5855_v44 = vpop.eup %5854  ;;  %5412 = vmatpush3.bf16.msra.mxu0 %v5411_v43  ;;  %5155 = vmatprep.mubr.msk.f32.mxu0 %vm5948_vm0, %v5947_v1 }
0x106d   :  { %v3047_v53 = vpop.xlane.xlu1 %3046  ;;  %5413 = vmatprep.subr.bf16.mxu0 %v5952_v61  ;;  %v3114_v27 = vmul.f32 %v5855_v44, %v7351_v22 }
0x106e   :  { %5860 = vrcp.f32 %v3047_v53 }
0x106f   :  { %5156 = vmatmul.mubr.msk.f32.gmra.mrb[94].mxu0 %vm924_vm7, %v3114_v27  ;;  %2956 = vmax.xlane.f32.xlu1 %v2955_v48 }
0x1070   :  { %v5857_v38 = vpop.eup %5856  ;;  %5415 = vmatpush3.bf16.msra.mxu0 %v5414_v26  ;;  %5158 = vmatprep.mubr.msk.f32.mxu0 %vm5948_vm0, %v5947_v1 }
0x1071   :  { %v3115_v3 = vmul.f32 %v5857_v38, %v7355_v14  ;;  %5200 = vmatprep.subr.mxu0 %v5947_v1  ;;  %v5617_v14 = vpop.permute.xlu0 %5616 }
0x1072   :  { %v5618_v52 = vunpack.i.l.bf16 %v5617_v14 }
0x1073   :  { %5159 = vmatmul.mubr.msk.f32.gmra.mrb[96].mxu0 %vm924_vm7, %v3115_v3 }
0x1074   :  { %v5859_v22 = vpop.eup %5858  ;;  %5161 = vmatprep.mubr.msk.f32.mxu0 %vm5948_vm0, %v5947_v1 }
0x1075   :  { %v3116_v56 = vmul.f32 %v5859_v22, %v7359_v45  ;;  %v5619_v45 = vunpack.i.h.bf16 %v5617_v14 }
0x1077   :  { %5162 = vmatmul.mubr.msk.f32.gmra.mrb[98].mxu0 %vm924_vm7, %v3116_v56  ;;  %v5417_v50 = vpack.c.bf16 %v5619_v45, %v5618_v52 }
0x1078   :  { %v5861_v31 = vpop.eup %5860  ;;  %5164 = vmatprep.mubr.msk.f32.mxu0 %vm5948_vm0, %v5947_v1 }
0x1079   :  { %v3117_v9 = vmul.f32 %v5861_v31, %v7363_v49  ;;  %v5629_v49 = vunpack.i.h.bf16 %v7436_v25 }
0x107b   :  { %5165 = vmatmul.mubr.msk.f32.gmra.mrb[100].mxu0 %vm924_vm7, %v3117_v9  ;;  %v5420_v39 = vpack.c.bf16 %v5629_v49, %v5628_v47 }
0x107c   :  { %5202 = vmatprep.mubr.msk.f32.mxu0 %vm5948_vm0, %v5947_v1 }
0x109f   :  { %v3050_v13 = vpop.xlane.xlu0 %3049 }
0x10a0   :  { %5862 = vrcp.f32 %v3050_v13 }
0x10a3   :  { %v3053_v5 = vpop.xlane.xlu0 %3052 }
0x10a4   :  { %5864 = vrcp.f32 %v3053_v5 }
0x10a7   :  { %v3056_v24 = vpop.xlane.xlu0 %3055 }
0x10a8   :  { %5866 = vrcp.f32 %v3056_v24 }
0x10aa   :  { %v5863_v12 = vpop.eup %5862 }
0x10ab   :  { %v3118_v32 = vmul.f32 %v5863_v12, %v7371_v11  ;;  %v3059_v6 = vpop.xlane.xlu0 %3058 }
0x10ac   :  { %5868 = vrcp.f32 %v3059_v6 }
0x10ad   :  { %5178 = vmatmul.mubr.msk.f32.vlgmr.msra.gmra.mrb[100].mxu1 %vm924_vm7, %v3118_v32 }
0x10ae   :  { %v5865_v60 = vpop.eup %5864  ;;  %5418 = vmatpush3.bf16.msra.mxu1 %v5417_v50  ;;  %5180 = vmatprep.mubr.msk.f32.mxu1 %vm5948_vm0, %v5947_v1 }
0x10af   :  { %5419 = vmatprep.subr.bf16.mxu1 %v5952_v61  ;;  %v3119_v34 = vmul.f32 %v5865_v60, %v7375_v58 }
0x10b1   :  { %5181 = vmatmul.mubr.msk.f32.gmra.mrb[102].mxu1 %vm924_vm7, %v3119_v34 }
0x10b2   :  { %v5867_v11 = vpop.eup %5866  ;;  %5421 = vmatpush3.bf16.msra.mxu1 %v5420_v39  ;;  %5183 = vmatprep.mubr.msk.f32.mxu1 %vm5948_vm0, %v5947_v1 }
0x10b3   :  { %v3120_v15 = vmul.f32 %v5867_v11, %v7379_v36  ;;  %5225 = vmatprep.subr.mxu1 %v5947_v1 }
0x10b5   :  { %5184 = vmatmul.mubr.msk.f32.gmra.mrb[104].mxu1 %vm924_vm7, %v3120_v15 }
0x10b6   :  { %v5869_v4 = vpop.eup %5868  ;;  %v3065_v25 = vpop.xlane.xlu1 %3064  ;;  %5186 = vmatprep.mubr.msk.f32.mxu1 %vm5948_vm0, %v5947_v1 }
0x10b7   :  { %v3121_v61 = vmul.f32 %v5869_v4, %v7384_v42  ;;  %5870 = vrcp.f32 %v3065_v25  ;;  %v5682_v25 = vld [vmem:[%s7758_s8 + $0x10] sm:$0xff]  }
0x10b9   :  { %5187 = vmatmul.mubr.msk.f32.gmra.mrb[106].mxu1 %vm924_vm7, %v3121_v61 }
0x10ba   :  { %5189 = vmatprep.mubr.msk.f32.mxu1 %vm5948_vm0, %v5947_v1 }
0x10bb   :  { %v3068_v58 = vpop.xlane.xlu1 %3067 }
0x10bc   :  { %5872 = vrcp.f32 %v3068_v58 }
0x10bf   :  { %v3071_v54 = vpop.xlane.xlu1 %3070 }
0x10c1   :  { %v5871_v55 = vpop.eup %5870 }
0x10c2   :  { %v3123_v59 = vmul.f32 %v5871_v55, %v7394_v30 }
0x10c3   :  { %v3074_v36 = vpop.xlane.xlu0 %3073  ;;  %v3062_v46 = vpop.xlane.xlu1 %3061 }
0x10c4   :  { %5874 = vrcp.f32 %v3062_v46 }
0x10c5   :  { %5876 = vrcp.f32 %v3071_v54  ;;  %v5683_v54 = vld [vmem:[%s7758_s8 + $0x18] sm:$0xff]   ;;  %s7793_s8 = smov 24  }
0x10c6   :  { %v5873_v17 = vpop.eup %5872 }
0x10c7   :  { %v3080_v19 = vpop.xlane.xlu0 %3079  ;;  %v3083_v63 = vpop.xlane.xlu1 %3082  ;;  %v3124_v2 = vmul.f32 %v5873_v17, %v7399_v40 }
0x10c8   :  { %5878 = vrcp.f32 %v3080_v19 }
0x10c9   :  { %5880 = vrcp.f32 %v3074_v36 }
0x10ca   :  { %5882 = vrcp.f32 %v3083_v63 }
0x10cb   :  { %v3086_v42 = vpop.xlane.xlu0 %3085  ;;  %v3384_v35 = vpop.permute.xlu1 %3383 }
0x10cc   :  { %5201 = vmatpush3.msk.msra.mxu0 %vm1175_vm6, %v3384_v35  ;;  %5884 = vrcp.f32 %v3086_v42 }
0x10cd   :  { %5203 = vmatmul.mubr.msk.f32.vlgmr.msra.gmra.mrb[102].mxu0 %vm924_vm7, %v3123_v59  ;;  %5242 = vmatprep.subr.bf16.mxu0 %v5947_v1 }
0x10ce   :  { %v5875_v16 = vpop.eup %5874  ;;  %5205 = vmatprep.mubr.msk.f32.mxu0 %vm5948_vm0, %v5947_v1  ;;  %5243 = vmatpush3.bf16.msra.mxu0 %v5682_v25 }
0x10cf   :  { %v3089_v43 = vpop.xlane.xlu0 %3088  ;;  %v3122_v37 = vmul.f32 %v5875_v16, %v7408_v41  ;;  %v5877_v44 = vpop.eup %5876  ;;  %5244 = vmatprep.subr.bf16.mxu0 %v5947_v1 }
0x10d0   :  { %5886 = vrcp.f32 %v3089_v43  ;;  %v3125_v40 = vmul.f32 %v5877_v44, %v7404_v33 }
0x10d1   :  { %5190 = vmatmul.mubr.msk.f32.gmra.mrb[108].mxu1 %vm924_vm7, %v3122_v37  ;;  %5206 = vmatmul.mubr.msk.f32.gmra.mrb[104].mxu0 %vm924_vm7, %v3124_v2 }
0x10d2   :  { %v5879_v30 = vpop.eup %5878  ;;  %5208 = vmatprep.mubr.msk.f32.mxu0 %vm5948_vm0, %v5947_v1  ;;  %5227 = vmatprep.mubr.msk.f32.mxu1 %vm5948_vm0, %v5947_v1 }
0x10d3   :  { %v3128_v53 = vmul.f32 %v5879_v30, %v7414_v23  ;;  %v3505_v27 = vpop.permute.xlu0 %3504  ;;  %v5881_v26 = vpop.eup %5880  ;;  %5245 = vmatpush3.bf16.msra.mxu0 %v5683_v54 }
0x10d4   :  { %5226 = vmatpush3.msk.msra.mxu1 %vm1175_vm6, %v3505_v27  ;;  %v5883_v41 = vpop.eup %5882  ;;  %v3126_v23 = vmul.f32 %v5881_v26, %v7410_v21  ;;  %5274 = vmatprep.subr.bf16.mxu0 %v5947_v1 }
0x10d5   :  { %5258 = vmatprep.subr.bf16.mxu1 %v5947_v1  ;;  %5209 = vmatmul.mubr.msk.f32.gmra.mrb[106].mxu0 %vm924_vm7, %v3125_v40  ;;  %v3129_v48 = vmul.f32 %v5883_v41, %v7418_v18 }
0x10d6   :  { %5228 = vmatmul.mubr.msk.f32.vlgmr.msra.gmra.mrb[110].mxu1 %vm924_vm7, %v3128_v53  ;;  %5211 = vmatprep.mubr.msk.f32.mxu0 %vm5948_vm0, %v5947_v1  ;;  %v5885_v38 = vpop.eup %5884 }
0x10d7   :  { %5230 = vmatprep.mubr.msk.f32.mxu1 %vm5948_vm0, %v5947_v1  ;;  %v3130_v33 = vmul.f32 %v5885_v38, %v7422_v29  ;;  %v2892_v38 = vmul.f32 0.35355338, %v7330_v0 }
0x10d9   :  { %5212 = vmatmul.mubr.msk.f32.gmra.mrb[108].mxu0 %vm924_vm7, %v3126_v23 }
0x10da   :  { %5231 = vmatmul.mubr.msk.f32.gmra.mrb[112].mxu1 %vm924_vm7, %v3129_v48  ;;  %5214 = vmatprep.mubr.msk.f32.mxu0 %vm5948_vm0, %v5947_v1  ;;  %v5887_v3 = vpop.eup %5886 }
0x10db   :  { %5233 = vmatprep.mubr.msk.f32.mxu1 %vm5948_vm0, %v5947_v1  ;;  %v3131_v21 = vmul.f32 %v5887_v3, %v7428_v8 }
0x10de   :  { %5234 = vmatmul.mubr.msk.f32.gmra.mrb[114].mxu1 %vm924_vm7, %v3130_v33  ;;  %v2912_v33 = vadd.f32 %v7258_v28, %v2892_v38 }
0x10df   :  { %5236 = vmatprep.mubr.msk.f32.mxu1 %vm5948_vm0, %v5947_v1 }
0x10e0   :  { %v2970_v3 = vsel %vm937_vm8, %v2912_v33, -inf }
0x10e2   :  { %5237 = vmatmul.mubr.msk.f32.gmra.mrb[116].mxu1 %vm924_vm7, %v3131_v21 }
0x10e3   :  { %5239 = vmatprep.mubr.msk.f32.mxu1 %vm5948_vm0, %v5947_v1 }
0x10fc   :  { %v2957_v18 = vpop.xlane.xlu1 %2956 }
0x10fd   :  { %v2987_v22 = vsub.f32 %v7443_v7, %v2957_v18 }
0x10ff   :  { %v3021_v56 = vmul.f32 1.442695, %v2987_v22 }
0x1101   :  { %5888 = vpow2.f32 %v3021_v56 }
0x110b   :  { %v5889_v31 = vpop.eup %5888 }
0x110c   :  { %v3075_v29 = vsel %vm937_vm8, %v5889_v31, 0.0 }
0x110d   :  { %3076 = vadd.xlane.f32.xlu0 %v3075_v29 }
0x113e   :  { %v7530_v9 = vpop.f32.mrb[92].mxu0 }
0x113f   :  { %v5154_v14 = vpop.f32.mrb[93].mxu0 }
0x1142   :  { %v7532_v13 = vpop.f32.mrb[94].mxu0 }
0x1143   :  { %v5157_v8 = vpop.f32.mrb[95].mxu0 }
0x1146   :  { %v7534_v5 = vpop.f32.mrb[96].mxu0 }
0x1147   :  { %v5160_v24 = vpop.f32.mrb[97].mxu0 }
0x114a   :  { %v7536_v45 = vpop.f32.mrb[98].mxu0 }
0x114b   :  { %v5163_v52 = vpop.f32.mrb[99].mxu0 }
0x114e   :  { %v7538_v12 = vpop.f32.mrb[100].mxu0 }
0x114f   :  { %v5166_v7 = vpop.f32.mrb[101].mxu0 }
0x1180   :  { %v3351_v32 = vpop.f32.mrb[100].mxu1 }
0x1181   :  { %v5179_v6 = vpop.f32.mrb[101].mxu1 }
0x1184   :  { %v3356_v50 = vpop.f32.mrb[102].mxu1 }
0x1185   :  { %v5630_v49 = vpack.i.bf16 %v3356_v50, %v3351_v32  ;;  %v5182_v47 = vpop.f32.mrb[103].mxu1 }
0x1187   :  { %5631 = vrot.lane.b32.xlu0 %v5630_v49, %s5955_s21 }
0x1188   :  { %v3361_v60 = vpop.f32.mrb[104].mxu1 }
0x1189   :  { %v5185_v34 = vpop.f32.mrb[105].mxu1 }
0x118c   :  { %v3366_v39 = vpop.f32.mrb[106].mxu1 }
0x118d   :  { %v5640_v11 = vpack.i.bf16 %v3366_v39, %v3361_v60  ;;  %v5188_v15 = vpop.f32.mrb[107].mxu1 }
0x118f   :  { %5641 = vrot.lane.b32.xlu0 %v5640_v11, %s5955_s21 }
0x119a   :  { %v3077_v4 = vpop.xlane.xlu0 %3076 }
0x119b   :  { %5890 = vrcp.f32 %v3077_v4 }
0x11a0   :  { %v3472_v61 = vpop.f32.mrb[102].mxu0 }
0x11a1   :  { %v5204_v58 = vpop.f32.mrb[103].mxu0 }
0x11a4   :  { %v7549_v36 = vpop.f32.mrb[108].mxu1  ;;  %v3477_v46 = vpop.f32.mrb[104].mxu0 }
0x11a5   :  { %v5891_v19 = vpop.eup %5890  ;;  %v5635_v63 = vpack.i.bf16 %v3477_v46, %v3472_v61  ;;  %v5191_v55 = vpop.f32.mrb[109].mxu1 }
0x11a6   :  { %v5207_v42 = vpop.f32.mrb[105].mxu0  ;;  %v3127_v59 = vmul.f32 %v5891_v19, %v5889_v31 }
0x11a7   :  { %5636 = vrot.lane.b32.xlu1 %v5635_v63, %s7792_s2 }
0x11a8   :  { %v3482_v35 = vpop.f32.mrb[106].mxu0  ;;  %5215 = vmatmul.mubr.msk.f32.gmra.mrb[110].mxu0 %vm924_vm7, %v3127_v59 }
0x11a9   :  { %v3593_v17 = vpop.f32.mrb[110].mxu1  ;;  %v5210_v16 = vpop.f32.mrb[107].mxu0  ;;  %5246 = vmatprep.mubr.msk.bf16.mxu0 %vm5948_vm0, %v5947_v1 }
0x11aa   :  { %v5229_v43 = vpop.f32.mrb[111].mxu1  ;;  %v7588_v16 = vld [vmem:[%s7759_s9 + $0x1] ss:$0 sm:$0xff] }
0x11ac   :  { %v3487_v37 = vpop.f32.mrb[108].mxu0 }
0x11ad   :  { %v3598_v2 = vpop.f32.mrb[112].mxu1  ;;  %v5650_v44 = vpack.i.bf16 %v3487_v37, %v3482_v35  ;;  %v5213_v53 = vpop.f32.mrb[109].mxu0 }
0x11ae   :  { %v5645_v30 = vpack.i.bf16 %v3598_v2, %v3593_v17  ;;  %v5232_v27 = vpop.f32.mrb[113].mxu1 }
0x11b0   :  { %5646 = vrot.lane.b32.xlu1 %v5645_v30, %s7793_s8 }
0x11b1   :  { %v3603_v26 = vpop.f32.mrb[114].mxu1 }
0x11b2   :  { %v5235_v40 = vpop.f32.mrb[115].mxu1 }
0x11b4   :  { %5651 = vrot.lane.b32.xlu1 %v5650_v44, %s7792_s2 }
0x11b5   :  { %v3608_v41 = vpop.f32.mrb[116].mxu1 }
0x11b6   :  { %v5655_v23 = vpack.i.bf16 %v3608_v41, %v3603_v26  ;;  %v5238_v48 = vpop.f32.mrb[117].mxu1 }
0x11b8   :  { %5656 = vrot.lane.b32.xlu0 %v5655_v23, %s7793_s8 }
0x11d8   :  { %2971 = vmax.xlane.f32.xlu1 %v2970_v3 }
0x11f9   :  { %v5632_v21 = vpop.permute.xlu0 %5631 }
0x11fa   :  { %v5634_v22 = vunpack.i.h.bf16 %v5632_v21  ;;  %v5633_v56 = vunpack.i.l.bf16 %v5632_v21 }
0x11fc   :  { %v3677_v8 = vsel %vm413_vm4, %v7530_v9, %v5633_v56  ;;  %v3678_v24 = vsel %vm413_vm4, %v7532_v13, %v5634_v22 }
0x1201   :  { %v5642_v7 = vpop.permute.xlu0 %5641 }
0x1202   :  { %v5644_v60 = vunpack.i.h.bf16 %v5642_v7  ;;  %v5643_v34 = vunpack.i.l.bf16 %v5642_v7 }
0x1204   :  { %v3679_v11 = vsel %vm413_vm4, %v7534_v5, %v5643_v34  ;;  %v3680_v15 = vsel %vm413_vm4, %v7536_v45, %v5644_v60 }
0x1219   :  { %v5637_v18 = vpop.permute.xlu1 %5636 }
0x121a   :  { %v5639_v31 = vunpack.i.h.bf16 %v5637_v18  ;;  %v5638_v29 = vunpack.i.l.bf16 %v5637_v18 }
0x121c   :  { %v3683_v28 = vsel %vm1696_vm9, %v3678_v24, %v5639_v31  ;;  %v3682_v32 = vsel %vm1696_vm9, %v3677_v8, %v5638_v29 }
0x1222   :  { %v5647_v14 = vpop.permute.xlu1 %5646 }
0x1223   :  { %v5649_v52 = vunpack.i.h.bf16 %v5647_v14  ;;  %v5648_v0 = vunpack.i.l.bf16 %v5647_v14 }
0x1225   :  { %v3687_v6 = vsel %vm1702_vm10, %v3682_v32, %v5648_v0  ;;  %v3688_v50 = vsel %vm1702_vm10, %v3683_v28, %v5649_v52 }
0x1226   :  { %v3692_v49 = vpack.c.bf16 %v3688_v50, %v3687_v6  ;;  %v5652_v47 = vpop.permute.xlu1 %5651 }
0x1227   :  { %v5654_v39 = vunpack.i.h.bf16 %v5652_v47  ;;  %v5653_v9 = vunpack.i.l.bf16 %v5652_v47 }
0x1228   :  { %5247 = vmatmul.mubr.msk.bf16.vlgmr.msra.gmra.mrb[112].mxu0 %vm187_vm2, %v3692_v49 }
0x1229   :  { %5250 = vmatprep.mubr.msk.bf16.mxu0 %vm5948_vm0, %v5947_v1  ;;  %v3685_v61 = vsel %vm1696_vm9, %v3680_v15, %v5654_v39  ;;  %v3684_v58 = vsel %vm1696_vm9, %v3679_v11, %v5653_v9  ;;  %v5684_v11 = vld [vmem:[%s7762_s12 + $0x10] sm:$0xff]   ;;  %v5685_v15 = vld [vmem:[%s7762_s12 + $0x18] sm:$0xff]  }
0x122a   :  { %v5657_v13 = vpop.permute.xlu0 %5656  ;;  %5259 = vmatpush3.bf16.msra.mxu1 %v5684_v11 }
0x122b   :  { %v5659_v4 = vunpack.i.h.bf16 %v5657_v13  ;;  %v5658_v25 = vunpack.i.l.bf16 %v5657_v13  ;;  %5260 = vmatprep.subr.bf16.mxu1 %v5947_v1 }
0x122d   :  { %v3689_v54 = vsel %vm1702_vm10, %v3684_v58, %v5658_v25  ;;  %v3690_v46 = vsel %vm1702_vm10, %v3685_v61, %v5659_v4 }
0x122e   :  { %v3693_v19 = vpack.c.bf16 %v3690_v46, %v3689_v54  ;;  %5261 = vmatpush3.bf16.msra.mxu1 %v5685_v15 }
0x122f   :  { %5302 = vmatprep.subr.bf16.mxu1 %v5947_v1 }
0x1230   :  { %5251 = vmatmul.mubr.msk.bf16.gmra.mrb[116].mxu0 %vm187_vm2, %v3693_v19 }
0x1231   :  { %5254 = vmatprep.mubr.msk.bf16.mxu0 %vm5948_vm0, %v5947_v1 }
0x1265   :  { %v2972_v5 = vpop.xlane.xlu1 %2971 }
0x1266   :  { %v2992_v63 = vsub.f32 %v2912_v33, %v2972_v5 }
0x1268   :  { %v3031_v55 = vmul.f32 1.442695, %v2992_v63 }
0x126a   :  { %5892 = vpow2.f32 %v3031_v55 }
0x1274   :  { %v5893_v45 = vpop.eup %5892 }
0x1275   :  { %v3090_v42 = vsel %vm937_vm8, %v5893_v45, 0.0 }
0x1276   :  { %3091 = vadd.xlane.f32.xlu0 %v3090_v42 }
0x127b   :  { %v3492_v59 = vpop.f32.mrb[110].mxu0 }
0x127c   :  { %v5216_v35 = vpop.f32.mrb[111].mxu0 }
0x12fb   :  { %v3755_v17 = vpop.f32.mrb[112].mxu0 }
0x12fc   :  { %v3777_v43 = vadd.f32 %v3755_v17, %v6915_v62  ;;  %v5248_v37 = vpop.f32.mrb[113].mxu0 }
0x12fd   :  { %v3758_v2 = vpop.f32.mrb[114].mxu0 }
0x12fe   :  { %v7592_v44 = vadd.f32 %v7588_v16, %v3777_v43  ;;  %v3778_v30 = vadd.f32 %v3758_v2, %v6918_v57  ;;  %v5249_v53 = vpop.f32.mrb[115].mxu0  ;;  %v7632_v43 = vld [vmem:[%s7760_s10 + $0x1] ss:$0 sm:$0xff] }
0x12ff   :  { %v7638_v53 = vld [vmem:[%s7761_s11 + $0x1] ss:$0 sm:$0xff] }
0x1300   :  { %v3791_v27 = vadd.f32 %v7588_v16, %v3778_v30  ;;  %v3799_v26 = vsel %vm187_vm2, %v7592_v44, 0.0 }
0x1301   :  { %3800 = vadd.xlane.f32.xlu0 %v3799_v26 }
0x1302   :  { %v3802_v48 = vsel %vm187_vm2, %v3791_v27, 0.0 }
0x1303   :  { %v3092_v40 = vpop.xlane.xlu0 %3091  ;;  %v3763_v41 = vpop.f32.mrb[116].mxu0 }
0x1304   :  { %5894 = vrcp.f32 %v3092_v40  ;;  %v3779_v23 = vadd.f32 %v3763_v41, %v6925_v10  ;;  %v5252_v62 = vpop.f32.mrb[117].mxu0 }
0x1305   :  { %3803 = vadd.xlane.f32.xlu0 %v3802_v48  ;;  %v3766_v38 = vpop.f32.mrb[118].mxu0 }
0x1306   :  { %v7601_v33 = vadd.f32 %v7588_v16, %v3779_v23  ;;  %v3780_v57 = vadd.f32 %v3766_v38, %v6928_v51  ;;  %v5253_v3 = vpop.f32.mrb[119].mxu0 }
0x1308   :  { %v3793_v21 = vadd.f32 %v7588_v16, %v3780_v57  ;;  %v3805_v18 = vsel %vm187_vm2, %v7601_v33, 0.0 }
0x1309   :  { %3806 = vadd.xlane.f32.xlu1 %v3805_v18 }
0x130a   :  { %v3808_v22 = vsel %vm187_vm2, %v3793_v21, 0.0 }
0x130b   :  { %3809 = vadd.xlane.f32.xlu0 %v3808_v22 }
0x130e   :  { %v5895_v10 = vpop.eup %5894 }
0x130f   :  { %v3132_v56 = vmul.f32 %v5895_v10, %v5893_v45 }
0x1311   :  { %5240 = vmatmul.mubr.msk.f32.gmra.mrb[118].mxu1 %vm924_vm7, %v3132_v56 }
0x1312   :  { %5262 = vmatprep.mubr.msk.bf16.mxu1 %vm5948_vm0, %v5947_v1 }
0x138e   :  { %v3801_v31 = vpop.xlane.xlu0 %3800 }
0x138f   :  { %v3814_v29 = vmul.f32 0.03125, %v3801_v31 }
0x1391   :  { %v3819_v51 = vsub.f32 %v7592_v44, %v3814_v29 }
0x1392   :  { %v3804_v14 = vpop.xlane.xlu0 %3803 }
0x1393   :  { %v3815_v8 = vmul.f32 0.03125, %v3804_v14  ;;  %v3824_v24 = vmul.f32 %v3819_v51, %v3819_v51 }
0x1395   :  { %v3820_v52 = vsub.f32 %v3791_v27, %v3815_v8  ;;  %v3829_v0 = vsel %vm187_vm2, %v3824_v24, 0.0  ;;  %v5686_v24 = vld [vmem:[%s7764_s14 + $0x40] sm:$0xff]  }
0x1396   :  { %3830 = vadd.xlane.f32.xlu1 %v3829_v0  ;;  %v3807_v7 = vpop.xlane.xlu1 %3806  ;;  %5275 = vmatpush3.bf16.msra.mxu0 %v5686_v24  ;;  %v5689_v0 = vld [vmem:[%s7764_s14 + $0x58] sm:$0xff]  }
0x1397   :  { %v3816_v28 = vmul.f32 0.03125, %v3807_v7  ;;  %v3825_v32 = vmul.f32 %v3820_v52, %v3820_v52  ;;  %5276 = vmatprep.subr.bf16.mxu0 %v5947_v1  ;;  %v5690_v7 = vld [vmem:[%s7764_s14 + $0x60] sm:$0xff]  }
0x1398   :  { %v3810_v6 = vpop.xlane.xlu0 %3809 }
0x1399   :  { %v3821_v50 = vsub.f32 %v7601_v33, %v3816_v28  ;;  %v3817_v49 = vmul.f32 0.03125, %v3810_v6  ;;  %v3832_v47 = vsel %vm187_vm2, %v3825_v32, 0.0  ;;  %v5691_v28 = vld [vmem:[%s7764_s14 + $0x68] sm:$0xff]   ;;  %v5692_v32 = vld [vmem:[%s7764_s14 + $0x70] sm:$0xff]   ;;  %v5693_v6 = vld [vmem:[%s7764_s14 + $0x78] sm:$0xff]  }
0x139a   :  { %3833 = vadd.xlane.f32.xlu0 %v3832_v47 }
0x139b   :  { %v3822_v60 = vsub.f32 %v3793_v21, %v3817_v49  ;;  %v3826_v34 = vmul.f32 %v3821_v50, %v3821_v50 }
0x139d   :  { %v3835_v39 = vsel %vm187_vm2, %v3826_v34, 0.0  ;;  %v3827_v9 = vmul.f32 %v3822_v60, %v3822_v60 }
0x139e   :  { %3836 = vadd.xlane.f32.xlu1 %v3835_v39 }
0x139f   :  { %v3838_v13 = vsel %vm187_vm2, %v3827_v9, 0.0 }
0x13a0   :  { %3839 = vadd.xlane.f32.xlu0 %v3838_v13 }
0x13af   :  { %3630 = vrot.lane.b32.xlu1 %v7549_v36, %s5955_s21 }
0x13b6   :  { %3650 = vrot.lane.b32.xlu0 %v3492_v59, %s7792_s2 }
0x13e4   :  { %v3613_v4 = vpop.f32.mrb[118].mxu1 }
0x13e5   :  { %v5241_v25 = vpop.f32.mrb[119].mxu1  ;;  %3670 = vrot.lane.b32.xlu1 %v3613_v4, %s7793_s8 }
0x1423   :  { %v3831_v36 = vpop.xlane.xlu1 %3830 }
0x1424   :  { %v3844_v61 = vmul.f32 0.03125, %v3831_v36 }
0x1426   :  { %v3849_v58 = vadd.f32 1e-05, %v3844_v61 }
0x1427   :  { %v3834_v54 = vpop.xlane.xlu0 %3833 }
0x1428   :  { %5896 = vrsqrt.f32 %v3849_v58  ;;  %v3845_v46 = vmul.f32 0.03125, %v3834_v54 }
0x142a   :  { %v3850_v19 = vadd.f32 1e-05, %v3845_v46 }
0x142b   :  { %v3837_v5 = vpop.xlane.xlu1 %3836 }
0x142c   :  { %5898 = vrsqrt.f32 %v3850_v19  ;;  %v3846_v63 = vmul.f32 0.03125, %v3837_v5 }
0x142d   :  { %v3840_v55 = vpop.xlane.xlu0 %3839 }
0x142e   :  { %v3851_v45 = vadd.f32 1e-05, %v3846_v63  ;;  %v3847_v42 = vmul.f32 0.03125, %v3840_v55 }
0x142f   :  { %v3631_v10 = vpop.permute.xlu1 %3630 }
0x1430   :  { %5900 = vrsqrt.f32 %v3851_v45  ;;  %v3852_v59 = vadd.f32 1e-05, %v3847_v42  ;;  %v3681_v56 = vsel %vm413_vm4, %v7538_v12, %v3631_v10  ;;  %v5687_v12 = vld [vmem:[%s7764_s14 + $0x48] sm:$0xff]  }
0x1431   :  { %v3651_v31 = vpop.permute.xlu0 %3650  ;;  %5277 = vmatpush3.bf16.msra.mxu0 %v5687_v12 }
0x1432   :  { %v5897_v35 = vpop.eup %5896  ;;  %5902 = vrsqrt.f32 %v3852_v59  ;;  %v3686_v29 = vsel %vm1696_vm9, %v3681_v56, %v3651_v31  ;;  %5278 = vmatprep.subr.bf16.mxu0 %v5947_v1 }
0x1433   :  { %v3859_v17 = vmul.f32 %v5897_v35, %v3819_v51 }
0x1435   :  { %v3870_v2 = vmul.f32 %v7632_v43, %v3859_v17 }
0x1436   :  { %v5899_v37 = vpop.eup %5898 }
0x1437   :  { %v3860_v30 = vmul.f32 %v5899_v37, %v3820_v52  ;;  %v3881_v40 = vadd.f32 %v7638_v53, %v3870_v2  ;;  %v5688_v52 = vld [vmem:[%s7764_s14 + $0x50] sm:$0xff]  }
0x1438   :  { %5279 = vmatpush3.bf16.msra.mxu0 %v5688_v52 }
0x1439   :  { %v3871_v27 = vmul.f32 %v7632_v43, %v3860_v30  ;;  %5280 = vmatprep.subr.bf16.mxu0 %v5947_v1 }
0x143a   :  { %v5901_v26 = vpop.eup %5900 }
0x143b   :  { %v3882_v41 = vadd.f32 %v7638_v53, %v3871_v27  ;;  %v3861_v23 = vmul.f32 %v5901_v26, %v3821_v50  ;;  %v7694_v50 = vld [vmem:[%s7763_s13 + $0x1] ss:$0 sm:$0xff] }
0x143c   :  { %v5903_v62 = vpop.eup %5902  ;;  %5281 = vmatpush3.bf16.msra.mxu0 %v5689_v0 }
0x143d   :  { %v3862_v48 = vmul.f32 %v5903_v62, %v3822_v60  ;;  %v3886_v38 = vpack.c.bf16 %v3882_v41, %v3881_v40  ;;  %v3872_v57 = vmul.f32 %v7632_v43, %v3861_v23  ;;  %5282 = vmatprep.subr.bf16.mxu0 %v5947_v1 }
0x143f   :  { %5263 = vmatmul.mubr.msk.bf16.vlgmr.msra.gmra.mrb[120].mxu1 %vm187_vm2, %v3886_v38  ;;  %v3873_v3 = vmul.f32 %v7632_v43, %v3862_v48  ;;  %v3883_v18 = vadd.f32 %v7638_v53, %v3872_v57 }
0x1440   :  { %5266 = vmatprep.mubr.msk.bf16.mxu1 %vm5948_vm0, %v5947_v1  ;;  %5283 = vmatpush3.bf16.msra.mxu0 %v5690_v7 }
0x1441   :  { %v3884_v21 = vadd.f32 %v7638_v53, %v3873_v3  ;;  %5284 = vmatprep.subr.bf16.mxu0 %v5947_v1 }
0x1443   :  { %v3887_v22 = vpack.c.bf16 %v3884_v21, %v3883_v18 }
0x1444   :  { %5285 = vmatpush3.bf16.msra.mxu0 %v5691_v28 }
0x1445   :  { %5286 = vmatprep.subr.bf16.mxu0 %v5947_v1 }
0x1447   :  { %5267 = vmatmul.mubr.msk.bf16.gmra.mrb[124].mxu1 %vm187_vm2, %v3887_v22 }
0x1448   :  { %5270 = vmatprep.mubr.msk.bf16.mxu1 %vm5948_vm0, %v5947_v1  ;;  %5287 = vmatpush3.bf16.msra.mxu0 %v5692_v32 }
0x1449   :  { %5288 = vmatprep.subr.bf16.mxu0 %v5947_v1 }
0x144c   :  { %5289 = vmatpush3.bf16.msra.mxu0 %v5693_v6 }
0x1457   :  { %v3671_v51 = vpop.permute.xlu1 %3670 }
0x1458   :  { %v3691_v14 = vsel %vm1702_vm10, %v3686_v29, %v3671_v51 }
0x1459   :  { %v3694_v8 = vpack.c.bf16 %v3691_v14, %v3691_v14 }
0x145b   :  { %5255 = vmatmul.mubr.msk.bf16.gmra.mrb[120].mxu0 %vm187_vm2, %v3694_v8 }
0x145c   :  { %5290 = vmatprep.mubr.msk.bf16.mxu0 %vm5948_vm0, %v5947_v1 }
0x1512   :  { %v3957_v49 = vpop.f32.mrb[120].mxu1 }
0x1513   :  { %v3958_v47 = vadd.f32 %v7694_v50, %v3957_v49  ;;  %v5264_v60 = vpop.f32.mrb[121].mxu1 }
0x1514   :  { %v3960_v34 = vpop.f32.mrb[122].mxu1 }
0x1515   :  { %v3979_v39 = vmul.f32 %v3958_v47, %v3958_v47  ;;  %v3961_v9 = vadd.f32 %v7694_v50, %v3960_v34  ;;  %v5265_v13 = vpop.f32.mrb[123].mxu1 }
0x1517   :  { %v3984_v11 = vmul.f32 %v3979_v39, %v3958_v47  ;;  %v3980_v15 = vmul.f32 %v3961_v9, %v3961_v9 }
0x1519   :  { %v3989_v4 = vmul.f32 0.044715, %v3984_v11  ;;  %v3985_v25 = vmul.f32 %v3980_v15, %v3961_v9 }
0x151a   :  { %v3965_v36 = vpop.f32.mrb[124].mxu1 }
0x151b   :  { %v3994_v61 = vadd.f32 %v3989_v4, %v3958_v47  ;;  %v3990_v58 = vmul.f32 0.044715, %v3985_v25  ;;  %v3966_v54 = vadd.f32 %v7694_v50, %v3965_v36  ;;  %v5268_v46 = vpop.f32.mrb[125].mxu1  ;;  %v4504_v4 = vld [vmem:[%s7765_s15 + $0x1] ss:$0 sm:$0xff] }
0x151c   :  { %v3968_v19 = vpop.f32.mrb[126].mxu1 }
0x151d   :  { %v3999_v5 = vmul.f32 0.7978846, %v3994_v61  ;;  %v3995_v63 = vadd.f32 %v3990_v58, %v3961_v9  ;;  %v3981_v55 = vmul.f32 %v3966_v54, %v3966_v54  ;;  %v3969_v45 = vadd.f32 %v7694_v50, %v3968_v19  ;;  %v5269_v42 = vpop.f32.mrb[127].mxu1 }
0x151f   :  { %5904 = vtanh.f32 %v3999_v5  ;;  %v4000_v59 = vmul.f32 0.7978846, %v3995_v63  ;;  %v3986_v35 = vmul.f32 %v3981_v55, %v3966_v54  ;;  %v3982_v17 = vmul.f32 %v3969_v45, %v3969_v45 }
0x1521   :  { %5906 = vtanh.f32 %v4000_v59  ;;  %v3991_v37 = vmul.f32 0.044715, %v3986_v35  ;;  %v3987_v2 = vmul.f32 %v3982_v17, %v3969_v45 }
0x1523   :  { %v3996_v30 = vadd.f32 %v3991_v37, %v3966_v54  ;;  %v3992_v27 = vmul.f32 0.044715, %v3987_v2 }
0x1525   :  { %v4001_v26 = vmul.f32 0.7978846, %v3996_v30  ;;  %v3997_v40 = vadd.f32 %v3992_v27, %v3969_v45 }
0x1527   :  { %5908 = vtanh.f32 %v4001_v26  ;;  %v4002_v41 = vmul.f32 0.7978846, %v3997_v40  ;;  %v5694_v40 = vld [vmem:[%s7768_s18] sm:$0xff]  }
0x1528   :  { %5303 = vmatpush3.bf16.msra.mxu1 %v5694_v40 }
0x1529   :  { %v5905_v23 = vpop.eup %5904  ;;  %5910 = vtanh.f32 %v4002_v41  ;;  %5304 = vmatprep.subr.bf16.mxu1 %v5947_v1 }
0x152a   :  { %v4009_v62 = vadd.f32 1.0, %v5905_v23 }
0x152b   :  { %v5907_v48 = vpop.eup %5906 }
0x152c   :  { %v4014_v38 = vmul.f32 0.5, %v4009_v62  ;;  %v4010_v57 = vadd.f32 1.0, %v5907_v48 }
0x152e   :  { %v4015_v3 = vmul.f32 0.5, %v4010_v57  ;;  %v3771_v21 = vpop.f32.mrb[120].mxu0  ;;  %v4019_v10 = vmul.f32 %v4014_v38, %v3958_v47 }
0x152f   :  { %v3781_v18 = vadd.f32 %v3771_v21, %v6935_v20  ;;  %v5256_v22 = vpop.f32.mrb[121].mxu0 }
0x1530   :  { %v4020_v56 = vmul.f32 %v4015_v3, %v3961_v9  ;;  %v3774_v31 = vpop.f32.mrb[122].mxu0 }
0x1531   :  { %v5909_v29 = vpop.eup %5908  ;;  %v3794_v51 = vadd.f32 %v7588_v16, %v3781_v18  ;;  %v5257_v14 = vpop.f32.mrb[123].mxu0  ;;  %v4506_v31 = vld [vmem:[%s7767_s17] ss:$0 sm:$0xff]  ;;  %s4262_s17 = sshll.u32 %s5958_s25, 4  ;;  %s4263_s17 = int_to_ptr.vmem [resolvable:$true] %s4262_s17 }
0x1532   :  { %v4024_v8 = vpack.c.bf16 %v4020_v56, %v4019_v10  ;;  %v4011_v24 = vadd.f32 1.0, %v5909_v29  ;;  %s5923_s30 = scalar_lea.vmem %s4263_s17, 32  ;;  %p5928_p1 = scmp.lt.s32.totalorder %s4263_s17, %s4263_s17 }
0x1533   :  { %v5911_v12 = vpop.eup %5910  ;;  %v3811_v52 = vsel %vm200_vm3, %v3794_v51, 0.0  ;;  %p5924_p0 = scmp.ne.s32.totalorder %s4263_s17, %s5923_s30  ;;  %p5929_p2 = scmp.lt.s32.totalorder %s5923_s30, %s5923_s30 }
0x1534   :  { %5291 = vmatmul.mubr.bf16.vlgmr.msra.gmra.mrb[124].mxu0 %v4024_v8  ;;  %3812 = vadd.xlane.f32.xlu1 %v3811_v52  ;;  %v4012_v0 = vadd.f32 1.0, %v5911_v12  ;;  %v4016_v7 = vmul.f32 0.5, %v4011_v24 }
0x1535   :  { %5294 = vmatprep.mubr.msk.bf16.mxu0 %vm5948_vm0, %v5947_v1  ;;  %p5930_p3 = por %p5929_p2, %p5928_p1 }
0x1536   :  { %v4017_v20 = vmul.f32 0.5, %v4012_v0  ;;  %v4021_v28 = vmul.f32 %v4016_v7, %v3966_v54 }
0x1537   :  { %p5931_p4 = pnand %p5930_p3, %p5924_p0 }
0x1538   :  { %v4022_v32 = vmul.f32 %v4017_v20, %v3969_v45  ;;  %v4507_v20 = vld [vmem:[%s7769_s19] ss:$0 sm:$0xff] }
0x153a   :  { %v4025_v6 = vpack.c.bf16 %v4022_v32, %v4021_v28 }
0x153c   :  { %5295 = vmatmul.mubr.bf16.gmra.mrb[128].mxu0 %v4025_v6 }
0x153d   :  { %5298 = vmatprep.mubr.msk.bf16.mxu0 %vm5948_vm0, %v5947_v1 }
0x15c1   :  { %v3813_v16 = vpop.xlane.xlu1 %3812 }
0x15c2   :  { %v3818_v49 = vmul.f32 0.03125, %v3813_v16 }
0x15c4   :  { %v3823_v47 = vsub.f32 %v3794_v51, %v3818_v49 }
0x15c6   :  { %v3828_v60 = vmul.f32 %v3823_v47, %v3823_v47 }
0x15c8   :  { %v3841_v34 = vsel %vm200_vm3, %v3828_v60, 0.0 }
0x15c9   :  { %3842 = vadd.xlane.f32.xlu0 %v3841_v34 }
0x1607   :  { %v4126_v39 = vpop.f32.mrb[124].mxu0 }
0x1608   :  { %v5292_v9 = vpop.f32.mrb[125].mxu0  ;;  %v4145_v15 = vadd.f32 %v4126_v39, %v7592_v44 }
0x1609   :  { %v4129_v13 = vpop.f32.mrb[126].mxu0 }
0x160a   :  { %v5293_v11 = vpop.f32.mrb[127].mxu0  ;;  %v4155_v54 = vadd.f32 %v4504_v4, %v4145_v15 }
0x160f   :  { %v4133_v25 = vpop.f32.mrb[128].mxu0 }
0x1610   :  { %v4146_v36 = vadd.f32 %v4133_v25, %v7601_v33  ;;  %v5296_v61 = vpop.f32.mrb[129].mxu0 }
0x1611   :  { %v4136_v58 = vpop.f32.mrb[130].mxu0 }
0x1612   :  { %v4156_v46 = vadd.f32 %v4504_v4, %v4146_v36  ;;  %v5297_v19 = vpop.f32.mrb[131].mxu0 }
0x1614   :  { %v4158_v5 = vsel %vm4157_vm11, %v4155_v54, %v4156_v46 }
0x1615   :  { %v4161_v63 = vsel %vm200_vm3, %v4158_v5, 0.0 }
0x1616   :  { %4162 = vadd.xlane.f32.xlu0 %v4161_v63 }
0x1656   :  { %v3843_v55 = vpop.xlane.xlu0 %3842 }
0x1657   :  { %v3848_v45 = vmul.f32 0.03125, %v3843_v55 }
0x1659   :  { %v3853_v44 = vadd.f32 1e-05, %v3848_v45 }
0x165b   :  { %5912 = vrsqrt.f32 %v3853_v44 }
0x1665   :  { %v5913_v42 = vpop.eup %5912 }
0x1666   :  { %v3863_v59 = vmul.f32 %v5913_v42, %v3823_v47 }
0x1668   :  { %v3874_v35 = vmul.f32 %v7632_v43, %v3863_v59  ;;  %v5695_v43 = vld [vmem:[%s7768_s18 + $0x8] sm:$0xff]  }
0x1669   :  { %5305 = vmatpush3.bf16.msra.mxu1 %v5695_v43 }
0x166a   :  { %v3885_v33 = vadd.f32 %v7638_v53, %v3874_v35 }
0x166c   :  { %v3888_v17 = vpack.c.bf16 %v3885_v33, %v3885_v33 }
0x166e   :  { %5271 = vmatmul.mubr.msk.bf16.gmra.mrb[128].mxu1 %vm187_vm2, %v3888_v17 }
0x166f   :  { %5306 = vmatprep.mubr.msk.bf16.mxu1 %vm5948_vm0, %v5947_v1  ;;  %v4505_v1 = vld [vmem:[%s7766_s16] ss:$0 sm:$0xff] }
0x16a3   :  { %v4163_v37 = vpop.xlane.xlu0 %4162 }
0x16a4   :  { %v4164_v2 = vmul.f32 0.03125, %v4163_v37 }
0x16a6   :  { %v4165_v30 = vsub.f32 %v4158_v5, %v4164_v2 }
0x16a8   :  { %v4166_v27 = vmul.f32 %v4165_v30, %v4165_v30 }
0x16aa   :  { %v4167_v26 = vsel %vm200_vm3, %v4166_v27, 0.0 }
0x16ab   :  { %4168 = vadd.xlane.f32.xlu1 %v4167_v26 }
0x1738   :  { %v4169_v53 = vpop.xlane.xlu1 %4168 }
0x1739   :  { %v4170_v41 = vmul.f32 0.03125, %v4169_v53 }
0x173b   :  { %v4171_v23 = vadd.f32 1e-05, %v4170_v41 }
0x173d   :  { %5914 = vrsqrt.f32 %v4171_v23 }
0x1741   :  { %v3973_v62 = vpop.f32.mrb[128].mxu1 }
0x1742   :  { %v3974_v48 = vadd.f32 %v7694_v50, %v3973_v62  ;;  %v5272_v38 = vpop.f32.mrb[129].mxu1 }
0x1743   :  { %v3976_v57 = vpop.f32.mrb[130].mxu1 }
0x1744   :  { %v3983_v3 = vmul.f32 %v3974_v48, %v3974_v48  ;;  %v5273_v21 = vpop.f32.mrb[131].mxu1 }
0x1746   :  { %v3988_v18 = vmul.f32 %v3983_v3, %v3974_v48 }
0x1747   :  { %v5915_v22 = vpop.eup %5914 }
0x1748   :  { %v4173_v10 = vmul.f32 %v5915_v22, %v4165_v30  ;;  %v3993_v56 = vmul.f32 0.044715, %v3988_v18 }
0x174a   :  { %v4180_v29 = vmul.f32 %v4505_v1, %v4173_v10  ;;  %v3998_v51 = vadd.f32 %v3993_v56, %v3974_v48 }
0x174c   :  { %v4187_v14 = vadd.f32 %v4506_v31, %v4180_v29  ;;  %v4003_v50 = vmul.f32 0.7978846, %v3998_v51 }
0x174e   :  { %v4188_v8 = vpack.c.bf16 %v4187_v14, %v4187_v14  ;;  %5916 = vtanh.f32 %v4003_v50 }
0x1750   :  { %5307 = vmatmul.mubr.msk.bf16.vlgmr.msra.gmra.mrb[132].mxu1 %vm187_vm2, %v4188_v8 }
0x1758   :  { %v5917_v24 = vpop.eup %5916 }
0x1759   :  { %v4013_v12 = vadd.f32 1.0, %v5917_v24 }
0x175b   :  { %v4018_v52 = vmul.f32 0.5, %v4013_v12 }
0x175d   :  { %v4023_v0 = vmul.f32 %v4018_v52, %v3974_v48 }
0x175f   :  { %v4026_v7 = vpack.c.bf16 %v4023_v0, %v4023_v0 }
0x1761   :  { %5299 = vmatmul.mubr.bf16.gmra.mrb[132].mxu0 %v4026_v7 }
0x1823   :  { %v4249_v28 = vpop.f32.mrb[132].mxu1 }
0x1824   :  { %v4250_v32 = vadd.f32 %v4507_v20, %v4249_v28  ;;  %v5308_v6 = vpop.f32.mrb[133].mxu1 }
0x1825   :  { %v4252_v16 = vpop.f32.mrb[134].mxu1 }
0x1826   :  { %4255 = vst [vmem:[#allocation2] sm:$0x3] %v4250_v32  ;;  %v5309_v49 = vpop.f32.mrb[135].mxu1 }
0x1827   :  { %5934 = shalt.err (!%p5931_p4)
}
0x1828   :  { %s5935_s19 = scalar_lea.hbm %s7770_s20, 32 }
0x1829   :  { %p5936_p5 = scmp.ne.s32.totalorder %s7770_s20, %s5935_s19  ;;  %p5939_p6 = scmp.lt.u32.totalorder %s5935_s19, %s7770_s20 }
0x182b   :  { %p5941_p7 = pnand %p5939_p6, %p5936_p5 }
0x182d   :  { %5944 = shalt.err (!%p5941_p7)
}
0x182e   :  { %4265 = dma.vmem_to_hbm [thread:$0]  %s4263_s17, 32, %s7770_s20, [#allocation3]  }
0x1834   :  { %v4140_v47 = vpop.f32.mrb[132].mxu0 }
0x1835   :  { %v5300_v60 = vpop.f32.mrb[133].mxu0 }
0x1836   :  { %v4142_v34 = vpop.f32.mrb[134].mxu0 }
0x1837   :  { %v5301_v39 = vpop.f32.mrb[135].mxu0 }
0x1838   :  { %5945 = dma.done.wait [#allocation3], 32  }
0x1839   :  { %5946 = vsyncadd [#allocation3], 4294967264 }
0x183a   :  { %4269 = vsyncpa [#allocation3], 1 }

</bundles_post_ra>
